<compile_context>
chip_gen: v7x
topology: tpu7x:2x2x1
jax: 0.10.0
libtpu: 0.0.40
codegen_flags: <defaults>
</compile_context>

<pallas_src>
import jax
import jax.numpy as jnp
from jax.experimental import pallas as pl
from jax.experimental.pallas import tpu as pltpu  # noqa: F401  (kept per template)


# ----------------------------------------------------------------------------
# Pallas kernels
# ----------------------------------------------------------------------------
def _conv_mm_kernel(cols_ref, w_ref, b_ref, o_ref):
    # cols_ref: (K, M) bf16, w_ref: (Cout, K) bf16, b_ref: (Cout, 1) f32
    # o_ref:    (Cout, M) bf16  -- lane-dense along the big M = N*Ho*Wo dim.
    acc = jnp.dot(w_ref[...], cols_ref[...],
                  preferred_element_type=jnp.float32)
    o_ref[...] = jnp.maximum(acc + b_ref[...], 0.0).astype(o_ref.dtype)


def _fc_fused_kernel(x_ref, w1_ref, b1_ref, w2_ref, b2_ref, w3_ref, b3_ref,
                     o_ref):
    # Fused fc1 -> relu -> fc2 -> relu -> fc3.  Intermediates stay in VMEM.
    # x_ref: (N, 1944) bf16; weights bf16 [in, out]; biases f32 (1, out).
    h = jnp.dot(x_ref[...], w1_ref[...], preferred_element_type=jnp.float32)
    h = jnp.maximum(h + b1_ref[...], 0.0)
    h = jnp.dot(h.astype(w2_ref.dtype), w2_ref[...],
                preferred_element_type=jnp.float32)
    h = jnp.maximum(h + b2_ref[...], 0.0)
    o = jnp.dot(h.astype(w3_ref.dtype), w3_ref[...],
                preferred_element_type=jnp.float32)
    o_ref[...] = o + b3_ref[...]


# ----------------------------------------------------------------------------
# Wrappers (gridless, full-block — everything fits VMEM with large margin)
# ----------------------------------------------------------------------------
def conv_relu_lane_dense(cols_T, w_mat, b_col):
    """bf16 ReLU(W @ cols + b): cols_T [K, M] bf16, w_mat [Cout, K] bf16."""
    cout = w_mat.shape[0]
    m = cols_T.shape[1]
    return pl.pallas_call(
        _conv_mm_kernel,
        out_shape=jax.ShapeDtypeStruct((cout, m), jnp.bfloat16),
    )(cols_T, w_mat, b_col)


def fc_fused(x, p):
    """Fused fc1->relu->fc2->relu->fc3 in a single pallas_call."""
    n = x.shape[0]
    return pl.pallas_call(
        _fc_fused_kernel,
        out_shape=jax.ShapeDtypeStruct((n, p["fw3"].shape[1]), jnp.float32),
    )(x, p["fw1"], p["fb1"], p["fw2"], p["fb2"], p["fw3"], p["fb3"])


# ----------------------------------------------------------------------------
# XLA glue (tiny tensors; kept minimal)
# ----------------------------------------------------------------------------
def _im2col_T(y_cf, k):
    """y_cf: [Cin, N, H, W] (bf16) -> cols_T [Cin*k*k, N*Ho*Wo].

    One slice per (kh, kw): 25 pieces of [Cin, M], concatenated along K.
    Row order is (kh, kw, ci) — matches weights permuted to [Cout, kh, kw, Cin].
    """
    cin, n, h, w = y_cf.shape
    ho, wo = h - k + 1, w - k + 1
    pieces = [
        y_cf[:, :, dy:dy + ho, dx:dx + wo].reshape(cin, n * ho * wo)
        for dy in range(k) for dx in range(k)
    ]
    return jnp.concatenate(pieces, axis=0), (ho, wo)


def _maxpool2x2_cf(y):
    """2x2 max-pool, stride 2, on [C, N, H, W]; dtype-preserving (bf16)."""
    c, n, h, w = y.shape
    return y.reshape(c, n, h // 2, 2, w // 2, 2).max(axis=(3, 5))


def net_forward(x, p):
    n = x.shape[0]
    # Channel-leading bf16 activations [C, N, H, W]: feeds lane-dense im2col
    # for both convs; the single f32->bf16 cast of x happens here, once.
    y = jnp.transpose(x.astype(jnp.bfloat16), (1, 0, 2, 3))  # [1, N, 48, 48]

    # conv1 (1->6, k=5) + ReLU, then 2x2 pool
    cols, (ho, wo) = _im2col_T(y, 5)                      # [25, N*44*44] bf16
    y = conv_relu_lane_dense(cols, p["w1m"], p["b1c"])    # [6, N*44*44] bf16
    y = _maxpool2x2_cf(y.reshape(6, n, ho, wo))           # [6, N, 22, 22]

    # conv2 (6->24, k=5) + ReLU, then 2x2 pool
    cols, (ho, wo) = _im2col_T(y, 5)                      # [150, N*18*18] bf16
    y = conv_relu_lane_dense(cols, p["w2m"], p["b2c"])    # [24, N*18*18] bf16
    y = _maxpool2x2_cf(y.reshape(24, n, ho, wo))          # [24, N, 9, 9]

    # flatten in torch's (C, H, W) order: .view(-1, 24*9*9) on NCHW (15 KB op)
    feat = jnp.transpose(y, (1, 0, 2, 3)).reshape(n, 24 * 9 * 9)  # bf16

    # fused fc chain: 1944 -> 486 -> 84 -> 7
    return fc_fused(feat, p)


# ----------------------------------------------------------------------------
# One-time parameter preparation (outside the jitted per-step path):
# reshape / permute / cast every weight & bias to its kernel dtype exactly once.
# ----------------------------------------------------------------------------
def prepare_params(raw):
    bf16, f32 = jnp.bfloat16, jnp.float32

    def conv_w(w):
        # [Cout, Cin, kh, kw] -> [Cout, (kh, kw, Cin)] to match im2col row order.
        cout = w.shape[0]
        return jnp.transpose(w, (0, 2, 3, 1)).reshape(cout, -1).astype(bf16)

    return {
        "w1m": conv_w(raw["w1"]), "b1c": raw["b1"].reshape(-1, 1).astype(f32),
        "w2m": conv_w(raw["w2"]), "b2c": raw["b2"].reshape(-1, 1).astype(f32),
        "fw1": raw["fw1"].astype(bf16), "fb1": raw["fb1"].reshape(1, -1).astype(f32),
        "fw2": raw["fw2"].astype(bf16), "fb2": raw["fb2"].reshape(1, -1).astype(f32),
        "fw3": raw["fw3"].astype(bf16), "fb3": raw["fb3"].reshape(1, -1).astype(f32),
    }


# ----------------------------------------------------------------------------
# Deterministic parameter init (PyTorch-like uniform(-1/sqrt(fan_in), ...))
# ----------------------------------------------------------------------------
def init_params(key):
    keys = jax.random.split(key, 10)

    def u(k, shape, fan_in):
        bound = 1.0 / float(fan_in) ** 0.5
        return jax.random.uniform(k, shape, jnp.float32, -bound, bound)

    return {
        "w1": u(keys[0], (6, 1, 5, 5), 1 * 25),
        "b1": u(keys[1], (6,), 1 * 25),
        "w2": u(keys[2], (24, 6, 5, 5), 6 * 25),
        "b2": u(keys[3], (24,), 6 * 25),
        "fw1": u(keys[4], (24 * 9 * 9, 486), 24 * 9 * 9),
        "fb1": u(keys[5], (486,), 24 * 9 * 9),
        "fw2": u(keys[6], (486, 84), 486),
        "fb2": u(keys[7], (84,), 486),
        "fw3": u(keys[8], (84, 7), 84),
        "fb3": u(keys[9], (7,), 84),
    }


if __name__ == "__main__":
    key = jax.random.PRNGKey(0)
    pkey, xkey = jax.random.split(key)
    params = prepare_params(init_params(pkey))   # one-time, outside jit
    # Input spatial size 48x48 is required so that the flatten dim is 24*9*9.
    x = jax.random.normal(xkey, (2, 1, 48, 48), jnp.float32)
    out = jax.jit(net_forward)(x, params)
    jax.block_until_ready(out)
    assert out.shape == (2, 7), out.shape
    print("KERNEL_OK")
</pallas_src>

<mosaic_0001>
module attributes {stable_mosaic.version = 11 : i64} {
  func.func @_conv_mm_kernel(%arg0: memref<25x3872xbf16, #tpu.memory_space<vmem>>, %arg1: memref<6x25xbf16, #tpu.memory_space<vmem>>, %arg2: memref<6x1xf32, #tpu.memory_space<vmem>>, %arg3: memref<6x3872xbf16, #tpu.memory_space<vmem>>) attributes {dimension_semantics = [], scalar_prefetch = 0 : i64, scratch_operands = 0 : i64, tpu.core_type = #tpu.core_type<tc>} {
    %c0 = arith.constant 0 : index
    %c0_0 = arith.constant 0 : index
    %0 = vector.load %arg1[%c0, %c0_0] : memref<6x25xbf16, #tpu.memory_space<vmem>>, vector<6x25xbf16>
    %c0_1 = arith.constant 0 : index
    %c0_2 = arith.constant 0 : index
    %1 = vector.load %arg0[%c0_1, %c0_2] : memref<25x3872xbf16, #tpu.memory_space<vmem>>, vector<25x3872xbf16>
    %cst = arith.constant dense<0.000000e+00> : vector<6x3872xf32>
    %2 = tpu.matmul %0, %1, %cst {dimension_numbers = #tpu.dot_dimension_numbers<[1], [0], [0], [1], [0, 0, 1, 1], [], []>} : vector<6x25xbf16>, vector<25x3872xbf16>, vector<6x3872xf32> -> vector<6x3872xf32>
    %c0_3 = arith.constant 0 : index
    %c0_4 = arith.constant 0 : index
    %3 = vector.load %arg2[%c0_3, %c0_4] : memref<6x1xf32, #tpu.memory_space<vmem>>, vector<6x1xf32>
    %4 = vector.broadcast %3 : vector<6x1xf32> to vector<6x3872xf32>
    %5 = arith.addf %2, %4 : vector<6x3872xf32>
    %cst_5 = arith.constant 0.000000e+00 : f32
    %6 = vector.broadcast %cst_5 : f32 to vector<6x3872xf32>
    %7 = arith.maximumf %5, %6 : vector<6x3872xf32>
    %8 = arith.truncf %7 : vector<6x3872xf32> to vector<6x3872xbf16>
    %c0_6 = arith.constant 0 : index
    %c0_7 = arith.constant 0 : index
    %9 = vector.load %arg3[%c0_6, %c0_7] : memref<6x3872xbf16, #tpu.memory_space<vmem>>, vector<6x3872xbf16>
    tpu.vector_store %arg3[%c0_6, %c0_7], %8 {strides = array<i32>} : memref<6x3872xbf16, #tpu.memory_space<vmem>>, vector<6x3872xbf16>,
    return
  }
}

module attributes {stable_mosaic.version = 11 : i64} {
  func.func @_conv_mm_kernel(%arg0: memref<150x648xbf16, #tpu.memory_space<vmem>>, %arg1: memref<24x150xbf16, #tpu.memory_space<vmem>>, %arg2: memref<24x1xf32, #tpu.memory_space<vmem>>, %arg3: memref<24x648xbf16, #tpu.memory_space<vmem>>) attributes {dimension_semantics = [], scalar_prefetch = 0 : i64, scratch_operands = 0 : i64, tpu.core_type = #tpu.core_type<tc>} {
    %c0 = arith.constant 0 : index
    %c0_0 = arith.constant 0 : index
    %0 = vector.load %arg1[%c0, %c0_0] : memref<24x150xbf16, #tpu.memory_space<vmem>>, vector<24x150xbf16>
    %c0_1 = arith.constant 0 : index
    %c0_2 = arith.constant 0 : index
    %1 = vector.load %arg0[%c0_1, %c0_2] : memref<150x648xbf16, #tpu.memory_space<vmem>>, vector<150x648xbf16>
    %cst = arith.constant dense<0.000000e+00> : vector<24x648xf32>
    %2 = tpu.matmul %0, %1, %cst {dimension_numbers = #tpu.dot_dimension_numbers<[1], [0], [0], [1], [0, 0, 1, 1], [], []>} : vector<24x150xbf16>, vector<150x648xbf16>, vector<24x648xf32> -> vector<24x648xf32>
    %c0_3 = arith.constant 0 : index
    %c0_4 = arith.constant 0 : index
    %3 = vector.load %arg2[%c0_3, %c0_4] : memref<24x1xf32, #tpu.memory_space<vmem>>, vector<24x1xf32>
    %4 = vector.broadcast %3 : vector<24x1xf32> to vector<24x648xf32>
    %5 = arith.addf %2, %4 : vector<24x648xf32>
    %cst_5 = arith.constant 0.000000e+00 : f32
    %6 = vector.broadcast %cst_5 : f32 to vector<24x648xf32>
    %7 = arith.maximumf %5, %6 : vector<24x648xf32>
    %8 = arith.truncf %7 : vector<24x648xf32> to vector<24x648xbf16>
    %c0_6 = arith.constant 0 : index
    %c0_7 = arith.constant 0 : index
    %9 = vector.load %arg3[%c0_6, %c0_7] : memref<24x648xbf16, #tpu.memory_space<vmem>>, vector<24x648xbf16>
    tpu.vector_store %arg3[%c0_6, %c0_7], %8 {strides = array<i32>} : memref<24x648xbf16, #tpu.memory_space<vmem>>, vector<24x648xbf16>,
    return
  }
}

module attributes {stable_mosaic.version = 11 : i64} {
  func.func @_fc_fused_kernel(%arg0: memref<2x1944xbf16, #tpu.memory_space<vmem>>, %arg1: memref<1944x486xbf16, #tpu.memory_space<vmem>>, %arg2: memref<1x486xf32, #tpu.memory_space<vmem>>, %arg3: memref<486x84xbf16, #tpu.memory_space<vmem>>, %arg4: memref<1x84xf32, #tpu.memory_space<vmem>>, %arg5: memref<84x7xbf16, #tpu.memory_space<vmem>>, %arg6: memref<1x7xf32, #tpu.memory_space<vmem>>, %arg7: memref<2x7xf32, #tpu.memory_space<vmem>>) attributes {dimension_semantics = [], scalar_prefetch = 0 : i64, scratch_operands = 0 : i64, tpu.core_type = #tpu.core_type<tc>} {
    %c0 = arith.constant 0 : index
    %c0_0 = arith.constant 0 : index
    %0 = vector.load %arg0[%c0, %c0_0] : memref<2x1944xbf16, #tpu.memory_space<vmem>>, vector<2x1944xbf16>
    %c0_1 = arith.constant 0 : index
    %c0_2 = arith.constant 0 : index
    %1 = vector.load %arg1[%c0_1, %c0_2] : memref<1944x486xbf16, #tpu.memory_space<vmem>>, vector<1944x486xbf16>
    %cst = arith.constant dense<0.000000e+00> : vector<2x486xf32>
    %2 = tpu.matmul %0, %1, %cst {dimension_numbers = #tpu.dot_dimension_numbers<[1], [0], [0], [1], [0, 0, 1, 1], [], []>} : vector<2x1944xbf16>, vector<1944x486xbf16>, vector<2x486xf32> -> vector<2x486xf32>
    %c0_3 = arith.constant 0 : index
    %c0_4 = arith.constant 0 : index
    %3 = vector.load %arg2[%c0_3, %c0_4] : memref<1x486xf32, #tpu.memory_space<vmem>>, vector<1x486xf32>
    %4 = vector.broadcast %3 : vector<1x486xf32> to vector<2x486xf32>
    %5 = arith.addf %2, %4 : vector<2x486xf32>
    %cst_5 = arith.constant 0.000000e+00 : f32
    %6 = vector.broadcast %cst_5 : f32 to vector<2x486xf32>
    %7 = arith.maximumf %5, %6 : vector<2x486xf32>
    %8 = arith.truncf %7 : vector<2x486xf32> to vector<2x486xbf16>
    %c0_6 = arith.constant 0 : index
    %c0_7 = arith.constant 0 : index
    %9 = vector.load %arg3[%c0_6, %c0_7] : memref<486x84xbf16, #tpu.memory_space<vmem>>, vector<486x84xbf16>
    %cst_8 = arith.constant dense<0.000000e+00> : vector<2x84xf32>
    %10 = tpu.matmul %8, %9, %cst_8 {dimension_numbers = #tpu.dot_dimension_numbers<[1], [0], [0], [1], [0, 0, 1, 1], [], []>} : vector<2x486xbf16>, vector<486x84xbf16>, vector<2x84xf32> -> vector<2x84xf32>
    %c0_9 = arith.constant 0 : index
    %c0_10 = arith.constant 0 : index
    %11 = vector.load %arg4[%c0_9, %c0_10] : memref<1x84xf32, #tpu.memory_space<vmem>>, vector<1x84xf32>
    %12 = vector.broadcast %11 : vector<1x84xf32> to vector<2x84xf32>
    %13 = arith.addf %10, %12 : vector<2x84xf32>
    %cst_11 = arith.constant 0.000000e+00 : f32
    %14 = vector.broadcast %cst_11 : f32 to vector<2x84xf32>
    %15 = arith.maximumf %13, %14 : vector<2x84xf32>
    %16 = arith.truncf %15 : vector<2x84xf32> to vector<2x84xbf16>
    %c0_12 = arith.constant 0 : index
    %c0_13 = arith.constant 0 : index
    %17 = vector.load %arg5[%c0_12, %c0_13] : memref<84x7xbf16, #tpu.memory_space<vmem>>, vector<84x7xbf16>
    %cst_14 = arith.constant dense<0.000000e+00> : vector<2x7xf32>
    %18 = tpu.matmul %16, %17, %cst_14 {dimension_numbers = #tpu.dot_dimension_numbers<[1], [0], [0], [1], [0, 0, 1, 1], [], []>} : vector<2x84xbf16>, vector<84x7xbf16>, vector<2x7xf32> -> vector<2x7xf32>
    %c0_15 = arith.constant 0 : index
    %c0_16 = arith.constant 0 : index
    %19 = vector.load %arg6[%c0_15, %c0_16] : memref<1x7xf32, #tpu.memory_space<vmem>>, vector<1x7xf32>
    %20 = vector.broadcast %19 : vector<1x7xf32> to vector<2x7xf32>
    %21 = arith.addf %18, %20 : vector<2x7xf32>
    %c0_17 = arith.constant 0 : index
    %c0_18 = arith.constant 0 : index
    %22 = vector.load %arg7[%c0_17, %c0_18] : memref<2x7xf32, #tpu.memory_space<vmem>>, vector<2x7xf32>
    tpu.vector_store %arg7[%c0_17, %c0_18], %21 {strides = array<i32>} : memref<2x7xf32, #tpu.memory_space<vmem>>, vector<2x7xf32>,
    return
  }
}

</mosaic_0001>

<bundles_post_ra>
// kernel: net_forward.3
= control target key start
LH: loop header
LB: loop body
LE: loop exit
PB: predicated region body
PF: predicated region fallthrough
CT: control target
= control target key end

     0   :  { %vm371_vm0 = vcmask 1043456   ;;  %vm372_vm1 = vcmask 1044480   ;;  %v1518_v1 = vmov 65535   ;;  %v1519_v3 = vmov 0   ;;  %s1898_s0 = inlined_call_operand.vmem [shape: bf16[25,3872], index: 0, kind: input, shape index: {}]   ;;  %s1899_s1 = inlined_call_operand.vmem [shape: bf16[6,25], index: 1, kind: input, shape index: {}]   ;;  %s1900_s2 = inlined_call_operand.vmem [shape: f32[6,1], index: 2, kind: input, shape index: {}]   ;;  %s1901_s3 = inlined_call_operand.vmem [shape: bf16[6,3872], index: 3, kind: output, shape index: {}]  }
   0x1   :  { %v1426_v0 = vld [vmem:[%s1898_s0 + $0x4] ss:$124 sps:$4 sm:$0xff]   ;;  %v373_v2 = vsel %vm371_vm0, 4294967295, %v1518_v1  ;;  %500 = vmatprep.mubr.bf16.mxu0 %v1519_v3  ;;  %541 = vmatprep.mubr.bf16.mxu1 %v1519_v3  ;;  %v1428_v4 = vld [vmem:[%s1898_s0 + $0xc] ss:$124 sps:$4 sm:$0xff]   ;;  %vm367_vm2 = vcmask 203776  }
   0x2   :  { %1425 = vset.pattern.permute.xlu0 %v1519_v3  ;;  %468 = vmatprep.subr.bf16.mxu0 %v1426_v0  ;;  %v1430_v5 = vld [vmem:[%s1898_s0] ss:$124 sps:$4 sm:$0xff]   ;;  %v1431_v6 = vld [vmem:[%s1898_s0 + $0x8] ss:$124 sps:$4 sm:$0xff]   ;;  %v1557_v7 = vsel %vm372_vm1, %v373_v2, 0  ;;  %vm1521_vm3 = vmmov 0  }
   0x3   :  { %509 = vmatprep.subr.bf16.mxu1 %v1428_v4  ;;  %v1432_v8 = vld [vmem:[%s1898_s0 + $0xfc] ss:$124 sps:$4 sm:$0x1f]   ;;  %469 = vmatpush1.bf16.msra.mxu0 %v1430_v5  ;;  %v1434_v9 = vld [vmem:[%s1898_s0 + $0x104] ss:$124 sps:$4 sm:$0x1f]  }
   0x4   :  { %510 = vmatpush1.bf16.msra.mxu1 %v1431_v6  ;;  %v379_v10 = vand.u32 %v1432_v8, %v1557_v7  ;;  %v1436_v11 = vld [vmem:[%s1898_s0 + $0xf8] ss:$124 sps:$4 sm:$0x1f]   ;;  %v1437_v12 = vld [vmem:[%s1898_s0 + $0x100] ss:$124 sps:$4 sm:$0x1f]   ;;  %v385_v13 = vand.u32 %v1434_v9, %v1557_v7 }
   0x5   :  { %v376_v14 = vand.u32 %v1436_v11, %v1557_v7  ;;  %v382_v15 = vand.u32 %v1437_v12, %v1557_v7  ;;  %v1578_v16 = vld [vmem:[%s1899_s1] sm:$0x7]  ;;  %v1438_v17 = vld [vmem:[%s1898_s0 + $0x10] ss:$124 sps:$4 sm:$0xff]   ;;  %v1441_v19 = vld [vmem:[%s1898_s0 + $0x18] ss:$124 sps:$4 sm:$0xff]  }
   0x6   :  { %470 = vmatprep.subr.bf16.mxu0 %v379_v10  ;;  %v1440_v18 = vld [vmem:[%s1898_s0 + $0x14] ss:$124 sps:$4 sm:$0xff]   ;;  %511 = vmatprep.subr.bf16.mxu1 %v385_v13  ;;  %v1443_v20 = vld [vmem:[%s1898_s0 + $0x1c] ss:$124 sps:$4 sm:$0xff]   ;;  %v1452_v29 = vld [vmem:[%s1898_s0 + $0x24] ss:$124 sps:$4 sm:$0xff]  }
   0x7   :  { %471 = vmatpush1.bf16.msra.mxu0 %v376_v14  ;;  %v1444_v21 = vld [vmem:[%s1898_s0 + $0x108] ss:$124 sps:$4 sm:$0x1f]   ;;  %v1447_v23 = vld [vmem:[%s1898_s0 + $0x110] ss:$124 sps:$4 sm:$0x1f]  }
   0x8   :  { %512 = vmatpush1.bf16.msra.mxu1 %v382_v15  ;;  %550 = vmatprep.subr.bf16.mxu0 %v1440_v18  ;;  %v1446_v22 = vld [vmem:[%s1898_s0 + $0x10c] ss:$124 sps:$4 sm:$0x1f]   ;;  %v1449_v24 = vld [vmem:[%s1898_s0 + $0x114] ss:$124 sps:$4 sm:$0x1f]   ;;  %v388_v27 = vand.u32 %v1444_v21, %v1557_v7  ;;  %v394_v28 = vand.u32 %v1447_v23, %v1557_v7 }
   0x9   :  { %591 = vmatprep.subr.bf16.mxu1 %v1443_v20  ;;  %v391_v25 = vand.u32 %v1446_v22, %v1557_v7  ;;  %v397_v26 = vand.u32 %v1449_v24, %v1557_v7  ;;  %v1455_v30 = vld [vmem:[%s1898_s0 + $0x2c] ss:$124 sps:$4 sm:$0xff]   ;;  %v1450_v31 = vld [vmem:[%s1898_s0 + $0x20] ss:$124 sps:$4 sm:$0xff]   ;;  %v1464_v39 = vld [vmem:[%s1898_s0 + $0x34] ss:$124 sps:$4 sm:$0xff]  }
   0xa   :  { %1362 = vmatmul.mubr.msk.bf16.vlgmr.msra.gmra.mrb[0].mxu0 %vm367_vm2, %v1578_v16  ;;  %v1453_v32 = vld [vmem:[%s1898_s0 + $0x28] ss:$124 sps:$4 sm:$0xff]   ;;  %v1456_v33 = vld [vmem:[%s1898_s0 + $0x118] ss:$124 sps:$4 sm:$0x1f]   ;;  %vm1294_vm4 = vcmask 256000  }
   0xb   :  { %1363 = vmatmul.mubr.msk.bf16.vlgmr.msra.gmra.mrb[0].mxu1 %vm367_vm2, %v1578_v16  ;;  %551 = vmatpush1.bf16.msra.mxu0 %v1438_v17  ;;  %v1458_v34 = vld [vmem:[%s1898_s0 + $0x11c] ss:$124 sps:$4 sm:$0x1f]   ;;  %v1461_v36 = vld [vmem:[%s1898_s0 + $0x124] ss:$124 sps:$4 sm:$0x1f]   ;;  %v400_v40 = vand.u32 %v1456_v33, %v1557_v7 }
   0xc   :  { %592 = vmatpush1.bf16.msra.mxu1 %v1441_v19  ;;  %552 = vmatprep.subr.bf16.mxu0 %v391_v25  ;;  %v1459_v35 = vld [vmem:[%s1898_s0 + $0x120] ss:$124 sps:$4 sm:$0x1f]   ;;  %v403_v37 = vand.u32 %v1458_v34, %v1557_v7  ;;  %v409_v38 = vand.u32 %v1461_v36, %v1557_v7  ;;  %v1470_v43 = vld [vmem:[%s1898_s0 + $0x12c] ss:$124 sps:$4 sm:$0x1f]  }
   0xd   :  { %582 = vmatprep.mubr.bf16.mxu0 %v1519_v3  ;;  %593 = vmatprep.subr.bf16.mxu1 %v397_v26  ;;  %v406_v41 = vand.u32 %v1459_v35, %v1557_v7  ;;  %v1467_v42 = vld [vmem:[%s1898_s0 + $0x3c] ss:$124 sps:$4 sm:$0xff]   ;;  %v1473_v44 = vld [vmem:[%s1898_s0 + $0x134] ss:$124 sps:$4 sm:$0x1f]   ;;  %v415_v49 = vand.u32 %v1470_v43, %v1557_v7  ;;  %v1520_v35 = vmov 0.0  }
   0xe   :  { %623 = vmatprep.mubr.bf16.mxu1 %v1519_v3  ;;  %v1462_v45 = vld [vmem:[%s1898_s0 + $0x30] ss:$124 sps:$4 sm:$0xff]   ;;  %v1468_v46 = vld [vmem:[%s1898_s0 + $0x128] ss:$124 sps:$4 sm:$0x1f]   ;;  %v421_v50 = vand.u32 %v1473_v44, %v1557_v7 }
   0xf   :  { %553 = vmatpush1.bf16.msra.mxu0 %v388_v27  ;;  %v1465_v47 = vld [vmem:[%s1898_s0 + $0x38] ss:$124 sps:$4 sm:$0xff]   ;;  %v1471_v48 = vld [vmem:[%s1898_s0 + $0x130] ss:$124 sps:$4 sm:$0x1f]   ;;  %v412_v52 = vand.u32 %v1468_v46, %v1557_v7 }
  0x10   :  { %594 = vmatpush1.bf16.msra.mxu1 %v394_v28  ;;  %632 = vmatprep.subr.bf16.mxu0 %v1452_v29  ;;  %v1476_v51 = vld [vmem:[%s1898_s0 + $0x44] ss:$124 sps:$4 sm:$0xff]   ;;  %v418_v53 = vand.u32 %v1471_v48, %v1557_v7  ;;  %v1479_v54 = vld [vmem:[%s1898_s0 + $0x4c] ss:$124 sps:$4 sm:$0xff]   ;;  %v1488_v63 = vld [vmem:[%s1898_s0 + $0x54] ss:$124 sps:$4 sm:$0xff]  }
  0x11   :  { %673 = vmatprep.subr.bf16.mxu1 %v1455_v30  ;;  %v1482_v55 = vld [vmem:[%s1898_s0 + $0x13c] ss:$124 sps:$4 sm:$0x1f]   ;;  %v1485_v56 = vld [vmem:[%s1898_s0 + $0x144] ss:$124 sps:$4 sm:$0x1f]  }
  0x12   :  { %1364 = vmatmul.mubr.msk.bf16.vlgmr.msra.gmra.mrb[4].mxu0 %vm367_vm2, %v1578_v16  ;;  %v1474_v57 = vld [vmem:[%s1898_s0 + $0x40] ss:$124 sps:$4 sm:$0xff]   ;;  %v1477_v58 = vld [vmem:[%s1898_s0 + $0x48] ss:$124 sps:$4 sm:$0xff]   ;;  %v427_v61 = vand.u32 %v1482_v55, %v1557_v7  ;;  %v433_v62 = vand.u32 %v1485_v56, %v1557_v7  ;;  %v1486_v6 = vld [vmem:[%s1898_s0 + $0x50] ss:$124 sps:$4 sm:$0xff]  }
  0x13   :  { %1365 = vmatmul.mubr.msk.bf16.vlgmr.msra.gmra.mrb[4].mxu1 %vm367_vm2, %v1578_v16  ;;  %633 = vmatpush1.bf16.msra.mxu0 %v1450_v31  ;;  %v1480_v59 = vld [vmem:[%s1898_s0 + $0x138] ss:$124 sps:$4 sm:$0x1f]   ;;  %v1483_v60 = vld [vmem:[%s1898_s0 + $0x140] ss:$124 sps:$4 sm:$0x1f]  }
  0x14   :  { %674 = vmatpush1.bf16.msra.mxu1 %v1453_v32  ;;  %634 = vmatprep.subr.bf16.mxu0 %v403_v37  ;;  %v1491_v0 = vld [vmem:[%s1898_s0 + $0x5c] ss:$124 sps:$4 sm:$0xff]   ;;  %v424_v1 = vand.u32 %v1480_v59, %v1557_v7  ;;  %v430_v2 = vand.u32 %v1483_v60, %v1557_v7  ;;  %v1494_v4 = vld [vmem:[%s1898_s0 + $0x14c] ss:$124 sps:$4 sm:$0x1f]  }
  0x15   :  { %675 = vmatprep.subr.bf16.mxu1 %v409_v38  ;;  %664 = vmatprep.mubr.bf16.mxu0 %v1519_v3  ;;  %v1497_v5 = vld [vmem:[%s1898_s0 + $0x154] ss:$124 sps:$4 sm:$0x1f]   ;;  %v1492_v8 = vld [vmem:[%s1898_s0 + $0x148] ss:$124 sps:$4 sm:$0x1f]   ;;  %v439_v11 = vand.u32 %v1494_v4, %v1557_v7 }
  0x16   :  { %705 = vmatprep.mubr.bf16.mxu1 %v1519_v3  ;;  %v1495_v9 = vld [vmem:[%s1898_s0 + $0x150] ss:$124 sps:$4 sm:$0x1f]   ;;  %v1489_v10 = vld [vmem:[%s1898_s0 + $0x58] ss:$124 sps:$4 sm:$0xff]   ;;  %v445_v12 = vand.u32 %v1497_v5, %v1557_v7  ;;  %v436_v13 = vand.u32 %v1492_v8, %v1557_v7 }
  0x17   :  { %635 = vmatpush1.bf16.msra.mxu0 %v400_v40  ;;  %v442_v14 = vand.u32 %v1495_v9, %v1557_v7  ;;  %v1500_v15 = vld [vmem:[%s1898_s0 + $0x64] ss:$124 sps:$4 sm:$0xff]   ;;  %v1503_v17 = vld [vmem:[%s1898_s0 + $0x6c] ss:$124 sps:$4 sm:$0xff]   ;;  %v1512_v29 = vld [vmem:[%s1898_s0 + $0x74] ss:$124 sps:$4 sm:$0xff]  }
  0x18   :  { %676 = vmatpush1.bf16.msra.mxu1 %v406_v41  ;;  %714 = vmatprep.subr.bf16.mxu0 %v1464_v39  ;;  %v80_v18 = vld [vmem:[%s1900_s2] sm:$0x3f]  ;;  %v1506_v19 = vld [vmem:[%s1898_s0 + $0x15c] ss:$124 sps:$4 sm:$0x1f]  }
  0x19   :  { %755 = vmatprep.subr.bf16.mxu1 %v1467_v42  ;;  %v1509_v20 = vld [vmem:[%s1898_s0 + $0x164] ss:$124 sps:$4 sm:$0x1f]   ;;  %83 = vperm.xlu0 %1425, %v80_v18   ;;  %v1504_v23 = vld [vmem:[%s1898_s0 + $0x158] ss:$124 sps:$4 sm:$0x1f]   ;;  %v451_v25 = vand.u32 %v1506_v19, %v1557_v7 }
  0x1a   :  { %1366 = vmatmul.mubr.msk.bf16.vlgmr.msra.gmra.mrb[8].mxu0 %vm367_vm2, %v1578_v16  ;;  %v1498_v21 = vld [vmem:[%s1898_s0 + $0x60] ss:$124 sps:$4 sm:$0xff]   ;;  %v1501_v22 = vld [vmem:[%s1898_s0 + $0x68] ss:$124 sps:$4 sm:$0xff]   ;;  %v457_v26 = vand.u32 %v1509_v20, %v1557_v7  ;;  %v448_v27 = vand.u32 %v1504_v23, %v1557_v7  ;;  %v1510_v31 = vld [vmem:[%s1898_s0 + $0x70] ss:$124 sps:$4 sm:$0xff]  }
  0x1b   :  { %1367 = vmatmul.mubr.msk.bf16.vlgmr.msra.gmra.mrb[8].mxu1 %vm367_vm2, %v1578_v16  ;;  %715 = vmatpush1.bf16.msra.mxu0 %v1462_v45  ;;  %v1507_v24 = vld [vmem:[%s1898_s0 + $0x160] ss:$124 sps:$4 sm:$0x1f]   ;;  %v1516_v30 = vld [vmem:[%s1898_s0 + $0x16c] ss:$124 sps:$4 sm:$0x1f]  }
  0x1c   :  { %756 = vmatpush1.bf16.msra.mxu1 %v1465_v47  ;;  %716 = vmatprep.subr.bf16.mxu0 %v415_v49  ;;  %v454_v28 = vand.u32 %v1507_v24, %v1557_v7  ;;  %v1513_v32 = vld [vmem:[%s1898_s0 + $0x78] ss:$124 sps:$4 sm:$0xff]   ;;  %v1514_v33 = vld [vmem:[%s1898_s0 + $0x168] ss:$124 sps:$4 sm:$0x1f]   ;;  %v463_v36 = vand.u32 %v1516_v30, %v1557_v7 }
  0x1d   :  { %757 = vmatprep.subr.bf16.mxu1 %v421_v50  ;;  %746 = vmatprep.mubr.bf16.mxu0 %v1519_v3  ;;  %v1517_v34 = vld [vmem:[%s1898_s0 + $0x170] ss:$124 sps:$4 sm:$0x1f]   ;;  %v460_v37 = vand.u32 %v1514_v33, %v1557_v7 }
  0x1e   :  { %787 = vmatprep.mubr.bf16.mxu1 %v1519_v3  ;;  %v466_v38 = vand.u32 %v1517_v34, %v1557_v7 }
  0x1f   :  { %717 = vmatpush1.bf16.msra.mxu0 %v412_v52 }
  0x20   :  { %758 = vmatpush1.bf16.msra.mxu1 %v418_v53  ;;  %796 = vmatprep.subr.bf16.mxu0 %v1476_v51 }
  0x21   :  { %837 = vmatprep.subr.bf16.mxu1 %v1479_v54 }
  0x22   :  { %1368 = vmatmul.mubr.msk.bf16.vlgmr.msra.gmra.mrb[12].mxu0 %vm367_vm2, %v1578_v16 }
  0x23   :  { %1369 = vmatmul.mubr.msk.bf16.vlgmr.msra.gmra.mrb[12].mxu1 %vm367_vm2, %v1578_v16  ;;  %797 = vmatpush1.bf16.msra.mxu0 %v1474_v57 }
  0x24   :  { %838 = vmatpush1.bf16.msra.mxu1 %v1477_v58  ;;  %798 = vmatprep.subr.bf16.mxu0 %v427_v61 }
  0x25   :  { %839 = vmatprep.subr.bf16.mxu1 %v433_v62  ;;  %828 = vmatprep.mubr.bf16.mxu0 %v1519_v3 }
  0x26   :  { %869 = vmatprep.mubr.bf16.mxu1 %v1519_v3 }
  0x27   :  { %799 = vmatpush1.bf16.msra.mxu0 %v424_v1 }
  0x28   :  { %840 = vmatpush1.bf16.msra.mxu1 %v430_v2  ;;  %878 = vmatprep.subr.bf16.mxu0 %v1488_v63 }
  0x29   :  { %919 = vmatprep.subr.bf16.mxu1 %v1491_v0 }
  0x2a   :  { %1370 = vmatmul.mubr.msk.bf16.vlgmr.msra.gmra.mrb[16].mxu0 %vm367_vm2, %v1578_v16 }
  0x2b   :  { %1371 = vmatmul.mubr.msk.bf16.vlgmr.msra.gmra.mrb[16].mxu1 %vm367_vm2, %v1578_v16  ;;  %879 = vmatpush1.bf16.msra.mxu0 %v1486_v6 }
  0x2c   :  { %920 = vmatpush1.bf16.msra.mxu1 %v1489_v10  ;;  %880 = vmatprep.subr.bf16.mxu0 %v439_v11 }
  0x2d   :  { %921 = vmatprep.subr.bf16.mxu1 %v445_v12  ;;  %910 = vmatprep.mubr.bf16.mxu0 %v1519_v3 }
  0x2e   :  { %951 = vmatprep.mubr.bf16.mxu1 %v1519_v3 }
  0x2f   :  { %881 = vmatpush1.bf16.msra.mxu0 %v436_v13 }
  0x30   :  { %922 = vmatpush1.bf16.msra.mxu1 %v442_v14  ;;  %960 = vmatprep.subr.bf16.mxu0 %v1500_v15 }
  0x31   :  { %1001 = vmatprep.subr.bf16.mxu1 %v1503_v17 }
  0x32   :  { %1372 = vmatmul.mubr.msk.bf16.vlgmr.msra.gmra.mrb[20].mxu0 %vm367_vm2, %v1578_v16 }
  0x33   :  { %1373 = vmatmul.mubr.msk.bf16.vlgmr.msra.gmra.mrb[20].mxu1 %vm367_vm2, %v1578_v16  ;;  %961 = vmatpush1.bf16.msra.mxu0 %v1498_v21 }
  0x34   :  { %1002 = vmatpush1.bf16.msra.mxu1 %v1501_v22  ;;  %962 = vmatprep.subr.bf16.mxu0 %v451_v25 }
  0x35   :  { %1003 = vmatprep.subr.bf16.mxu1 %v457_v26  ;;  %992 = vmatprep.mubr.bf16.mxu0 %v1519_v3 }
  0x36   :  { %1033 = vmatprep.mubr.bf16.mxu1 %v1519_v3 }
  0x37   :  { %963 = vmatpush1.bf16.msra.mxu0 %v448_v27 }
  0x38   :  { %1004 = vmatpush1.bf16.msra.mxu1 %v454_v28  ;;  %1042 = vmatprep.subr.bf16.mxu0 %v1512_v29 }
  0x39   :  { %1413 = vmatprep.subr.bf16.mxu1 %v1520_v35 }
  0x3a   :  { %1374 = vmatmul.mubr.msk.bf16.vlgmr.msra.gmra.mrb[24].mxu0 %vm367_vm2, %v1578_v16 }
  0x3b   :  { %1375 = vmatmul.mubr.msk.bf16.vlgmr.msra.gmra.mrb[24].mxu1 %vm367_vm2, %v1578_v16  ;;  %1043 = vmatpush1.bf16.msra.mxu0 %v1510_v31 }
  0x3c   :  { %1414 = vmatpush3.bf16.msra.mxu1 %v1513_v32  ;;  %1044 = vmatprep.subr.bf16.mxu0 %v463_v36 }
  0x3d   :  { %1415 = vmatprep.subr.bf16.mxu1 %v1520_v35  ;;  %1074 = vmatprep.mubr.bf16.mxu0 %v1519_v3 }
  0x3e   :  { %1417 = vmatprep.mubr.msk.bf16.mxu1 %vm1521_vm3, %v1520_v35 }
  0x3f   :  { %1045 = vmatpush1.bf16.msra.mxu0 %v460_v37 }
  0x40   :  { %1416 = vmatpush3.bf16.msra.mxu1 %v466_v38 }
  0x42   :  { %1376 = vmatmul.mubr.msk.bf16.vlgmr.msra.gmra.mrb[28].mxu0 %vm367_vm2, %v1578_v16 }
  0x43   :  { %1418 = vmatmul.mubr.msk.bf16.vlgmr.msra.gmra.mrb[28].mxu1 %vm367_vm2, %v1578_v16 }
  0x98   :  { %v1817_v39 = vpop.permute.xlu0 %83 }
  0xdd   :  { %v502_v40 = vpop.f32.mrb[0].mxu0 }
  0xde   :  { %v543_v41 = vpop.f32.mrb[0].mxu1  ;;  %v503_v7 = vadd.f32 %v502_v40, %v1817_v39  ;;  %v504_v42 = vpop.f32.mrb[1].mxu0 }
  0xdf   :  { %v544_v43 = vadd.f32 %v543_v41, %v1817_v39  ;;  %v545_v3 = vpop.f32.mrb[1].mxu1  ;;  %v505_v44 = vadd.f32 %v504_v42, %v1817_v39  ;;  %v506_v46 = vpop.f32.mrb[2].mxu0 }
  0xe0   :  { %v546_v45 = vadd.f32 %v545_v3, %v1817_v39  ;;  %v547_v47 = vpop.f32.mrb[2].mxu1  ;;  %v1123_v48 = vmax.f32 %v503_v7, 0.0  ;;  %v507_v50 = vpop.f32.mrb[3].mxu0 }
  0xe1   :  { %v1125_v49 = vmax.f32 %v544_v43, 0.0  ;;  %v548_v16 = vpop.f32.mrb[3].mxu1  ;;  %v1124_v51 = vmax.f32 %v505_v44, 0.0 }
  0xe2   :  { %v1126_v52 = vmax.f32 %v546_v45, 0.0 }
  0xe3   :  { %v1394_v53 = vpack.c.bf16 %v1124_v51, %v1123_v48 }
  0xe4   :  { %v1395_v54 = vpack.c.bf16 %v1126_v52, %v1125_v49 }
  0xe5   :  { %1279 = vst [vmem:[%s1901_s3] sm:$0x77] %v1394_v53  ;;  %v584_v55 = vpop.f32.mrb[4].mxu0 }
  0xe6   :  { %1280 = vst [vmem:[%s1901_s3 + $0x8] sm:$0x77] %v1395_v54  ;;  %v625_v56 = vpop.f32.mrb[4].mxu1  ;;  %v585_v57 = vadd.f32 %v584_v55, %v1817_v39  ;;  %v586_v59 = vpop.f32.mrb[5].mxu0 }
  0xe7   :  { %v626_v58 = vadd.f32 %v625_v56, %v1817_v39  ;;  %v627_v60 = vpop.f32.mrb[5].mxu1  ;;  %v587_v61 = vadd.f32 %v586_v59, %v1817_v39  ;;  %v588_v63 = vpop.f32.mrb[6].mxu0 }
  0xe8   :  { %v628_v62 = vadd.f32 %v627_v60, %v1817_v39  ;;  %v629_v0 = vpop.f32.mrb[6].mxu1  ;;  %v1127_v1 = vmax.f32 %v585_v57, 0.0  ;;  %v589_v4 = vpop.f32.mrb[7].mxu0 }
  0xe9   :  { %v1129_v2 = vmax.f32 %v626_v58, 0.0  ;;  %v630_v5 = vpop.f32.mrb[7].mxu1  ;;  %v1128_v6 = vmax.f32 %v587_v61, 0.0 }
  0xea   :  { %v1130_v8 = vmax.f32 %v628_v62, 0.0 }
  0xeb   :  { %v1396_v9 = vpack.c.bf16 %v1128_v6, %v1127_v1 }
  0xec   :  { %v1397_v10 = vpack.c.bf16 %v1130_v8, %v1129_v2 }
  0xed   :  { %1281 = vst [vmem:[%s1901_s3 + $0x10] sm:$0x77] %v1396_v9  ;;  %v666_v11 = vpop.f32.mrb[8].mxu0 }
  0xee   :  { %1282 = vst [vmem:[%s1901_s3 + $0x18] sm:$0x77] %v1397_v10  ;;  %v707_v12 = vpop.f32.mrb[8].mxu1  ;;  %v667_v13 = vadd.f32 %v666_v11, %v1817_v39  ;;  %v668_v15 = vpop.f32.mrb[9].mxu0 }
  0xef   :  { %v708_v14 = vadd.f32 %v707_v12, %v1817_v39  ;;  %v709_v17 = vpop.f32.mrb[9].mxu1  ;;  %v669_v18 = vadd.f32 %v668_v15, %v1817_v39  ;;  %v670_v20 = vpop.f32.mrb[10].mxu0 }
  0xf0   :  { %v710_v19 = vadd.f32 %v709_v17, %v1817_v39  ;;  %v711_v21 = vpop.f32.mrb[10].mxu1  ;;  %v1131_v22 = vmax.f32 %v667_v13, 0.0  ;;  %v671_v24 = vpop.f32.mrb[11].mxu0 }
  0xf1   :  { %v1133_v23 = vmax.f32 %v708_v14, 0.0  ;;  %v712_v25 = vpop.f32.mrb[11].mxu1  ;;  %v1132_v26 = vmax.f32 %v669_v18, 0.0 }
  0xf2   :  { %v1134_v27 = vmax.f32 %v710_v19, 0.0 }
  0xf3   :  { %v1398_v28 = vpack.c.bf16 %v1132_v26, %v1131_v22 }
  0xf4   :  { %v1399_v29 = vpack.c.bf16 %v1134_v27, %v1133_v23 }
  0xf5   :  { %1283 = vst [vmem:[%s1901_s3 + $0x20] sm:$0x77] %v1398_v28  ;;  %v748_v30 = vpop.f32.mrb[12].mxu0 }
  0xf6   :  { %1284 = vst [vmem:[%s1901_s3 + $0x28] sm:$0x77] %v1399_v29  ;;  %v789_v31 = vpop.f32.mrb[12].mxu1  ;;  %v749_v32 = vadd.f32 %v748_v30, %v1817_v39  ;;  %v750_v34 = vpop.f32.mrb[13].mxu0 }
  0xf7   :  { %v790_v33 = vadd.f32 %v789_v31, %v1817_v39  ;;  %v791_v35 = vpop.f32.mrb[13].mxu1  ;;  %v751_v36 = vadd.f32 %v750_v34, %v1817_v39  ;;  %v752_v38 = vpop.f32.mrb[14].mxu0 }
  0xf8   :  { %v792_v37 = vadd.f32 %v791_v35, %v1817_v39  ;;  %v793_v40 = vpop.f32.mrb[14].mxu1  ;;  %v1135_v41 = vmax.f32 %v749_v32, 0.0  ;;  %v753_v42 = vpop.f32.mrb[15].mxu0 }
  0xf9   :  { %v1137_v7 = vmax.f32 %v790_v33, 0.0  ;;  %v794_v43 = vpop.f32.mrb[15].mxu1  ;;  %v1136_v3 = vmax.f32 %v751_v36, 0.0 }
  0xfa   :  { %v1138_v44 = vmax.f32 %v792_v37, 0.0 }
  0xfb   :  { %v1400_v45 = vpack.c.bf16 %v1136_v3, %v1135_v41 }
  0xfc   :  { %v1401_v46 = vpack.c.bf16 %v1138_v44, %v1137_v7 }
  0xfd   :  { %1285 = vst [vmem:[%s1901_s3 + $0x30] sm:$0x77] %v1400_v45  ;;  %v830_v47 = vpop.f32.mrb[16].mxu0 }
  0xfe   :  { %1286 = vst [vmem:[%s1901_s3 + $0x38] sm:$0x77] %v1401_v46  ;;  %v871_v48 = vpop.f32.mrb[16].mxu1  ;;  %v831_v49 = vadd.f32 %v830_v47, %v1817_v39  ;;  %v832_v16 = vpop.f32.mrb[17].mxu0 }
  0xff   :  { %v872_v50 = vadd.f32 %v871_v48, %v1817_v39  ;;  %v873_v51 = vpop.f32.mrb[17].mxu1  ;;  %v833_v52 = vadd.f32 %v832_v16, %v1817_v39  ;;  %v834_v54 = vpop.f32.mrb[18].mxu0 }
 0x100   :  { %v874_v53 = vadd.f32 %v873_v51, %v1817_v39  ;;  %v875_v55 = vpop.f32.mrb[18].mxu1  ;;  %v1139_v56 = vmax.f32 %v831_v49, 0.0  ;;  %v835_v58 = vpop.f32.mrb[19].mxu0 }
 0x101   :  { %v1141_v57 = vmax.f32 %v872_v50, 0.0  ;;  %v876_v59 = vpop.f32.mrb[19].mxu1  ;;  %v1140_v60 = vmax.f32 %v833_v52, 0.0 }
 0x102   :  { %v1142_v61 = vmax.f32 %v874_v53, 0.0 }
 0x103   :  { %v1402_v62 = vpack.c.bf16 %v1140_v60, %v1139_v56 }
 0x104   :  { %v1403_v63 = vpack.c.bf16 %v1142_v61, %v1141_v57 }
 0x105   :  { %1287 = vst [vmem:[%s1901_s3 + $0x40] sm:$0x77] %v1402_v62  ;;  %v912_v0 = vpop.f32.mrb[20].mxu0 }
 0x106   :  { %1288 = vst [vmem:[%s1901_s3 + $0x48] sm:$0x77] %v1403_v63  ;;  %v953_v1 = vpop.f32.mrb[20].mxu1  ;;  %v913_v2 = vadd.f32 %v912_v0, %v1817_v39  ;;  %v914_v5 = vpop.f32.mrb[21].mxu0 }
 0x107   :  { %v954_v4 = vadd.f32 %v953_v1, %v1817_v39  ;;  %v955_v6 = vpop.f32.mrb[21].mxu1  ;;  %v915_v8 = vadd.f32 %v914_v5, %v1817_v39  ;;  %v916_v10 = vpop.f32.mrb[22].mxu0 }
 0x108   :  { %v956_v9 = vadd.f32 %v955_v6, %v1817_v39  ;;  %v957_v11 = vpop.f32.mrb[22].mxu1  ;;  %v1143_v12 = vmax.f32 %v913_v2, 0.0  ;;  %v917_v14 = vpop.f32.mrb[23].mxu0 }
 0x109   :  { %v1145_v13 = vmax.f32 %v954_v4, 0.0  ;;  %v958_v15 = vpop.f32.mrb[23].mxu1  ;;  %v1144_v17 = vmax.f32 %v915_v8, 0.0 }
 0x10a   :  { %v1146_v18 = vmax.f32 %v956_v9, 0.0 }
 0x10b   :  { %v1404_v19 = vpack.c.bf16 %v1144_v17, %v1143_v12 }
 0x10c   :  { %v1405_v20 = vpack.c.bf16 %v1146_v18, %v1145_v13 }
 0x10d   :  { %1289 = vst [vmem:[%s1901_s3 + $0x50] sm:$0x77] %v1404_v19  ;;  %v994_v21 = vpop.f32.mrb[24].mxu0 }
 0x10e   :  { %1290 = vst [vmem:[%s1901_s3 + $0x58] sm:$0x77] %v1405_v20  ;;  %v1035_v22 = vpop.f32.mrb[24].mxu1  ;;  %v995_v23 = vadd.f32 %v994_v21, %v1817_v39  ;;  %v996_v25 = vpop.f32.mrb[25].mxu0 }
 0x10f   :  { %v1036_v24 = vadd.f32 %v1035_v22, %v1817_v39  ;;  %v1037_v26 = vpop.f32.mrb[25].mxu1  ;;  %v997_v27 = vadd.f32 %v996_v25, %v1817_v39  ;;  %v998_v29 = vpop.f32.mrb[26].mxu0 }
 0x110   :  { %v1038_v28 = vadd.f32 %v1037_v26, %v1817_v39  ;;  %v1039_v30 = vpop.f32.mrb[26].mxu1  ;;  %v1147_v31 = vmax.f32 %v995_v23, 0.0  ;;  %v999_v33 = vpop.f32.mrb[27].mxu0 }
 0x111   :  { %v1149_v32 = vmax.f32 %v1036_v24, 0.0  ;;  %v1040_v34 = vpop.f32.mrb[27].mxu1  ;;  %v1148_v35 = vmax.f32 %v997_v27, 0.0 }
 0x112   :  { %v1150_v36 = vmax.f32 %v1038_v28, 0.0 }
 0x113   :  { %v1406_v37 = vpack.c.bf16 %v1148_v35, %v1147_v31 }
 0x114   :  { %v1407_v38 = vpack.c.bf16 %v1150_v36, %v1149_v32 }
 0x115   :  { %1291 = vst [vmem:[%s1901_s3 + $0x60] sm:$0x77] %v1406_v37  ;;  %v1076_v40 = vpop.f32.mrb[28].mxu0 }
 0x116   :  { %1292 = vst [vmem:[%s1901_s3 + $0x68] sm:$0x77] %v1407_v38  ;;  %v1117_v41 = vpop.f32.mrb[28].mxu1  ;;  %v1077_v7 = vadd.f32 %v1076_v40, %v1817_v39  ;;  %v1078_v43 = vpop.f32.mrb[29].mxu0 }
 0x117   :  { %v1118_v42 = vadd.f32 %v1117_v41, %v1817_v39  ;;  %v1419_v3 = vpop.f32.mrb[29].mxu1  ;;  %v1079_v44 = vadd.f32 %v1078_v43, %v1817_v39  ;;  %v1080_v45 = vpop.f32.mrb[30].mxu0 }
 0x118   :  { %v1120_v46 = vpop.f32.mrb[30].mxu1  ;;  %v1151_v47 = vmax.f32 %v1077_v7, 0.0  ;;  %v1081_v49 = vpop.f32.mrb[31].mxu0 }
 0x119   :  { %v1153_v48 = vmax.f32 %v1118_v42, 0.0  ;;  %v1420_v50 = vpop.f32.mrb[31].mxu1  ;;  %v1152_v16 = vmax.f32 %v1079_v44, 0.0 }
 0x11b   :  { %v1409_v51 = vpack.c.bf16 %v1153_v48, %v1153_v48  ;;  %v1408_v52 = vpack.c.bf16 %v1152_v16, %v1151_v47 }
 0x11d   :  { %1295 = vst.msk [vmem:[%s1901_s3 + $0x78] sm:$0x7] %vm1294_vm4, %v1409_v51  ;;  %1293 = vst [vmem:[%s1901_s3 + $0x70] sm:$0x77] %v1408_v52 }

// kernel: net_forward.4
= control target key start
LH: loop header
LB: loop body
LE: loop exit
PB: predicated region body
PF: predicated region fallthrough
CT: control target
= control target key end

     0   :  { %v872_v1 = vmov 0   ;;  %vm393_vm0 = vcmask 179200   ;;  %vm400_vm1 = vcmask 1042432   ;;  %vm652_vm2 = vcmask 1043456   ;;  %s1140_s0 = inlined_call_operand.vmem [shape: bf16[150,648], index: 0, kind: input, shape index: {}]   ;;  %s1141_s1 = inlined_call_operand.vmem [shape: bf16[24,150], index: 1, kind: input, shape index: {}]   ;;  %s1142_s2 = inlined_call_operand.vmem [shape: f32[24,1], index: 2, kind: input, shape index: {}]   ;;  %s1143_s3 = inlined_call_operand.vmem [shape: bf16[24,648], index: 3, kind: output, shape index: {}]  }
   0x1   :  { %v780_v0 = vld [vmem:[%s1140_s0 + $0x4] ss:$24 sps:$4 sm:$0xff]   ;;  %778 = vset.pattern.permute.xlu0 %v872_v1  ;;  %779 = vset.pattern.permute.xlu1 %v872_v1  ;;  %v784_v3 = vld [vmem:[%s1140_s0] ss:$24 sps:$4 sm:$0xff]   ;;  %v786_v5 = vld [vmem:[%s1140_s0 + $0x34] ss:$24 sps:$4 sm:$0xff]  }
   0x2   :  { %v782_v2 = vld [vmem:[%s1140_s0 + $0xc] ss:$24 sps:$4 sm:$0xff]   ;;  %419 = vmatprep.subr.bf16.mxu0 %v780_v0  ;;  %v785_v4 = vld [vmem:[%s1140_s0 + $0x8] ss:$24 sps:$4 sm:$0xff]   ;;  %v788_v6 = vld [vmem:[%s1140_s0 + $0x3c] ss:$24 sps:$4 sm:$0xff]  }
   0x3   :  { %470 = vmatprep.subr.bf16.mxu1 %v782_v2  ;;  %420 = vmatpush1.bf16.msra.mxu0 %v784_v3  ;;  %v790_v7 = vld [vmem:[%s1140_s0 + $0x30] ss:$24 sps:$4 sm:$0xff]   ;;  %v792_v9 = vld [vmem:[%s1140_s0 + $0x64] ss:$24 sps:$4 sm:$0xff]   ;;  %v796_v11 = vld [vmem:[%s1140_s0 + $0x60] ss:$24 sps:$4 sm:$0xff]  }
   0x4   :  { %471 = vmatpush1.bf16.msra.mxu1 %v785_v4  ;;  %421 = vmatprep.subr.bf16.mxu0 %v786_v5  ;;  %v791_v8 = vld [vmem:[%s1140_s0 + $0x38] ss:$24 sps:$4 sm:$0xff]   ;;  %v794_v10 = vld [vmem:[%s1140_s0 + $0x6c] ss:$24 sps:$4 sm:$0xff]   ;;  %v797_v12 = vld [vmem:[%s1140_s0 + $0x68] ss:$24 sps:$4 sm:$0xff]  }
   0x5   :  { %472 = vmatprep.subr.bf16.mxu1 %v788_v6  ;;  %v798_v13 = vld [vmem:[%s1140_s0 + $0x94] ss:$24 sps:$4 sm:$0xff]   ;;  %v802_v15 = vld [vmem:[%s1140_s0 + $0x90] ss:$24 sps:$4 sm:$0xff]   ;;  %v804_v17 = vld [vmem:[%s1140_s0 + $0xc4] ss:$24 sps:$4 sm:$0xff]  }
   0x6   :  { %v800_v14 = vld [vmem:[%s1140_s0 + $0x9c] ss:$24 sps:$4 sm:$0xff]   ;;  %v803_v16 = vld [vmem:[%s1140_s0 + $0x98] ss:$24 sps:$4 sm:$0xff]   ;;  %v806_v18 = vld [vmem:[%s1140_s0 + $0xcc] ss:$24 sps:$4 sm:$0xff]  }
   0x7   :  { %422 = vmatpush1.bf16.msra.mxu0 %v790_v7  ;;  %v808_v19 = vld [vmem:[%s1140_s0 + $0xc0] ss:$24 sps:$4 sm:$0xff]   ;;  %v810_v21 = vld [vmem:[%s1140_s0 + $0xf4] ss:$24 sps:$4 sm:$0xff]   ;;  %v814_v23 = vld [vmem:[%s1140_s0 + $0xf0] ss:$24 sps:$4 sm:$0xff]  }
   0x8   :  { %473 = vmatpush1.bf16.msra.mxu1 %v791_v8  ;;  %423 = vmatprep.subr.bf16.mxu0 %v792_v9  ;;  %v809_v20 = vld [vmem:[%s1140_s0 + $0xc8] ss:$24 sps:$4 sm:$0xff]   ;;  %v812_v22 = vld [vmem:[%s1140_s0 + $0xfc] ss:$24 sps:$4 sm:$0xff]   ;;  %v815_v24 = vld [vmem:[%s1140_s0 + $0xf8] ss:$24 sps:$4 sm:$0xff]  }
   0x9   :  { %474 = vmatprep.subr.bf16.mxu1 %v794_v10  ;;  %v816_v25 = vld [vmem:[%s1140_s0 + $0x124] ss:$24 sps:$4 sm:$0xff]   ;;  %v820_v27 = vld [vmem:[%s1140_s0 + $0x120] ss:$24 sps:$4 sm:$0xff]   ;;  %v822_v29 = vld [vmem:[%s1140_s0 + $0x154] ss:$24 sps:$4 sm:$0xff]  }
   0xa   :  { %v818_v26 = vld [vmem:[%s1140_s0 + $0x12c] ss:$24 sps:$4 sm:$0xff]   ;;  %v821_v28 = vld [vmem:[%s1140_s0 + $0x128] ss:$24 sps:$4 sm:$0xff]   ;;  %v824_v30 = vld [vmem:[%s1140_s0 + $0x15c] ss:$24 sps:$4 sm:$0xff]  }
   0xb   :  { %424 = vmatpush1.bf16.msra.mxu0 %v796_v11  ;;  %v986_v31 = vld [vmem:[%s1141_s1 + $0x4] ss:$8 sps:$4 sm:$0xff]   ;;  %v826_v32 = vld [vmem:[%s1140_s0 + $0x150] ss:$24 sps:$4 sm:$0xff]   ;;  %v73_v37 = vld [vmem:[%s1140_s0 + $0x1b8] sm:$0x77] }
   0xc   :  { %475 = vmatpush1.bf16.msra.mxu1 %v797_v12  ;;  %425 = vmatprep.subr.bf16.mxu0 %v798_v13  ;;  %v827_v33 = vld [vmem:[%s1140_s0 + $0x158] ss:$24 sps:$4 sm:$0xff]   ;;  %v828_v34 = vld [vmem:[%s1140_s0 + $0x184] ss:$24 sps:$4 sm:$0xff]   ;;  %v833_v39 = vld [vmem:[%s1140_s0 + $0x188] ss:$24 sps:$4 sm:$0xff]   ;;  %v727_v41 = vcombine.high %v73_v37, %v73_v37  ;;  %v726_v43 = vcombine.low %v73_v37, %v73_v37 }
   0xd   :  { %476 = vmatprep.subr.bf16.mxu1 %v800_v14  ;;  %731 = vmatprep.mubr.msk.bf16.mxu0 %vm393_vm0, %v986_v31  ;;  %v830_v35 = vld [vmem:[%s1140_s0 + $0x18c] ss:$24 sps:$4 sm:$0xff]   ;;  %v72_v36 = vld [vmem:[%s1140_s0 + $0x1b0] sm:$0x77]  ;;  %v832_v38 = vld [vmem:[%s1140_s0 + $0x180] ss:$24 sps:$4 sm:$0xff]  }
   0xe   :  { %734 = vmatprep.mubr.msk.bf16.mxu1 %vm393_vm0, %v986_v31  ;;  %v725_v40 = vcombine.high %v72_v36, %v72_v36  ;;  %v724_v42 = vcombine.low %v72_v36, %v72_v36  ;;  %v408_v45 = vsel %vm400_vm1, %v726_v43, 0  ;;  %v843_v46 = vld [vmem:[%s1140_s0 + $0x14] ss:$24 sps:$4 sm:$0xff]   ;;  %v75_v47 = vld [vmem:[%s1142_s2] sm:$0xff]  ;;  %v841_v51 = vld [vmem:[%s1140_s0 + $0x10] ss:$24 sps:$4 sm:$0xff]  }
   0xf   :  { %426 = vmatpush1.bf16.msra.mxu0 %v802_v15  ;;  %v1029_v48 = vld [vmem:[%s1141_s1] ss:$8 sps:$4 sm:$0xff]   ;;  %v17_v49 = vld [vmem:[%s1141_s1 + $0x10] sm:$0xff]  ;;  %80 = vperm.xlu0 %778, %v75_v47   ;;  %v846_v52 = vld [vmem:[%s1140_s0 + $0x44] ss:$24 sps:$4 sm:$0xff]   ;;  %vm653_vm3 = vcmask 64516  }
  0x10   :  { %477 = vmatpush1.bf16.msra.mxu1 %v803_v16  ;;  %427 = vmatprep.subr.bf16.mxu0 %v804_v17  ;;  %v402_v44 = vsel %vm400_vm1, %v724_v42, 0  ;;  %v77_v50 = vld [vmem:[%s1142_s2 + $0x10] sm:$0xff]  ;;  %v669_v53 = vcombine.high %v17_v49, %v17_v49  ;;  %v844_v54 = vld [vmem:[%s1140_s0 + $0x40] ss:$24 sps:$4 sm:$0xff]   ;;  %v76_v55 = vld [vmem:[%s1142_s2 + $0x8] sm:$0xff]  ;;  %v668_v57 = vcombine.low %v17_v49, %v17_v49 }
  0x11   :  { %478 = vmatprep.subr.bf16.mxu1 %v806_v18  ;;  %90 = vperm.xlu1 %779, %v77_v50   ;;  %v849_v56 = vld [vmem:[%s1140_s0 + $0x74] ss:$24 sps:$4 sm:$0xff]   ;;  %v847_v58 = vld [vmem:[%s1140_s0 + $0x70] ss:$24 sps:$4 sm:$0xff]   ;;  %v852_v59 = vld [vmem:[%s1140_s0 + $0xa4] ss:$24 sps:$4 sm:$0xff]  }
  0x12   :  { %v850_v60 = vld [vmem:[%s1140_s0 + $0xa0] ss:$24 sps:$4 sm:$0xff]   ;;  %v855_v61 = vld [vmem:[%s1140_s0 + $0xd4] ss:$24 sps:$4 sm:$0xff]   ;;  %v853_v62 = vld [vmem:[%s1140_s0 + $0xd0] ss:$24 sps:$4 sm:$0xff]  }
  0x13   :  { %428 = vmatpush1.bf16.msra.mxu0 %v808_v19  ;;  %85 = vperm.xlu0 %778, %v76_v55   ;;  %v858_v63 = vld [vmem:[%s1140_s0 + $0x104] ss:$24 sps:$4 sm:$0xff]   ;;  %v856_v0 = vld [vmem:[%s1140_s0 + $0x100] ss:$24 sps:$4 sm:$0xff]   ;;  %v861_v1 = vld [vmem:[%s1140_s0 + $0x134] ss:$24 sps:$4 sm:$0xff]  }
  0x14   :  { %479 = vmatpush1.bf16.msra.mxu1 %v809_v20  ;;  %429 = vmatprep.subr.bf16.mxu0 %v810_v21  ;;  %v859_v2 = vld [vmem:[%s1140_s0 + $0x130] ss:$24 sps:$4 sm:$0xff]   ;;  %v865_v3 = vld [vmem:[%s1140_s0 + $0x164] ss:$24 sps:$4 sm:$0xff]   ;;  %v863_v4 = vld [vmem:[%s1140_s0 + $0x160] ss:$24 sps:$4 sm:$0xff]  }
  0x15   :  { %480 = vmatprep.subr.bf16.mxu1 %v812_v22  ;;  %v869_v5 = vld [vmem:[%s1140_s0 + $0x194] ss:$24 sps:$4 sm:$0xff]   ;;  %v74_v6 = vld [vmem:[%s1140_s0 + $0x1c0] sm:$0x77]  ;;  %v867_v7 = vld [vmem:[%s1140_s0 + $0x190] ss:$24 sps:$4 sm:$0xff]  }
  0x16   :  { %v729_v8 = vcombine.high %v74_v6, %v74_v6  ;;  %v728_v9 = vcombine.low %v74_v6, %v74_v6  ;;  %vm654_vm4 = vmor %vm653_vm3, %vm652_vm2 }
  0x17   :  { %430 = vmatpush1.bf16.msra.mxu0 %v814_v23 }
  0x18   :  { %481 = vmatpush1.bf16.msra.mxu1 %v815_v24  ;;  %431 = vmatprep.subr.bf16.mxu0 %v816_v25  ;;  %v414_v10 = vsel %vm400_vm1, %v728_v9, 0 }
  0x19   :  { %482 = vmatprep.subr.bf16.mxu1 %v818_v26 }
  0x1b   :  { %432 = vmatpush1.bf16.msra.mxu0 %v820_v27 }
  0x1c   :  { %483 = vmatpush1.bf16.msra.mxu1 %v821_v28  ;;  %433 = vmatprep.subr.bf16.mxu0 %v822_v29 }
  0x1d   :  { %484 = vmatprep.subr.bf16.mxu1 %v824_v30 }
  0x1f   :  { %434 = vmatpush1.bf16.msra.mxu0 %v826_v32 }
  0x20   :  { %485 = vmatpush1.bf16.msra.mxu1 %v827_v33  ;;  %435 = vmatprep.subr.bf16.mxu0 %v828_v34 }
  0x21   :  { %486 = vmatprep.subr.bf16.mxu1 %v830_v35 }
  0x23   :  { %436 = vmatpush1.bf16.msra.mxu0 %v832_v38 }
  0x24   :  { %487 = vmatpush1.bf16.msra.mxu1 %v833_v39  ;;  %730 = vmatprep.subr.msk.bf16.mxu0 %vm400_vm1, %v725_v40 }
  0x25   :  { %733 = vmatprep.subr.msk.bf16.mxu1 %vm400_vm1, %v727_v41 }
  0x27   :  { %438 = vmatpush1.bf16.msra.mxu0 %v402_v44 }
  0x28   :  { %489 = vmatpush1.bf16.msra.mxu1 %v408_v45  ;;  %521 = vmatprep.subr.bf16.mxu0 %v843_v46 }
  0x29   :  { %757 = vmatprep.subr.bf16.mxu1 %v843_v46 }
  0x2a   :  { %452 = vmatmul.mubr.bf16.vlgmr.msra.gmra.mrb[0].mxu0 %v1029_v48 }
  0x2b   :  { %503 = vmatmul.mubr.bf16.vlgmr.msra.gmra.mrb[0].mxu1 %v1029_v48  ;;  %522 = vmatpush1.bf16.msra.mxu0 %v841_v51 }
  0x2c   :  { %767 = vmatpush1.bf16.msra.mxu1 %v841_v51  ;;  %523 = vmatprep.subr.bf16.mxu0 %v846_v52 }
  0x2d   :  { %758 = vmatprep.subr.bf16.mxu1 %v846_v52  ;;  %732 = vmatprep.mubr.msk.bf16.mxu0 %vm393_vm0, %v669_v53 }
  0x2e   :  { %735 = vmatprep.mubr.msk.bf16.mxu1 %vm393_vm0, %v669_v53 }
  0x2f   :  { %524 = vmatpush1.bf16.msra.mxu0 %v844_v54 }
  0x30   :  { %768 = vmatpush1.bf16.msra.mxu1 %v844_v54  ;;  %525 = vmatprep.subr.bf16.mxu0 %v849_v56 }
  0x31   :  { %759 = vmatprep.subr.bf16.mxu1 %v849_v56 }
  0x32   :  { %462 = vmatmul.mubr.bf16.gmra.mrb[4].mxu0 %v668_v57 }
  0x33   :  { %513 = vmatmul.mubr.bf16.gmra.mrb[4].mxu1 %v668_v57  ;;  %526 = vmatpush1.bf16.msra.mxu0 %v847_v58 }
  0x34   :  { %769 = vmatpush1.bf16.msra.mxu1 %v847_v58  ;;  %527 = vmatprep.subr.bf16.mxu0 %v852_v59 }
  0x35   :  { %760 = vmatprep.subr.bf16.mxu1 %v852_v59  ;;  %737 = vmatprep.mubr.msk.bf16.mxu0 %vm393_vm0, %v986_v31 }
  0x36   :  { %738 = vmatprep.mubr.msk.bf16.mxu1 %vm393_vm0, %v669_v53 }
  0x37   :  { %528 = vmatpush1.bf16.msra.mxu0 %v850_v60 }
  0x38   :  { %770 = vmatpush1.bf16.msra.mxu1 %v850_v60  ;;  %529 = vmatprep.subr.bf16.mxu0 %v855_v61 }
  0x39   :  { %761 = vmatprep.subr.bf16.mxu1 %v855_v61 }
  0x3b   :  { %530 = vmatpush1.bf16.msra.mxu0 %v853_v62 }
  0x3c   :  { %771 = vmatpush1.bf16.msra.mxu1 %v853_v62  ;;  %531 = vmatprep.subr.bf16.mxu0 %v858_v63 }
  0x3d   :  { %762 = vmatprep.subr.bf16.mxu1 %v858_v63 }
  0x3f   :  { %532 = vmatpush1.bf16.msra.mxu0 %v856_v0 }
  0x40   :  { %772 = vmatpush1.bf16.msra.mxu1 %v856_v0  ;;  %533 = vmatprep.subr.bf16.mxu0 %v861_v1 }
  0x41   :  { %763 = vmatprep.subr.bf16.mxu1 %v861_v1 }
  0x43   :  { %534 = vmatpush1.bf16.msra.mxu0 %v859_v2 }
  0x44   :  { %773 = vmatpush1.bf16.msra.mxu1 %v859_v2  ;;  %535 = vmatprep.subr.bf16.mxu0 %v865_v3 }
  0x45   :  { %764 = vmatprep.subr.bf16.mxu1 %v865_v3 }
  0x47   :  { %536 = vmatpush1.bf16.msra.mxu0 %v863_v4 }
  0x48   :  { %774 = vmatpush1.bf16.msra.mxu1 %v863_v4  ;;  %537 = vmatprep.subr.bf16.mxu0 %v869_v5 }
  0x49   :  { %765 = vmatprep.subr.bf16.mxu1 %v869_v5 }
  0x4b   :  { %538 = vmatpush1.bf16.msra.mxu0 %v867_v7 }
  0x4c   :  { %775 = vmatpush1.bf16.msra.mxu1 %v867_v7  ;;  %736 = vmatprep.subr.msk.bf16.mxu0 %vm400_vm1, %v729_v8 }
  0x4d   :  { %766 = vmatprep.subr.msk.bf16.mxu1 %vm400_vm1, %v729_v8 }
  0x4f   :  { %540 = vmatpush1.bf16.msra.mxu0 %v414_v10 }
  0x50   :  { %776 = vmatpush1.bf16.msra.mxu1 %v414_v10 }
  0x52   :  { %554 = vmatmul.mubr.bf16.vlgmr.msra.gmra.mrb[8].mxu0 %v1029_v48 }
  0x53   :  { %564 = vmatmul.mubr.bf16.vlgmr.msra.gmra.mrb[8].mxu1 %v668_v57 }
  0x8e   :  { %v81_v11 = vpop.permute.xlu0 %80 }
  0x90   :  { %v91_v39 = vpop.permute.xlu1 %90 }
  0x92   :  { %v1105_v12 = vpop.permute.xlu0 %85 }
  0xfd   :  { %v453_v13 = vpop.f32.mrb[0].mxu0 }
  0xfe   :  { %v504_v14 = vpop.f32.mrb[0].mxu1  ;;  %v454_v15 = vadd.f32 %v453_v13, %v81_v11  ;;  %v455_v17 = vpop.f32.mrb[1].mxu0 }
  0xff   :  { %v505_v16 = vadd.f32 %v504_v14, %v81_v11  ;;  %v506_v18 = vpop.f32.mrb[1].mxu1  ;;  %v456_v19 = vadd.f32 %v455_v17, %v81_v11  ;;  %v457_v21 = vpop.f32.mrb[2].mxu0 }
 0x100   :  { %v507_v20 = vadd.f32 %v506_v18, %v81_v11  ;;  %v508_v22 = vpop.f32.mrb[2].mxu1  ;;  %v572_v23 = vmax.f32 %v454_v15, 0.0  ;;  %v458_v25 = vadd.f32 %v457_v21, %v1105_v12  ;;  %v459_v27 = vpop.f32.mrb[3].mxu0 }
 0x101   :  { %v574_v24 = vmax.f32 %v505_v16, 0.0  ;;  %v509_v26 = vadd.f32 %v508_v22, %v1105_v12  ;;  %v510_v28 = vpop.f32.mrb[3].mxu1  ;;  %v573_v29 = vmax.f32 %v456_v19, 0.0  ;;  %v460_v31 = vadd.f32 %v459_v27, %v1105_v12 }
 0x102   :  { %v575_v30 = vmax.f32 %v507_v20, 0.0  ;;  %v511_v32 = vadd.f32 %v510_v28, %v1105_v12  ;;  %v578_v33 = vmax.f32 %v458_v25, 0.0 }
 0x103   :  { %v580_v34 = vmax.f32 %v509_v26, 0.0  ;;  %v748_v35 = vpack.c.bf16 %v573_v29, %v572_v23  ;;  %v579_v37 = vmax.f32 %v460_v31, 0.0 }
 0x104   :  { %v749_v36 = vpack.c.bf16 %v575_v30, %v574_v24  ;;  %v581_v38 = vmax.f32 %v511_v32, 0.0 }
 0x105   :  { %650 = vst [vmem:[%s1143_s3] sm:$0xff] %v748_v35  ;;  %v751_v40 = vpack.c.bf16 %v579_v37, %v578_v33  ;;  %v463_v42 = vpop.f32.mrb[4].mxu0 }
 0x106   :  { %651 = vst [vmem:[%s1143_s3 + $0x8] sm:$0xff] %v749_v36  ;;  %v752_v41 = vpack.c.bf16 %v581_v38, %v580_v34  ;;  %v514_v43 = vpop.f32.mrb[4].mxu1  ;;  %v465_v44 = vpop.f32.mrb[5].mxu0  ;;  %v464_v45 = vadd.f32 %v463_v42, %v91_v39 }
 0x107   :  { %v515_v46 = vadd.f32 %v514_v43, %v91_v39  ;;  %v516_v47 = vpop.f32.mrb[5].mxu1  ;;  %656 = vst [vmem:[%s1143_s3 + $0x18] sm:$0xff] %v751_v40  ;;  %v467_v48 = vpop.f32.mrb[6].mxu0  ;;  %v466_v49 = vadd.f32 %v465_v44, %v91_v39 }
 0x108   :  { %657 = vst [vmem:[%s1143_s3 + $0x20] sm:$0xff] %v752_v41  ;;  %v517_v50 = vadd.f32 %v516_v47, %v91_v39  ;;  %v518_v51 = vpop.f32.mrb[6].mxu1  ;;  %v584_v52 = vmax.f32 %v464_v45, 0.0  ;;  %v468_v53 = vpop.f32.mrb[7].mxu0 }
 0x109   :  { %v586_v54 = vmax.f32 %v515_v46, 0.0  ;;  %v519_v55 = vpop.f32.mrb[7].mxu1  ;;  %v585_v56 = vmax.f32 %v466_v49, 0.0 }
 0x10a   :  { %v587_v57 = vmax.f32 %v517_v50, 0.0 }
 0x10b   :  { %v754_v58 = vpack.c.bf16 %v585_v56, %v584_v52 }
 0x10c   :  { %v755_v59 = vpack.c.bf16 %v587_v57, %v586_v54 }
 0x10d   :  { %659 = vst [vmem:[%s1143_s3 + $0x30] sm:$0xff] %v754_v58 }
 0x10e   :  { %660 = vst [vmem:[%s1143_s3 + $0x38] sm:$0xff] %v755_v59 }
 0x125   :  { %v555_v60 = vpop.f32.mrb[8].mxu0 }
 0x126   :  { %v565_v61 = vpop.f32.mrb[8].mxu1  ;;  %v556_v62 = vadd.f32 %v555_v60, %v81_v11  ;;  %v557_v0 = vpop.f32.mrb[9].mxu0 }
 0x127   :  { %v566_v63 = vadd.f32 %v565_v61, %v91_v39  ;;  %v567_v1 = vpop.f32.mrb[9].mxu1  ;;  %v558_v2 = vadd.f32 %v557_v0, %v81_v11  ;;  %v559_v4 = vpop.f32.mrb[10].mxu0 }
 0x128   :  { %v568_v3 = vadd.f32 %v567_v1, %v91_v39  ;;  %v569_v5 = vpop.f32.mrb[10].mxu1  ;;  %v576_v6 = vmax.f32 %v556_v62, 0.0  ;;  %v560_v8 = vadd.f32 %v559_v4, %v1105_v12  ;;  %v561_v9 = vpop.f32.mrb[11].mxu0 }
 0x129   :  { %v588_v7 = vmax.f32 %v566_v63, 0.0  ;;  %v570_v10 = vpop.f32.mrb[11].mxu1  ;;  %v577_v13 = vmax.f32 %v558_v2, 0.0  ;;  %v562_v15 = vadd.f32 %v561_v9, %v1105_v12 }
 0x12a   :  { %v589_v14 = vmax.f32 %v568_v3, 0.0  ;;  %v582_v16 = vmax.f32 %v560_v8, 0.0 }
 0x12b   :  { %v750_v17 = vpack.c.bf16 %v577_v13, %v576_v6  ;;  %v583_v11 = vmax.f32 %v562_v15, 0.0 }
 0x12c   :  { %v756_v18 = vpack.c.bf16 %v589_v14, %v588_v7 }
 0x12d   :  { %655 = vst.msk [vmem:[%s1143_s3 + $0x10] sm:$0xff] %vm654_vm4, %v750_v17  ;;  %v753_v19 = vpack.c.bf16 %v583_v11, %v582_v16 }
 0x12e   :  { %661 = vst.msk [vmem:[%s1143_s3 + $0x40] sm:$0xff] %vm654_vm4, %v756_v18 }
 0x12f   :  { %658 = vst.msk [vmem:[%s1143_s3 + $0x28] sm:$0xff] %vm654_vm4, %v753_v19 }

// kernel: net_forward.5
= control target key start
LH: loop header
LB: loop body
LE: loop exit
PB: predicated region body
PF: predicated region fallthrough
CT: control target
= control target key end

     0   :  { %v518_v36 = vlaneseq  ;;  %v5656_v37 = vmov 1966171168   ;;  %s7400_s0 = inlined_call_operand.vmem [shape: bf16[2,1944], index: 0, kind: input, shape index: {}]   ;;  %s7401_s1 = inlined_call_operand.vmem [shape: bf16[1944,486], index: 1, kind: input, shape index: {}]   ;;  %s7402_s2 = inlined_call_operand.vmem [shape: f32[1,486], index: 2, kind: input, shape index: {}]   ;;  %s7403_s3 = inlined_call_operand.vmem [shape: bf16[486,84], index: 3, kind: input, shape index: {}]   ;;  %s7404_s4 = inlined_call_operand.vmem [shape: f32[1,84], index: 4, kind: input, shape index: {}]   ;;  %s7405_s5 = inlined_call_operand.vmem [shape: bf16[84,7], index: 5, kind: input, shape index: {}]   ;;  %s7406_s6 = inlined_call_operand.vmem [shape: f32[1,7], index: 6, kind: input, shape index: {}]   ;;  %s7407_s7 = inlined_call_operand.hbm [shape: f32[2,7], index: 7, kind: output, shape index: {}]  }
   0x1   :  { %v4863_v0 = vld [vmem:[%s7401_s1 + $0x4] ss:$16 sps:$4 sm:$0xff]   ;;  %v4865_v1 = vld [vmem:[%s7401_s1 + $0xc] ss:$16 sps:$4 sm:$0xff]   ;;  %v4867_v2 = vld [vmem:[%s7401_s1] ss:$16 sps:$4 sm:$0xff]   ;;  %v542_v38 = vunpack.c.l.s4 %v5656_v37 }
   0x2   :  { %3100 = vmatprep.subr.bf16.mxu0 %v4863_v0  ;;  %v4868_v3 = vld [vmem:[%s7401_s1 + $0x8] ss:$16 sps:$4 sm:$0xff]   ;;  %3428 = vmatprep.subr.bf16.mxu1 %v4865_v1  ;;  %v4869_v4 = vld [vmem:[%s7401_s1 + $0x24] ss:$16 sps:$4 sm:$0xff]   ;;  %v4871_v5 = vld [vmem:[%s7401_s1 + $0x2c] ss:$16 sps:$4 sm:$0xff]  }
   0x3   :  { %3101 = vmatpush1.bf16.msra.mxu0 %v4867_v2  ;;  %3429 = vmatpush1.bf16.msra.mxu1 %v4868_v3  ;;  %v4873_v6 = vld [vmem:[%s7401_s1 + $0x20] ss:$16 sps:$4 sm:$0xff]   ;;  %v4874_v7 = vld [vmem:[%s7401_s1 + $0x28] ss:$16 sps:$4 sm:$0xff]   ;;  %v4875_v8 = vld [vmem:[%s7401_s1 + $0x44] ss:$16 sps:$4 sm:$0xff]   ;;  %v543_v43 = vunpack.c.0.s8 %v542_v38 }
   0x4   :  { %3102 = vmatprep.subr.bf16.mxu0 %v4869_v4  ;;  %3430 = vmatprep.subr.bf16.mxu1 %v4871_v5  ;;  %v4877_v9 = vld [vmem:[%s7401_s1 + $0x4c] ss:$16 sps:$4 sm:$0xff]   ;;  %v4879_v10 = vld [vmem:[%s7401_s1 + $0x40] ss:$16 sps:$4 sm:$0xff]   ;;  %v4880_v11 = vld [vmem:[%s7401_s1 + $0x48] ss:$16 sps:$4 sm:$0xff]  }
   0x5   :  { %v4881_v12 = vld [vmem:[%s7401_s1 + $0x64] ss:$16 sps:$4 sm:$0xff]   ;;  %v4883_v13 = vld [vmem:[%s7401_s1 + $0x6c] ss:$16 sps:$4 sm:$0xff]   ;;  %v4885_v14 = vld [vmem:[%s7401_s1 + $0x60] ss:$16 sps:$4 sm:$0xff]  }
   0x6   :  { %v4886_v15 = vld [vmem:[%s7401_s1 + $0x68] ss:$16 sps:$4 sm:$0xff]   ;;  %v4887_v16 = vld [vmem:[%s7401_s1 + $0x84] ss:$16 sps:$4 sm:$0xff]   ;;  %v4889_v17 = vld [vmem:[%s7401_s1 + $0x8c] ss:$16 sps:$4 sm:$0xff]  }
   0x7   :  { %3103 = vmatpush1.bf16.msra.mxu0 %v4873_v6  ;;  %3431 = vmatpush1.bf16.msra.mxu1 %v4874_v7  ;;  %v4891_v18 = vld [vmem:[%s7401_s1 + $0x80] ss:$16 sps:$4 sm:$0xff]   ;;  %v4892_v19 = vld [vmem:[%s7401_s1 + $0x88] ss:$16 sps:$4 sm:$0xff]   ;;  %v4893_v20 = vld [vmem:[%s7401_s1 + $0xa4] ss:$16 sps:$4 sm:$0xff]  }
   0x8   :  { %3104 = vmatprep.subr.bf16.mxu0 %v4875_v8  ;;  %3432 = vmatprep.subr.bf16.mxu1 %v4877_v9  ;;  %v4895_v21 = vld [vmem:[%s7401_s1 + $0xac] ss:$16 sps:$4 sm:$0xff]   ;;  %v4897_v22 = vld [vmem:[%s7401_s1 + $0xa0] ss:$16 sps:$4 sm:$0xff]   ;;  %v4898_v23 = vld [vmem:[%s7401_s1 + $0xa8] ss:$16 sps:$4 sm:$0xff]  }
   0x9   :  { %v4899_v24 = vld [vmem:[%s7401_s1 + $0xc4] ss:$16 sps:$4 sm:$0xff]   ;;  %v4901_v25 = vld [vmem:[%s7401_s1 + $0xcc] ss:$16 sps:$4 sm:$0xff]   ;;  %v4903_v26 = vld [vmem:[%s7401_s1 + $0xc0] ss:$16 sps:$4 sm:$0xff]  }
   0xa   :  { %v4904_v27 = vld [vmem:[%s7401_s1 + $0xc8] ss:$16 sps:$4 sm:$0xff]   ;;  %v4905_v28 = vld [vmem:[%s7401_s1 + $0xe4] ss:$16 sps:$4 sm:$0xff]   ;;  %v4907_v29 = vld [vmem:[%s7401_s1 + $0xec] ss:$16 sps:$4 sm:$0xff]  }
   0xb   :  { %3105 = vmatpush1.bf16.msra.mxu0 %v4879_v10  ;;  %3433 = vmatpush1.bf16.msra.mxu1 %v4880_v11  ;;  %v4909_v30 = vld [vmem:[%s7401_s1 + $0xe0] ss:$16 sps:$4 sm:$0xff]   ;;  %v4910_v31 = vld [vmem:[%s7401_s1 + $0xe8] ss:$16 sps:$4 sm:$0xff]   ;;  %v4911_v32 = vld [vmem:[%s7401_s1 + $0x104] ss:$16 sps:$4 sm:$0xff]  }
   0xc   :  { %3106 = vmatprep.subr.bf16.mxu0 %v4881_v12  ;;  %3434 = vmatprep.subr.bf16.mxu1 %v4883_v13  ;;  %v4913_v33 = vld [vmem:[%s7401_s1 + $0x10c] ss:$16 sps:$4 sm:$0xff]   ;;  %v4915_v34 = vld [vmem:[%s7401_s1 + $0x100] ss:$16 sps:$4 sm:$0xff]   ;;  %v4916_v35 = vld [vmem:[%s7401_s1 + $0x108] ss:$16 sps:$4 sm:$0xff]  }
   0xd   :  { %v4917_v39 = vld [vmem:[%s7401_s1 + $0x124] ss:$16 sps:$4 sm:$0xff]   ;;  %v4919_v40 = vld [vmem:[%s7401_s1 + $0x12c] ss:$16 sps:$4 sm:$0xff]   ;;  %v4921_v41 = vld [vmem:[%s7401_s1 + $0x120] ss:$16 sps:$4 sm:$0xff]  }
   0xe   :  { %v5818_v42 = vshrl.u32 %v518_v36, 7  ;;  %v4922_v44 = vld [vmem:[%s7401_s1 + $0x128] ss:$16 sps:$4 sm:$0xff]   ;;  %v4923_v45 = vld [vmem:[%s7401_s1 + $0x144] ss:$16 sps:$4 sm:$0xff]  }
   0xf   :  { %3107 = vmatpush1.bf16.msra.mxu0 %v4885_v14  ;;  %3435 = vmatpush1.bf16.msra.mxu1 %v4886_v15  ;;  %v4925_v46 = vld [vmem:[%s7401_s1 + $0x14c] ss:$16 sps:$4 sm:$0xff]   ;;  %v4927_v47 = vld [vmem:[%s7401_s1 + $0x140] ss:$16 sps:$4 sm:$0xff]   ;;  %v4928_v48 = vld [vmem:[%s7401_s1 + $0x148] ss:$16 sps:$4 sm:$0xff]  }
  0x10   :  { %3108 = vmatprep.subr.bf16.mxu0 %v4887_v16  ;;  %3436 = vmatprep.subr.bf16.mxu1 %v4889_v17  ;;  %v5836_v49 = vsub.s32 %v543_v43, %v5818_v42  ;;  %v4929_v50 = vld [vmem:[%s7401_s1 + $0x164] ss:$16 sps:$4 sm:$0xff]   ;;  %v4931_v51 = vld [vmem:[%s7401_s1 + $0x16c] ss:$16 sps:$4 sm:$0xff]   ;;  %v4933_v53 = vld [vmem:[%s7401_s1 + $0x160] ss:$16 sps:$4 sm:$0xff]  }
  0x11   :  { %v5847_v52 = vld [vmem:[%s7400_s0] sm:$0xff]  ;;  %v4934_v55 = vld [vmem:[%s7401_s1 + $0x168] ss:$16 sps:$4 sm:$0xff]   ;;  %v4937_v57 = vld [vmem:[%s7401_s1 + $0x18c] ss:$16 sps:$4 sm:$0xff]  }
  0x12   :  { %v547_v54 = vrot.slane %v5847_v52, %v5836_v49  ;;  %v4935_v56 = vld [vmem:[%s7401_s1 + $0x184] ss:$16 sps:$4 sm:$0xff]   ;;  %v4939_v59 = vld [vmem:[%s7401_s1 + $0x180] ss:$16 sps:$4 sm:$0xff]   ;;  %v4940_v61 = vld [vmem:[%s7401_s1 + $0x188] ss:$16 sps:$4 sm:$0xff]  }
  0x13   :  { %3109 = vmatpush1.bf16.msra.mxu0 %v4891_v18  ;;  %3437 = vmatpush1.bf16.msra.mxu1 %v4892_v19  ;;  %v4941_v62 = vld [vmem:[%s7401_s1 + $0x1a4] ss:$16 sps:$4 sm:$0xff]   ;;  %v4943_v63 = vld [vmem:[%s7401_s1 + $0x1ac] ss:$16 sps:$4 sm:$0xff]   ;;  %v4945_v0 = vld [vmem:[%s7401_s1 + $0x1a0] ss:$16 sps:$4 sm:$0xff]  }
  0x14   :  { %3110 = vmatprep.subr.bf16.mxu0 %v4893_v20  ;;  %3438 = vmatprep.subr.bf16.mxu1 %v4895_v21  ;;  %v555_v58 = vcombine.high %v547_v54, %v547_v54  ;;  %v4946_v1 = vld [vmem:[%s7401_s1 + $0x1a8] ss:$16 sps:$4 sm:$0xff]   ;;  %v4947_v2 = vld [vmem:[%s7401_s1 + $0x1c4] ss:$16 sps:$4 sm:$0xff]   ;;  %v4949_v3 = vld [vmem:[%s7401_s1 + $0x1cc] ss:$16 sps:$4 sm:$0xff]   ;;  %v5916_v13 = vrot.slane %v547_v54, %v5836_v49 }
  0x15   :  { %v4951_v4 = vld [vmem:[%s7401_s1 + $0x1c0] ss:$16 sps:$4 sm:$0xff]   ;;  %v4952_v5 = vld [vmem:[%s7401_s1 + $0x1c8] ss:$16 sps:$4 sm:$0xff]   ;;  %v4953_v6 = vld [vmem:[%s7401_s1 + $0x1e4] ss:$16 sps:$4 sm:$0xff]  }
  0x16   :  { %v577_v60 = vrot.slane %v555_v58, %v5836_v49  ;;  %v4955_v7 = vld [vmem:[%s7401_s1 + $0x1ec] ss:$16 sps:$4 sm:$0xff]   ;;  %v4957_v8 = vld [vmem:[%s7401_s1 + $0x1e0] ss:$16 sps:$4 sm:$0xff]   ;;  %v4958_v9 = vld [vmem:[%s7401_s1 + $0x1e8] ss:$16 sps:$4 sm:$0xff]  }
  0x17   :  { %3111 = vmatpush1.bf16.msra.mxu0 %v4897_v22  ;;  %3439 = vmatpush1.bf16.msra.mxu1 %v4898_v23  ;;  %v4961_v10 = vld [vmem:[%s7401_s1 + $0x204] ss:$16 sps:$4 sm:$0xff]   ;;  %v4964_v11 = vld [vmem:[%s7401_s1 + $0x20c] ss:$16 sps:$4 sm:$0xff]   ;;  %v4959_v12 = vld [vmem:[%s7401_s1 + $0x200] ss:$16 sps:$4 sm:$0xff]  }
  0x18   :  { %3112 = vmatprep.subr.bf16.mxu0 %v4899_v24  ;;  %3440 = vmatprep.subr.bf16.mxu1 %v4901_v25  ;;  %v4962_v14 = vld [vmem:[%s7401_s1 + $0x208] ss:$16 sps:$4 sm:$0xff]   ;;  %v4967_v15 = vld [vmem:[%s7401_s1 + $0x224] ss:$16 sps:$4 sm:$0xff]   ;;  %v4970_v16 = vld [vmem:[%s7401_s1 + $0x22c] ss:$16 sps:$4 sm:$0xff]   ;;  %v587_v17 = vcombine.high %v577_v60, %v577_v60 }
  0x19   :  { %3132 = vmatprep.mubr.bf16.mxu0 %v577_v60  ;;  %3460 = vmatprep.mubr.bf16.mxu1 %v577_v60  ;;  %v4965_v18 = vld [vmem:[%s7401_s1 + $0x220] ss:$16 sps:$4 sm:$0xff]   ;;  %v4968_v19 = vld [vmem:[%s7401_s1 + $0x228] ss:$16 sps:$4 sm:$0xff]   ;;  %v4973_v20 = vld [vmem:[%s7401_s1 + $0x244] ss:$16 sps:$4 sm:$0xff]  }
  0x1a   :  { %v4976_v21 = vld [vmem:[%s7401_s1 + $0x24c] ss:$16 sps:$4 sm:$0xff]   ;;  %v4971_v22 = vld [vmem:[%s7401_s1 + $0x240] ss:$16 sps:$4 sm:$0xff]   ;;  %v4974_v23 = vld [vmem:[%s7401_s1 + $0x248] ss:$16 sps:$4 sm:$0xff]  }
  0x1b   :  { %3113 = vmatpush1.bf16.msra.mxu0 %v4903_v26  ;;  %3441 = vmatpush1.bf16.msra.mxu1 %v4904_v27  ;;  %v4979_v24 = vld [vmem:[%s7401_s1 + $0x264] ss:$16 sps:$4 sm:$0xff]   ;;  %v4982_v25 = vld [vmem:[%s7401_s1 + $0x26c] ss:$16 sps:$4 sm:$0xff]   ;;  %v4977_v26 = vld [vmem:[%s7401_s1 + $0x260] ss:$16 sps:$4 sm:$0xff]  }
  0x1c   :  { %3114 = vmatprep.subr.bf16.mxu0 %v4905_v28  ;;  %3442 = vmatprep.subr.bf16.mxu1 %v4907_v29  ;;  %v4980_v27 = vld [vmem:[%s7401_s1 + $0x268] ss:$16 sps:$4 sm:$0xff]   ;;  %v4985_v28 = vld [vmem:[%s7401_s1 + $0x284] ss:$16 sps:$4 sm:$0xff]   ;;  %v4988_v29 = vld [vmem:[%s7401_s1 + $0x28c] ss:$16 sps:$4 sm:$0xff]  }
  0x1d   :  { %v4997_v36 = vld [vmem:[%s7401_s1 + $0x2c4] ss:$16 sps:$4 sm:$0xff]   ;;  %v5000_v37 = vld [vmem:[%s7401_s1 + $0x2cc] ss:$16 sps:$4 sm:$0xff]   ;;  %v4995_v38 = vld [vmem:[%s7401_s1 + $0x2c0] ss:$16 sps:$4 sm:$0xff]  }
  0x1e   :  { %v5001_v43 = vld [vmem:[%s7401_s1 + $0x2e0] ss:$16 sps:$4 sm:$0xff]   ;;  %v5016_v54 = vld [vmem:[%s7401_s1 + $0x328] ss:$16 sps:$4 sm:$0xff]   ;;  %v5030_v60 = vld [vmem:[%s7401_s1 + $0x36c] ss:$16 sps:$4 sm:$0xff]  }
  0x1f   :  { %3115 = vmatpush1.bf16.msra.mxu0 %v4909_v30  ;;  %3443 = vmatpush1.bf16.msra.mxu1 %v4910_v31  ;;  %v4983_v30 = vld [vmem:[%s7401_s1 + $0x280] ss:$16 sps:$4 sm:$0xff]   ;;  %v4986_v31 = vld [vmem:[%s7401_s1 + $0x288] ss:$16 sps:$4 sm:$0xff]  }
  0x20   :  { %3116 = vmatprep.subr.bf16.mxu0 %v4911_v32  ;;  %3444 = vmatprep.subr.bf16.mxu1 %v4913_v33  ;;  %v4991_v32 = vld [vmem:[%s7401_s1 + $0x2a4] ss:$16 sps:$4 sm:$0xff]   ;;  %v4994_v33 = vld [vmem:[%s7401_s1 + $0x2ac] ss:$16 sps:$4 sm:$0xff]   ;;  %v5022_v58 = vld [vmem:[%s7401_s1 + $0x348] ss:$16 sps:$4 sm:$0xff]  }
  0x23   :  { %3117 = vmatpush1.bf16.msra.mxu0 %v4915_v34  ;;  %3445 = vmatpush1.bf16.msra.mxu1 %v4916_v35  ;;  %v4989_v34 = vld [vmem:[%s7401_s1 + $0x2a0] ss:$16 sps:$4 sm:$0xff]   ;;  %v4992_v35 = vld [vmem:[%s7401_s1 + $0x2a8] ss:$16 sps:$4 sm:$0xff]  }
  0x24   :  { %3118 = vmatprep.subr.bf16.mxu0 %v4917_v39  ;;  %3446 = vmatprep.subr.bf16.mxu1 %v4919_v40  ;;  %v4998_v39 = vld [vmem:[%s7401_s1 + $0x2c8] ss:$16 sps:$4 sm:$0xff]   ;;  %v5003_v40 = vld [vmem:[%s7401_s1 + $0x2e4] ss:$16 sps:$4 sm:$0xff]  }
  0x27   :  { %3119 = vmatpush1.bf16.msra.mxu0 %v4921_v41  ;;  %3447 = vmatpush1.bf16.msra.mxu1 %v4922_v44  ;;  %v5006_v41 = vld [vmem:[%s7401_s1 + $0x2ec] ss:$16 sps:$4 sm:$0xff]   ;;  %v5004_v44 = vld [vmem:[%s7401_s1 + $0x2e8] ss:$16 sps:$4 sm:$0xff]  }
  0x28   :  { %3120 = vmatprep.subr.bf16.mxu0 %v4923_v45  ;;  %3448 = vmatprep.subr.bf16.mxu1 %v4925_v46  ;;  %v5009_v45 = vld [vmem:[%s7401_s1 + $0x304] ss:$16 sps:$4 sm:$0xff]   ;;  %v5012_v46 = vld [vmem:[%s7401_s1 + $0x30c] ss:$16 sps:$4 sm:$0xff]  }
  0x2b   :  { %3121 = vmatpush1.bf16.msra.mxu0 %v4927_v47  ;;  %3449 = vmatpush1.bf16.msra.mxu1 %v4928_v48  ;;  %v5007_v47 = vld [vmem:[%s7401_s1 + $0x300] ss:$16 sps:$4 sm:$0xff]   ;;  %v5010_v48 = vld [vmem:[%s7401_s1 + $0x308] ss:$16 sps:$4 sm:$0xff]  }
  0x2c   :  { %3122 = vmatprep.subr.bf16.mxu0 %v4929_v50  ;;  %3450 = vmatprep.subr.bf16.mxu1 %v4931_v51  ;;  %v5015_v50 = vld [vmem:[%s7401_s1 + $0x324] ss:$16 sps:$4 sm:$0xff]   ;;  %v5018_v51 = vld [vmem:[%s7401_s1 + $0x32c] ss:$16 sps:$4 sm:$0xff]  }
  0x2f   :  { %3123 = vmatpush1.bf16.msra.mxu0 %v4933_v53  ;;  %3451 = vmatpush1.bf16.msra.mxu1 %v4934_v55  ;;  %v5013_v53 = vld [vmem:[%s7401_s1 + $0x320] ss:$16 sps:$4 sm:$0xff]   ;;  %v5021_v55 = vld [vmem:[%s7401_s1 + $0x344] ss:$16 sps:$4 sm:$0xff]  }
  0x30   :  { %3124 = vmatprep.subr.bf16.mxu0 %v4935_v56  ;;  %3452 = vmatprep.subr.bf16.mxu1 %v4937_v57  ;;  %v5024_v56 = vld [vmem:[%s7401_s1 + $0x34c] ss:$16 sps:$4 sm:$0xff]   ;;  %v5019_v57 = vld [vmem:[%s7401_s1 + $0x340] ss:$16 sps:$4 sm:$0xff]  }
  0x33   :  { %3125 = vmatpush1.bf16.msra.mxu0 %v4939_v59  ;;  %3453 = vmatpush1.bf16.msra.mxu1 %v4940_v61  ;;  %v5027_v59 = vld [vmem:[%s7401_s1 + $0x364] ss:$16 sps:$4 sm:$0xff]   ;;  %v5025_v61 = vld [vmem:[%s7401_s1 + $0x360] ss:$16 sps:$4 sm:$0xff]  }
  0x34   :  { %3126 = vmatprep.subr.bf16.mxu0 %v4941_v62  ;;  %3454 = vmatprep.subr.bf16.mxu1 %v4943_v63  ;;  %v5028_v62 = vld [vmem:[%s7401_s1 + $0x368] ss:$16 sps:$4 sm:$0xff]   ;;  %v5033_v63 = vld [vmem:[%s7401_s1 + $0x384] ss:$16 sps:$4 sm:$0xff]  }
  0x37   :  { %3127 = vmatpush1.bf16.msra.mxu0 %v4945_v0  ;;  %3455 = vmatpush1.bf16.msra.mxu1 %v4946_v1  ;;  %v5036_v0 = vld [vmem:[%s7401_s1 + $0x38c] ss:$16 sps:$4 sm:$0xff]   ;;  %v5031_v1 = vld [vmem:[%s7401_s1 + $0x380] ss:$16 sps:$4 sm:$0xff]  }
  0x38   :  { %3128 = vmatprep.subr.bf16.mxu0 %v4947_v2  ;;  %3456 = vmatprep.subr.bf16.mxu1 %v4949_v3  ;;  %v5034_v2 = vld [vmem:[%s7401_s1 + $0x388] ss:$16 sps:$4 sm:$0xff]   ;;  %v5039_v3 = vld [vmem:[%s7401_s1 + $0x3a4] ss:$16 sps:$4 sm:$0xff]  }
  0x3b   :  { %3129 = vmatpush1.bf16.msra.mxu0 %v4951_v4  ;;  %3457 = vmatpush1.bf16.msra.mxu1 %v4952_v5  ;;  %v5042_v4 = vld [vmem:[%s7401_s1 + $0x3ac] ss:$16 sps:$4 sm:$0xff]   ;;  %v5037_v5 = vld [vmem:[%s7401_s1 + $0x3a0] ss:$16 sps:$4 sm:$0xff]  }
  0x3c   :  { %3130 = vmatprep.subr.bf16.mxu0 %v4953_v6  ;;  %3458 = vmatprep.subr.bf16.mxu1 %v4955_v7  ;;  %v5040_v6 = vld [vmem:[%s7401_s1 + $0x3a8] ss:$16 sps:$4 sm:$0xff]   ;;  %v5045_v7 = vld [vmem:[%s7401_s1 + $0x3c4] ss:$16 sps:$4 sm:$0xff]  }
  0x3f   :  { %3131 = vmatpush1.bf16.msra.mxu0 %v4957_v8  ;;  %3459 = vmatpush1.bf16.msra.mxu1 %v4958_v9  ;;  %v5048_v8 = vld [vmem:[%s7401_s1 + $0x3cc] ss:$16 sps:$4 sm:$0xff]   ;;  %v540_v9 = vcombine.high %v5847_v52, %v5847_v52 }
  0x40   :  { %3141 = vmatprep.subr.bf16.mxu0 %v4961_v10  ;;  %3469 = vmatprep.subr.bf16.mxu1 %v4964_v11  ;;  %v5043_v10 = vld [vmem:[%s7401_s1 + $0x3c0] ss:$16 sps:$4 sm:$0xff]   ;;  %v5046_v11 = vld [vmem:[%s7401_s1 + $0x3c8] ss:$16 sps:$4 sm:$0xff]   ;;  %v5054_v52 = vld [vmem:[%s7401_s1 + $0x3ec] ss:$16 sps:$4 sm:$0xff]  }
  0x42   :  { %3133 = vmatmul.mubr.bf16.vlgmr.msra.gmra.mrb[0].mxu0 %v5916_v13  ;;  %3461 = vmatmul.mubr.bf16.vlgmr.msra.gmra.mrb[0].mxu1 %v5916_v13 }
  0x43   :  { %3142 = vmatpush1.bf16.msra.mxu0 %v4959_v12  ;;  %3470 = vmatpush1.bf16.msra.mxu1 %v4962_v14  ;;  %v5051_v12 = vld [vmem:[%s7401_s1 + $0x3e4] ss:$16 sps:$4 sm:$0xff]   ;;  %v6100_v14 = vrot.slane %v540_v9, %v5836_v49  ;;  %v5130_v9 = vld [vmem:[%s7401_s1 + $0x588] ss:$16 sps:$4 sm:$0xff]  }
  0x44   :  { %3143 = vmatprep.subr.bf16.mxu0 %v4967_v15  ;;  %3471 = vmatprep.subr.bf16.mxu1 %v4970_v16  ;;  %v5049_v15 = vld [vmem:[%s7401_s1 + $0x3e0] ss:$16 sps:$4 sm:$0xff]   ;;  %v5052_v16 = vld [vmem:[%s7401_s1 + $0x3e8] ss:$16 sps:$4 sm:$0xff]  }
  0x45   :  { %3173 = vmatprep.mubr.bf16.mxu0 %v587_v17  ;;  %3501 = vmatprep.mubr.bf16.mxu1 %v587_v17  ;;  %v5057_v17 = vld [vmem:[%s7401_s1 + $0x404] ss:$16 sps:$4 sm:$0xff]  }
  0x47   :  { %3144 = vmatpush1.bf16.msra.mxu0 %v4965_v18  ;;  %3472 = vmatpush1.bf16.msra.mxu1 %v4968_v19  ;;  %v5060_v18 = vld [vmem:[%s7401_s1 + $0x40c] ss:$16 sps:$4 sm:$0xff]   ;;  %v556_v19 = vcombine.high %v6100_v14, %v6100_v14 }
  0x48   :  { %3145 = vmatprep.subr.bf16.mxu0 %v4973_v20  ;;  %3473 = vmatprep.subr.bf16.mxu1 %v4976_v21  ;;  %v5055_v20 = vld [vmem:[%s7401_s1 + $0x400] ss:$16 sps:$4 sm:$0xff]   ;;  %v585_v21 = vcombine.high %v5916_v13, %v5916_v13 }
  0x49   :  { %v5061_v13 = vld [vmem:[%s7401_s1 + $0x420] ss:$16 sps:$4 sm:$0xff]  }
  0x4b   :  { %3146 = vmatpush1.bf16.msra.mxu0 %v4971_v22  ;;  %3474 = vmatpush1.bf16.msra.mxu1 %v4974_v23  ;;  %v5058_v22 = vld [vmem:[%s7401_s1 + $0x408] ss:$16 sps:$4 sm:$0xff]   ;;  %v5063_v23 = vld [vmem:[%s7401_s1 + $0x424] ss:$16 sps:$4 sm:$0xff]  }
  0x4c   :  { %3147 = vmatprep.subr.bf16.mxu0 %v4979_v24  ;;  %3475 = vmatprep.subr.bf16.mxu1 %v4982_v25  ;;  %v5066_v24 = vld [vmem:[%s7401_s1 + $0x42c] ss:$16 sps:$4 sm:$0xff]   ;;  %v6131_v25 = vrot.slane %v556_v19, %v5836_v49  ;;  %v5147_v19 = vld [vmem:[%s7401_s1 + $0x5e4] ss:$16 sps:$4 sm:$0xff]  }
  0x4f   :  { %3148 = vmatpush1.bf16.msra.mxu0 %v4977_v26  ;;  %3476 = vmatpush1.bf16.msra.mxu1 %v4980_v27  ;;  %v5064_v26 = vld [vmem:[%s7401_s1 + $0x428] ss:$16 sps:$4 sm:$0xff]   ;;  %v5069_v27 = vld [vmem:[%s7401_s1 + $0x444] ss:$16 sps:$4 sm:$0xff]  }
  0x50   :  { %3149 = vmatprep.subr.bf16.mxu0 %v4985_v28  ;;  %3477 = vmatprep.subr.bf16.mxu1 %v4988_v29  ;;  %v5072_v28 = vld [vmem:[%s7401_s1 + $0x44c] ss:$16 sps:$4 sm:$0xff]   ;;  %v5067_v29 = vld [vmem:[%s7401_s1 + $0x440] ss:$16 sps:$4 sm:$0xff]  }
  0x53   :  { %3150 = vmatpush1.bf16.msra.mxu0 %v4983_v30  ;;  %3478 = vmatpush1.bf16.msra.mxu1 %v4986_v31  ;;  %v5070_v30 = vld [vmem:[%s7401_s1 + $0x448] ss:$16 sps:$4 sm:$0xff]   ;;  %v5075_v31 = vld [vmem:[%s7401_s1 + $0x464] ss:$16 sps:$4 sm:$0xff]  }
  0x54   :  { %3151 = vmatprep.subr.bf16.mxu0 %v4991_v32  ;;  %3479 = vmatprep.subr.bf16.mxu1 %v4994_v33  ;;  %v5078_v32 = vld [vmem:[%s7401_s1 + $0x46c] ss:$16 sps:$4 sm:$0xff]   ;;  %v5073_v33 = vld [vmem:[%s7401_s1 + $0x460] ss:$16 sps:$4 sm:$0xff]  }
  0x57   :  { %3152 = vmatpush1.bf16.msra.mxu0 %v4989_v34  ;;  %3480 = vmatpush1.bf16.msra.mxu1 %v4992_v35  ;;  %v5076_v34 = vld [vmem:[%s7401_s1 + $0x468] ss:$16 sps:$4 sm:$0xff]   ;;  %v5081_v35 = vld [vmem:[%s7401_s1 + $0x484] ss:$16 sps:$4 sm:$0xff]  }
  0x58   :  { %3153 = vmatprep.subr.bf16.mxu0 %v4997_v36  ;;  %3481 = vmatprep.subr.bf16.mxu1 %v5000_v37  ;;  %v5084_v36 = vld [vmem:[%s7401_s1 + $0x48c] ss:$16 sps:$4 sm:$0xff]   ;;  %v5079_v37 = vld [vmem:[%s7401_s1 + $0x480] ss:$16 sps:$4 sm:$0xff]  }
  0x5b   :  { %3154 = vmatpush1.bf16.msra.mxu0 %v4995_v38  ;;  %3482 = vmatpush1.bf16.msra.mxu1 %v4998_v39  ;;  %v5082_v38 = vld [vmem:[%s7401_s1 + $0x488] ss:$16 sps:$4 sm:$0xff]   ;;  %v5087_v39 = vld [vmem:[%s7401_s1 + $0x4a4] ss:$16 sps:$4 sm:$0xff]  }
  0x5c   :  { %3155 = vmatprep.subr.bf16.mxu0 %v5003_v40  ;;  %3483 = vmatprep.subr.bf16.mxu1 %v5006_v41  ;;  %v5090_v40 = vld [vmem:[%s7401_s1 + $0x4ac] ss:$16 sps:$4 sm:$0xff]   ;;  %v5085_v41 = vld [vmem:[%s7401_s1 + $0x4a0] ss:$16 sps:$4 sm:$0xff]  }
  0x5f   :  { %3156 = vmatpush1.bf16.msra.mxu0 %v5001_v43  ;;  %3484 = vmatpush1.bf16.msra.mxu1 %v5004_v44  ;;  %v5088_v43 = vld [vmem:[%s7401_s1 + $0x4a8] ss:$16 sps:$4 sm:$0xff]   ;;  %v5093_v44 = vld [vmem:[%s7401_s1 + $0x4c4] ss:$16 sps:$4 sm:$0xff]  }
  0x60   :  { %3157 = vmatprep.subr.bf16.mxu0 %v5009_v45  ;;  %3485 = vmatprep.subr.bf16.mxu1 %v5012_v46  ;;  %v5096_v45 = vld [vmem:[%s7401_s1 + $0x4cc] ss:$16 sps:$4 sm:$0xff]   ;;  %v5091_v46 = vld [vmem:[%s7401_s1 + $0x4c0] ss:$16 sps:$4 sm:$0xff]  }
  0x63   :  { %3158 = vmatpush1.bf16.msra.mxu0 %v5007_v47  ;;  %3486 = vmatpush1.bf16.msra.mxu1 %v5010_v48  ;;  %v5094_v47 = vld [vmem:[%s7401_s1 + $0x4c8] ss:$16 sps:$4 sm:$0xff]   ;;  %v5099_v48 = vld [vmem:[%s7401_s1 + $0x4e4] ss:$16 sps:$4 sm:$0xff]  }
  0x64   :  { %3159 = vmatprep.subr.bf16.mxu0 %v5015_v50  ;;  %3487 = vmatprep.subr.bf16.mxu1 %v5018_v51  ;;  %v5102_v50 = vld [vmem:[%s7401_s1 + $0x4ec] ss:$16 sps:$4 sm:$0xff]   ;;  %v5097_v51 = vld [vmem:[%s7401_s1 + $0x4e0] ss:$16 sps:$4 sm:$0xff]  }
  0x67   :  { %3160 = vmatpush1.bf16.msra.mxu0 %v5013_v53  ;;  %3488 = vmatpush1.bf16.msra.mxu1 %v5016_v54  ;;  %v5100_v53 = vld [vmem:[%s7401_s1 + $0x4e8] ss:$16 sps:$4 sm:$0xff]   ;;  %v5105_v54 = vld [vmem:[%s7401_s1 + $0x504] ss:$16 sps:$4 sm:$0xff]  }
  0x68   :  { %3161 = vmatprep.subr.bf16.mxu0 %v5021_v55  ;;  %3489 = vmatprep.subr.bf16.mxu1 %v5024_v56  ;;  %v5108_v55 = vld [vmem:[%s7401_s1 + $0x50c] ss:$16 sps:$4 sm:$0xff]   ;;  %v5103_v56 = vld [vmem:[%s7401_s1 + $0x500] ss:$16 sps:$4 sm:$0xff]  }
  0x6b   :  { %3162 = vmatpush1.bf16.msra.mxu0 %v5019_v57  ;;  %3490 = vmatpush1.bf16.msra.mxu1 %v5022_v58  ;;  %v5106_v57 = vld [vmem:[%s7401_s1 + $0x508] ss:$16 sps:$4 sm:$0xff]   ;;  %v5111_v58 = vld [vmem:[%s7401_s1 + $0x524] ss:$16 sps:$4 sm:$0xff]  }
  0x6c   :  { %3163 = vmatprep.subr.bf16.mxu0 %v5027_v59  ;;  %3491 = vmatprep.subr.bf16.mxu1 %v5030_v60  ;;  %v5114_v59 = vld [vmem:[%s7401_s1 + $0x52c] ss:$16 sps:$4 sm:$0xff]   ;;  %v5109_v60 = vld [vmem:[%s7401_s1 + $0x520] ss:$16 sps:$4 sm:$0xff]  }
  0x6f   :  { %3164 = vmatpush1.bf16.msra.mxu0 %v5025_v61  ;;  %3492 = vmatpush1.bf16.msra.mxu1 %v5028_v62  ;;  %v5112_v61 = vld [vmem:[%s7401_s1 + $0x528] ss:$16 sps:$4 sm:$0xff]   ;;  %v5117_v62 = vld [vmem:[%s7401_s1 + $0x544] ss:$16 sps:$4 sm:$0xff]  }
  0x70   :  { %3165 = vmatprep.subr.bf16.mxu0 %v5033_v63  ;;  %3493 = vmatprep.subr.bf16.mxu1 %v5036_v0  ;;  %v5120_v63 = vld [vmem:[%s7401_s1 + $0x54c] ss:$16 sps:$4 sm:$0xff]   ;;  %v5115_v0 = vld [vmem:[%s7401_s1 + $0x540] ss:$16 sps:$4 sm:$0xff]  }
  0x73   :  { %3166 = vmatpush1.bf16.msra.mxu0 %v5031_v1  ;;  %3494 = vmatpush1.bf16.msra.mxu1 %v5034_v2  ;;  %v5118_v1 = vld [vmem:[%s7401_s1 + $0x548] ss:$16 sps:$4 sm:$0xff]   ;;  %v5123_v2 = vld [vmem:[%s7401_s1 + $0x564] ss:$16 sps:$4 sm:$0xff]  }
  0x74   :  { %3167 = vmatprep.subr.bf16.mxu0 %v5039_v3  ;;  %3495 = vmatprep.subr.bf16.mxu1 %v5042_v4  ;;  %v5126_v3 = vld [vmem:[%s7401_s1 + $0x56c] ss:$16 sps:$4 sm:$0xff]   ;;  %v5121_v4 = vld [vmem:[%s7401_s1 + $0x560] ss:$16 sps:$4 sm:$0xff]  }
  0x77   :  { %3168 = vmatpush1.bf16.msra.mxu0 %v5037_v5  ;;  %3496 = vmatpush1.bf16.msra.mxu1 %v5040_v6  ;;  %v5124_v5 = vld [vmem:[%s7401_s1 + $0x568] ss:$16 sps:$4 sm:$0xff]   ;;  %v5129_v6 = vld [vmem:[%s7401_s1 + $0x584] ss:$16 sps:$4 sm:$0xff]  }
  0x78   :  { %3169 = vmatprep.subr.bf16.mxu0 %v5045_v7  ;;  %3497 = vmatprep.subr.bf16.mxu1 %v5048_v8  ;;  %v5132_v7 = vld [vmem:[%s7401_s1 + $0x58c] ss:$16 sps:$4 sm:$0xff]   ;;  %v5127_v8 = vld [vmem:[%s7401_s1 + $0x580] ss:$16 sps:$4 sm:$0xff]  }
  0x7b   :  { %3170 = vmatpush1.bf16.msra.mxu0 %v5043_v10  ;;  %3498 = vmatpush1.bf16.msra.mxu1 %v5046_v11  ;;  %v5135_v10 = vld [vmem:[%s7401_s1 + $0x5a4] ss:$16 sps:$4 sm:$0xff]   ;;  %v5138_v11 = vld [vmem:[%s7401_s1 + $0x5ac] ss:$16 sps:$4 sm:$0xff]  }
  0x7c   :  { %3171 = vmatprep.subr.bf16.mxu0 %v5051_v12  ;;  %3499 = vmatprep.subr.bf16.mxu1 %v5054_v52  ;;  %v5133_v12 = vld [vmem:[%s7401_s1 + $0x5a0] ss:$16 sps:$4 sm:$0xff]   ;;  %v5136_v52 = vld [vmem:[%s7401_s1 + $0x5a8] ss:$16 sps:$4 sm:$0xff]  }
  0x7f   :  { %3172 = vmatpush1.bf16.msra.mxu0 %v5049_v15  ;;  %3500 = vmatpush1.bf16.msra.mxu1 %v5052_v16  ;;  %v5141_v15 = vld [vmem:[%s7401_s1 + $0x5c4] ss:$16 sps:$4 sm:$0xff]   ;;  %v5144_v16 = vld [vmem:[%s7401_s1 + $0x5cc] ss:$16 sps:$4 sm:$0xff]  }
  0x80   :  { %3182 = vmatprep.subr.bf16.mxu0 %v5057_v17  ;;  %3510 = vmatprep.subr.bf16.mxu1 %v5060_v18  ;;  %v5139_v17 = vld [vmem:[%s7401_s1 + $0x5c0] ss:$16 sps:$4 sm:$0xff]   ;;  %v5142_v18 = vld [vmem:[%s7401_s1 + $0x5c8] ss:$16 sps:$4 sm:$0xff]  }
  0x82   :  { %3174 = vmatmul.mubr.bf16.vlgmr.msra.gmra.mrb[0].mxu0 %v585_v21  ;;  %3502 = vmatmul.mubr.bf16.vlgmr.msra.gmra.mrb[0].mxu1 %v585_v21  ;;  %v5145_v21 = vld [vmem:[%s7401_s1 + $0x5e0] ss:$16 sps:$4 sm:$0xff]  }
  0x83   :  { %3183 = vmatpush1.bf16.msra.mxu0 %v5055_v20  ;;  %3511 = vmatpush1.bf16.msra.mxu1 %v5058_v22  ;;  %v5150_v20 = vld [vmem:[%s7401_s1 + $0x5ec] ss:$16 sps:$4 sm:$0xff]   ;;  %v5148_v22 = vld [vmem:[%s7401_s1 + $0x5e8] ss:$16 sps:$4 sm:$0xff]  }
  0x84   :  { %3184 = vmatprep.subr.bf16.mxu0 %v5063_v23  ;;  %3512 = vmatprep.subr.bf16.mxu1 %v5066_v24  ;;  %v5154_v23 = vld [vmem:[%s7401_s1 + $0x604] ss:$16 sps:$4 sm:$0xff]   ;;  %v5157_v24 = vld [vmem:[%s7401_s1 + $0x60c] ss:$16 sps:$4 sm:$0xff]  }
  0x85   :  { %3214 = vmatprep.mubr.bf16.mxu0 %v6131_v25  ;;  %3542 = vmatprep.mubr.bf16.mxu1 %v6131_v25 }
  0x87   :  { %3185 = vmatpush1.bf16.msra.mxu0 %v5061_v13  ;;  %3513 = vmatpush1.bf16.msra.mxu1 %v5064_v26  ;;  %v5152_v13 = vld [vmem:[%s7401_s1 + $0x600] ss:$16 sps:$4 sm:$0xff]   ;;  %v6320_v26 = vrot.slane %v6100_v14, %v5836_v49  ;;  %v588_v14 = vcombine.high %v6131_v25, %v6131_v25  ;;  %v5166_v25 = vld [vmem:[%s7401_s1 + $0x644] ss:$16 sps:$4 sm:$0xff]  }
  0x88   :  { %3186 = vmatprep.subr.bf16.mxu0 %v5069_v27  ;;  %3514 = vmatprep.subr.bf16.mxu1 %v5072_v28  ;;  %v5155_v27 = vld [vmem:[%s7401_s1 + $0x608] ss:$16 sps:$4 sm:$0xff]   ;;  %v5160_v28 = vld [vmem:[%s7401_s1 + $0x624] ss:$16 sps:$4 sm:$0xff]  }
  0x8b   :  { %3187 = vmatpush1.bf16.msra.mxu0 %v5067_v29  ;;  %3515 = vmatpush1.bf16.msra.mxu1 %v5070_v30  ;;  %v5163_v29 = vld [vmem:[%s7401_s1 + $0x62c] ss:$16 sps:$4 sm:$0xff]   ;;  %v5158_v30 = vld [vmem:[%s7401_s1 + $0x620] ss:$16 sps:$4 sm:$0xff]  }
  0x8c   :  { %3188 = vmatprep.subr.bf16.mxu0 %v5075_v31  ;;  %3516 = vmatprep.subr.bf16.mxu1 %v5078_v32  ;;  %v5161_v31 = vld [vmem:[%s7401_s1 + $0x628] ss:$16 sps:$4 sm:$0xff]   ;;  %v5169_v32 = vld [vmem:[%s7401_s1 + $0x64c] ss:$16 sps:$4 sm:$0xff]  }
  0x8f   :  { %3189 = vmatpush1.bf16.msra.mxu0 %v5073_v33  ;;  %3517 = vmatpush1.bf16.msra.mxu1 %v5076_v34  ;;  %v5164_v33 = vld [vmem:[%s7401_s1 + $0x640] ss:$16 sps:$4 sm:$0xff]   ;;  %v5167_v34 = vld [vmem:[%s7401_s1 + $0x648] ss:$16 sps:$4 sm:$0xff]  }
  0x90   :  { %3190 = vmatprep.subr.bf16.mxu0 %v5081_v35  ;;  %3518 = vmatprep.subr.bf16.mxu1 %v5084_v36  ;;  %v5172_v35 = vld [vmem:[%s7401_s1 + $0x664] ss:$16 sps:$4 sm:$0xff]   ;;  %v5175_v36 = vld [vmem:[%s7401_s1 + $0x66c] ss:$16 sps:$4 sm:$0xff]  }
  0x93   :  { %3191 = vmatpush1.bf16.msra.mxu0 %v5079_v37  ;;  %3519 = vmatpush1.bf16.msra.mxu1 %v5082_v38  ;;  %v5170_v37 = vld [vmem:[%s7401_s1 + $0x660] ss:$16 sps:$4 sm:$0xff]   ;;  %v5173_v38 = vld [vmem:[%s7401_s1 + $0x668] ss:$16 sps:$4 sm:$0xff]  }
  0x94   :  { %3192 = vmatprep.subr.bf16.mxu0 %v5087_v39  ;;  %3520 = vmatprep.subr.bf16.mxu1 %v5090_v40  ;;  %v5178_v39 = vld [vmem:[%s7401_s1 + $0x684] ss:$16 sps:$4 sm:$0xff]   ;;  %v5181_v40 = vld [vmem:[%s7401_s1 + $0x68c] ss:$16 sps:$4 sm:$0xff]  }
  0x97   :  { %3193 = vmatpush1.bf16.msra.mxu0 %v5085_v41  ;;  %3521 = vmatpush1.bf16.msra.mxu1 %v5088_v43  ;;  %v5176_v41 = vld [vmem:[%s7401_s1 + $0x680] ss:$16 sps:$4 sm:$0xff]   ;;  %v5179_v43 = vld [vmem:[%s7401_s1 + $0x688] ss:$16 sps:$4 sm:$0xff]  }
  0x98   :  { %3194 = vmatprep.subr.bf16.mxu0 %v5093_v44  ;;  %3522 = vmatprep.subr.bf16.mxu1 %v5096_v45  ;;  %v5184_v44 = vld [vmem:[%s7401_s1 + $0x6a4] ss:$16 sps:$4 sm:$0xff]   ;;  %v5187_v45 = vld [vmem:[%s7401_s1 + $0x6ac] ss:$16 sps:$4 sm:$0xff]  }
  0x9b   :  { %3195 = vmatpush1.bf16.msra.mxu0 %v5091_v46  ;;  %3523 = vmatpush1.bf16.msra.mxu1 %v5094_v47  ;;  %v5182_v46 = vld [vmem:[%s7401_s1 + $0x6a0] ss:$16 sps:$4 sm:$0xff]   ;;  %v5185_v47 = vld [vmem:[%s7401_s1 + $0x6a8] ss:$16 sps:$4 sm:$0xff]  }
  0x9c   :  { %3196 = vmatprep.subr.bf16.mxu0 %v5099_v48  ;;  %3524 = vmatprep.subr.bf16.mxu1 %v5102_v50  ;;  %v5190_v48 = vld [vmem:[%s7401_s1 + $0x6c4] ss:$16 sps:$4 sm:$0xff]   ;;  %v5193_v50 = vld [vmem:[%s7401_s1 + $0x6cc] ss:$16 sps:$4 sm:$0xff]  }
  0x9f   :  { %3197 = vmatpush1.bf16.msra.mxu0 %v5097_v51  ;;  %3525 = vmatpush1.bf16.msra.mxu1 %v5100_v53  ;;  %v5188_v51 = vld [vmem:[%s7401_s1 + $0x6c0] ss:$16 sps:$4 sm:$0xff]   ;;  %v5191_v53 = vld [vmem:[%s7401_s1 + $0x6c8] ss:$16 sps:$4 sm:$0xff]  }
  0xa0   :  { %3198 = vmatprep.subr.bf16.mxu0 %v5105_v54  ;;  %3526 = vmatprep.subr.bf16.mxu1 %v5108_v55  ;;  %v5196_v54 = vld [vmem:[%s7401_s1 + $0x6e4] ss:$16 sps:$4 sm:$0xff]   ;;  %v5199_v55 = vld [vmem:[%s7401_s1 + $0x6ec] ss:$16 sps:$4 sm:$0xff]  }
  0xa3   :  { %3199 = vmatpush1.bf16.msra.mxu0 %v5103_v56  ;;  %3527 = vmatpush1.bf16.msra.mxu1 %v5106_v57  ;;  %v5194_v56 = vld [vmem:[%s7401_s1 + $0x6e0] ss:$16 sps:$4 sm:$0xff]   ;;  %v5197_v57 = vld [vmem:[%s7401_s1 + $0x6e8] ss:$16 sps:$4 sm:$0xff]  }
  0xa4   :  { %3200 = vmatprep.subr.bf16.mxu0 %v5111_v58  ;;  %3528 = vmatprep.subr.bf16.mxu1 %v5114_v59  ;;  %v5202_v58 = vld [vmem:[%s7401_s1 + $0x704] ss:$16 sps:$4 sm:$0xff]   ;;  %v5205_v59 = vld [vmem:[%s7401_s1 + $0x70c] ss:$16 sps:$4 sm:$0xff]  }
  0xa7   :  { %3201 = vmatpush1.bf16.msra.mxu0 %v5109_v60  ;;  %3529 = vmatpush1.bf16.msra.mxu1 %v5112_v61  ;;  %v5200_v60 = vld [vmem:[%s7401_s1 + $0x700] ss:$16 sps:$4 sm:$0xff]   ;;  %v5203_v61 = vld [vmem:[%s7401_s1 + $0x708] ss:$16 sps:$4 sm:$0xff]  }
  0xa8   :  { %3202 = vmatprep.subr.bf16.mxu0 %v5117_v62  ;;  %3530 = vmatprep.subr.bf16.mxu1 %v5120_v63  ;;  %v5208_v62 = vld [vmem:[%s7401_s1 + $0x724] ss:$16 sps:$4 sm:$0xff]   ;;  %v5211_v63 = vld [vmem:[%s7401_s1 + $0x72c] ss:$16 sps:$4 sm:$0xff]  }
  0xab   :  { %3203 = vmatpush1.bf16.msra.mxu0 %v5115_v0  ;;  %3531 = vmatpush1.bf16.msra.mxu1 %v5118_v1  ;;  %v5206_v0 = vld [vmem:[%s7401_s1 + $0x720] ss:$16 sps:$4 sm:$0xff]   ;;  %v5209_v1 = vld [vmem:[%s7401_s1 + $0x728] ss:$16 sps:$4 sm:$0xff]  }
  0xac   :  { %3204 = vmatprep.subr.bf16.mxu0 %v5123_v2  ;;  %3532 = vmatprep.subr.bf16.mxu1 %v5126_v3  ;;  %v5214_v2 = vld [vmem:[%s7401_s1 + $0x744] ss:$16 sps:$4 sm:$0xff]   ;;  %v5217_v3 = vld [vmem:[%s7401_s1 + $0x74c] ss:$16 sps:$4 sm:$0xff]  }
  0xaf   :  { %3205 = vmatpush1.bf16.msra.mxu0 %v5121_v4  ;;  %3533 = vmatpush1.bf16.msra.mxu1 %v5124_v5  ;;  %v5212_v4 = vld [vmem:[%s7401_s1 + $0x740] ss:$16 sps:$4 sm:$0xff]   ;;  %v5215_v5 = vld [vmem:[%s7401_s1 + $0x748] ss:$16 sps:$4 sm:$0xff]  }
  0xb0   :  { %3206 = vmatprep.subr.bf16.mxu0 %v5129_v6  ;;  %3534 = vmatprep.subr.bf16.mxu1 %v5132_v7  ;;  %v5220_v6 = vld [vmem:[%s7401_s1 + $0x764] ss:$16 sps:$4 sm:$0xff]   ;;  %v5223_v7 = vld [vmem:[%s7401_s1 + $0x76c] ss:$16 sps:$4 sm:$0xff]  }
  0xb3   :  { %3207 = vmatpush1.bf16.msra.mxu0 %v5127_v8  ;;  %3535 = vmatpush1.bf16.msra.mxu1 %v5130_v9  ;;  %v5218_v8 = vld [vmem:[%s7401_s1 + $0x760] ss:$16 sps:$4 sm:$0xff]   ;;  %v5221_v9 = vld [vmem:[%s7401_s1 + $0x768] ss:$16 sps:$4 sm:$0xff]  }
  0xb4   :  { %3208 = vmatprep.subr.bf16.mxu0 %v5135_v10  ;;  %3536 = vmatprep.subr.bf16.mxu1 %v5138_v11  ;;  %v5226_v10 = vld [vmem:[%s7401_s1 + $0x784] ss:$16 sps:$4 sm:$0xff]   ;;  %v5229_v11 = vld [vmem:[%s7401_s1 + $0x78c] ss:$16 sps:$4 sm:$0xff]  }
  0xb7   :  { %3209 = vmatpush1.bf16.msra.mxu0 %v5133_v12  ;;  %3537 = vmatpush1.bf16.msra.mxu1 %v5136_v52  ;;  %v5224_v12 = vld [vmem:[%s7401_s1 + $0x780] ss:$16 sps:$4 sm:$0xff]   ;;  %v5227_v52 = vld [vmem:[%s7401_s1 + $0x788] ss:$16 sps:$4 sm:$0xff]  }
  0xb8   :  { %3210 = vmatprep.subr.bf16.mxu0 %v5141_v15  ;;  %3538 = vmatprep.subr.bf16.mxu1 %v5144_v16  ;;  %v5232_v15 = vld [vmem:[%s7401_s1 + $0x7a4] ss:$16 sps:$4 sm:$0xff]   ;;  %v5235_v16 = vld [vmem:[%s7401_s1 + $0x7ac] ss:$16 sps:$4 sm:$0xff]  }
  0xbb   :  { %3211 = vmatpush1.bf16.msra.mxu0 %v5139_v17  ;;  %3539 = vmatpush1.bf16.msra.mxu1 %v5142_v18  ;;  %v5230_v17 = vld [vmem:[%s7401_s1 + $0x7a0] ss:$16 sps:$4 sm:$0xff]   ;;  %v5233_v18 = vld [vmem:[%s7401_s1 + $0x7a8] ss:$16 sps:$4 sm:$0xff]  }
  0xbc   :  { %3212 = vmatprep.subr.bf16.mxu0 %v5147_v19  ;;  %3540 = vmatprep.subr.bf16.mxu1 %v5150_v20  ;;  %v5238_v19 = vld [vmem:[%s7401_s1 + $0x7c4] ss:$16 sps:$4 sm:$0xff]   ;;  %v5241_v20 = vld [vmem:[%s7401_s1 + $0x7cc] ss:$16 sps:$4 sm:$0xff]  }
  0xbf   :  { %3213 = vmatpush1.bf16.msra.mxu0 %v5145_v21  ;;  %3541 = vmatpush1.bf16.msra.mxu1 %v5148_v22  ;;  %v6494_v21 = vld [vmem:[%s7400_s0 + $0x8] sm:$0xff]  ;;  %v5236_v22 = vld [vmem:[%s7401_s1 + $0x7c0] ss:$16 sps:$4 sm:$0xff]  }
  0xc0   :  { %3223 = vmatprep.subr.bf16.mxu0 %v5154_v23  ;;  %3551 = vmatprep.subr.bf16.mxu1 %v5157_v24  ;;  %v5239_v23 = vld [vmem:[%s7401_s1 + $0x7c8] ss:$16 sps:$4 sm:$0xff]   ;;  %v5244_v24 = vld [vmem:[%s7401_s1 + $0x7e4] ss:$16 sps:$4 sm:$0xff]  }
  0xc2   :  { %3215 = vmatmul.mubr.bf16.vlgmr.msra.gmra.mrb[0].mxu0 %v6320_v26  ;;  %3543 = vmatmul.mubr.bf16.vlgmr.msra.gmra.mrb[0].mxu1 %v6320_v26 }
  0xc3   :  { %3224 = vmatpush1.bf16.msra.mxu0 %v5152_v13  ;;  %3552 = vmatpush1.bf16.msra.mxu1 %v5155_v27  ;;  %v5247_v13 = vld [vmem:[%s7401_s1 + $0x7ec] ss:$16 sps:$4 sm:$0xff]   ;;  %v6510_v27 = vrot.slane %v6494_v21, %v5836_v49 }
  0xc4   :  { %3225 = vmatprep.subr.bf16.mxu0 %v5160_v28  ;;  %3553 = vmatprep.subr.bf16.mxu1 %v5163_v29  ;;  %v5242_v28 = vld [vmem:[%s7401_s1 + $0x7e0] ss:$16 sps:$4 sm:$0xff]   ;;  %v5245_v29 = vld [vmem:[%s7401_s1 + $0x7e8] ss:$16 sps:$4 sm:$0xff]  }
  0xc5   :  { %3255 = vmatprep.mubr.bf16.mxu0 %v588_v14  ;;  %3583 = vmatprep.mubr.bf16.mxu1 %v588_v14  ;;  %v5250_v14 = vld [vmem:[%s7401_s1 + $0x804] ss:$16 sps:$4 sm:$0xff]  }
  0xc7   :  { %3226 = vmatpush1.bf16.msra.mxu0 %v5158_v30  ;;  %3554 = vmatpush1.bf16.msra.mxu1 %v5161_v31  ;;  %v5253_v30 = vld [vmem:[%s7401_s1 + $0x80c] ss:$16 sps:$4 sm:$0xff]   ;;  %v604_v31 = vcombine.high %v6510_v27, %v6510_v27 }
  0xc8   :  { %3227 = vmatprep.subr.bf16.mxu0 %v5166_v25  ;;  %3555 = vmatprep.subr.bf16.mxu1 %v5169_v32  ;;  %v586_v25 = vcombine.high %v6320_v26, %v6320_v26  ;;  %v5248_v32 = vld [vmem:[%s7401_s1 + $0x800] ss:$16 sps:$4 sm:$0xff]   ;;  %v5259_v26 = vld [vmem:[%s7401_s1 + $0x82c] ss:$16 sps:$4 sm:$0xff]  }
  0xcb   :  { %3228 = vmatpush1.bf16.msra.mxu0 %v5164_v33  ;;  %3556 = vmatpush1.bf16.msra.mxu1 %v5167_v34  ;;  %v5251_v33 = vld [vmem:[%s7401_s1 + $0x808] ss:$16 sps:$4 sm:$0xff]   ;;  %v5256_v34 = vld [vmem:[%s7401_s1 + $0x824] ss:$16 sps:$4 sm:$0xff]  }
  0xcc   :  { %3229 = vmatprep.subr.bf16.mxu0 %v5172_v35  ;;  %3557 = vmatprep.subr.bf16.mxu1 %v5175_v36  ;;  %v6541_v35 = vrot.slane %v604_v31, %v5836_v49  ;;  %v5254_v36 = vld [vmem:[%s7401_s1 + $0x820] ss:$16 sps:$4 sm:$0xff]   ;;  %v5335_v31 = vld [vmem:[%s7401_s1 + $0x9c8] ss:$16 sps:$4 sm:$0xff]  }
  0xcf   :  { %3230 = vmatpush1.bf16.msra.mxu0 %v5170_v37  ;;  %3558 = vmatpush1.bf16.msra.mxu1 %v5173_v38  ;;  %v5257_v37 = vld [vmem:[%s7401_s1 + $0x828] ss:$16 sps:$4 sm:$0xff]   ;;  %v5262_v38 = vld [vmem:[%s7401_s1 + $0x844] ss:$16 sps:$4 sm:$0xff]  }
  0xd0   :  { %3231 = vmatprep.subr.bf16.mxu0 %v5178_v39  ;;  %3559 = vmatprep.subr.bf16.mxu1 %v5181_v40  ;;  %v5265_v39 = vld [vmem:[%s7401_s1 + $0x84c] ss:$16 sps:$4 sm:$0xff]   ;;  %v5260_v40 = vld [vmem:[%s7401_s1 + $0x840] ss:$16 sps:$4 sm:$0xff]  }
  0xd3   :  { %3232 = vmatpush1.bf16.msra.mxu0 %v5176_v41  ;;  %3560 = vmatpush1.bf16.msra.mxu1 %v5179_v43  ;;  %v5263_v41 = vld [vmem:[%s7401_s1 + $0x848] ss:$16 sps:$4 sm:$0xff]   ;;  %v5268_v43 = vld [vmem:[%s7401_s1 + $0x864] ss:$16 sps:$4 sm:$0xff]  }
  0xd4   :  { %3233 = vmatprep.subr.bf16.mxu0 %v5184_v44  ;;  %3561 = vmatprep.subr.bf16.mxu1 %v5187_v45  ;;  %v5271_v44 = vld [vmem:[%s7401_s1 + $0x86c] ss:$16 sps:$4 sm:$0xff]   ;;  %v5266_v45 = vld [vmem:[%s7401_s1 + $0x860] ss:$16 sps:$4 sm:$0xff]  }
  0xd7   :  { %3234 = vmatpush1.bf16.msra.mxu0 %v5182_v46  ;;  %3562 = vmatpush1.bf16.msra.mxu1 %v5185_v47  ;;  %v5269_v46 = vld [vmem:[%s7401_s1 + $0x868] ss:$16 sps:$4 sm:$0xff]   ;;  %v5274_v47 = vld [vmem:[%s7401_s1 + $0x884] ss:$16 sps:$4 sm:$0xff]  }
  0xd8   :  { %3235 = vmatprep.subr.bf16.mxu0 %v5190_v48  ;;  %3563 = vmatprep.subr.bf16.mxu1 %v5193_v50  ;;  %v5277_v48 = vld [vmem:[%s7401_s1 + $0x88c] ss:$16 sps:$4 sm:$0xff]   ;;  %v5272_v50 = vld [vmem:[%s7401_s1 + $0x880] ss:$16 sps:$4 sm:$0xff]  }
  0xdb   :  { %3236 = vmatpush1.bf16.msra.mxu0 %v5188_v51  ;;  %3564 = vmatpush1.bf16.msra.mxu1 %v5191_v53  ;;  %v5275_v51 = vld [vmem:[%s7401_s1 + $0x888] ss:$16 sps:$4 sm:$0xff]   ;;  %v5280_v53 = vld [vmem:[%s7401_s1 + $0x8a4] ss:$16 sps:$4 sm:$0xff]  }
  0xdc   :  { %3237 = vmatprep.subr.bf16.mxu0 %v5196_v54  ;;  %3565 = vmatprep.subr.bf16.mxu1 %v5199_v55  ;;  %v5283_v54 = vld [vmem:[%s7401_s1 + $0x8ac] ss:$16 sps:$4 sm:$0xff]   ;;  %v5278_v55 = vld [vmem:[%s7401_s1 + $0x8a0] ss:$16 sps:$4 sm:$0xff]  }
  0xdf   :  { %3238 = vmatpush1.bf16.msra.mxu0 %v5194_v56  ;;  %3566 = vmatpush1.bf16.msra.mxu1 %v5197_v57  ;;  %v5281_v56 = vld [vmem:[%s7401_s1 + $0x8a8] ss:$16 sps:$4 sm:$0xff]   ;;  %v5286_v57 = vld [vmem:[%s7401_s1 + $0x8c4] ss:$16 sps:$4 sm:$0xff]  }
  0xe0   :  { %3239 = vmatprep.subr.bf16.mxu0 %v5202_v58  ;;  %3567 = vmatprep.subr.bf16.mxu1 %v5205_v59  ;;  %v5289_v58 = vld [vmem:[%s7401_s1 + $0x8cc] ss:$16 sps:$4 sm:$0xff]   ;;  %v5284_v59 = vld [vmem:[%s7401_s1 + $0x8c0] ss:$16 sps:$4 sm:$0xff]  }
  0xe3   :  { %3240 = vmatpush1.bf16.msra.mxu0 %v5200_v60  ;;  %3568 = vmatpush1.bf16.msra.mxu1 %v5203_v61  ;;  %v5287_v60 = vld [vmem:[%s7401_s1 + $0x8c8] ss:$16 sps:$4 sm:$0xff]   ;;  %v5292_v61 = vld [vmem:[%s7401_s1 + $0x8e4] ss:$16 sps:$4 sm:$0xff]  }
  0xe4   :  { %3241 = vmatprep.subr.bf16.mxu0 %v5208_v62  ;;  %3569 = vmatprep.subr.bf16.mxu1 %v5211_v63  ;;  %v5295_v62 = vld [vmem:[%s7401_s1 + $0x8ec] ss:$16 sps:$4 sm:$0xff]   ;;  %v5290_v63 = vld [vmem:[%s7401_s1 + $0x8e0] ss:$16 sps:$4 sm:$0xff]  }
  0xe7   :  { %3242 = vmatpush1.bf16.msra.mxu0 %v5206_v0  ;;  %3570 = vmatpush1.bf16.msra.mxu1 %v5209_v1  ;;  %v5293_v0 = vld [vmem:[%s7401_s1 + $0x8e8] ss:$16 sps:$4 sm:$0xff]   ;;  %v5298_v1 = vld [vmem:[%s7401_s1 + $0x904] ss:$16 sps:$4 sm:$0xff]  }
  0xe8   :  { %3243 = vmatprep.subr.bf16.mxu0 %v5214_v2  ;;  %3571 = vmatprep.subr.bf16.mxu1 %v5217_v3  ;;  %v5301_v2 = vld [vmem:[%s7401_s1 + $0x90c] ss:$16 sps:$4 sm:$0xff]   ;;  %v5296_v3 = vld [vmem:[%s7401_s1 + $0x900] ss:$16 sps:$4 sm:$0xff]  }
  0xeb   :  { %3244 = vmatpush1.bf16.msra.mxu0 %v5212_v4  ;;  %3572 = vmatpush1.bf16.msra.mxu1 %v5215_v5  ;;  %v5299_v4 = vld [vmem:[%s7401_s1 + $0x908] ss:$16 sps:$4 sm:$0xff]   ;;  %v5304_v5 = vld [vmem:[%s7401_s1 + $0x924] ss:$16 sps:$4 sm:$0xff]  }
  0xec   :  { %3245 = vmatprep.subr.bf16.mxu0 %v5220_v6  ;;  %3573 = vmatprep.subr.bf16.mxu1 %v5223_v7  ;;  %v5307_v6 = vld [vmem:[%s7401_s1 + $0x92c] ss:$16 sps:$4 sm:$0xff]   ;;  %v5302_v7 = vld [vmem:[%s7401_s1 + $0x920] ss:$16 sps:$4 sm:$0xff]  }
  0xef   :  { %3246 = vmatpush1.bf16.msra.mxu0 %v5218_v8  ;;  %3574 = vmatpush1.bf16.msra.mxu1 %v5221_v9  ;;  %v5305_v8 = vld [vmem:[%s7401_s1 + $0x928] ss:$16 sps:$4 sm:$0xff]   ;;  %v5310_v9 = vld [vmem:[%s7401_s1 + $0x944] ss:$16 sps:$4 sm:$0xff]  }
  0xf0   :  { %3247 = vmatprep.subr.bf16.mxu0 %v5226_v10  ;;  %3575 = vmatprep.subr.bf16.mxu1 %v5229_v11  ;;  %v5313_v10 = vld [vmem:[%s7401_s1 + $0x94c] ss:$16 sps:$4 sm:$0xff]   ;;  %v5308_v11 = vld [vmem:[%s7401_s1 + $0x940] ss:$16 sps:$4 sm:$0xff]  }
  0xf3   :  { %3248 = vmatpush1.bf16.msra.mxu0 %v5224_v12  ;;  %3576 = vmatpush1.bf16.msra.mxu1 %v5227_v52  ;;  %v5311_v12 = vld [vmem:[%s7401_s1 + $0x948] ss:$16 sps:$4 sm:$0xff]   ;;  %v5316_v52 = vld [vmem:[%s7401_s1 + $0x964] ss:$16 sps:$4 sm:$0xff]  }
  0xf4   :  { %3249 = vmatprep.subr.bf16.mxu0 %v5232_v15  ;;  %3577 = vmatprep.subr.bf16.mxu1 %v5235_v16  ;;  %v5319_v15 = vld [vmem:[%s7401_s1 + $0x96c] ss:$16 sps:$4 sm:$0xff]   ;;  %v5314_v16 = vld [vmem:[%s7401_s1 + $0x960] ss:$16 sps:$4 sm:$0xff]  }
  0xf7   :  { %3250 = vmatpush1.bf16.msra.mxu0 %v5230_v17  ;;  %3578 = vmatpush1.bf16.msra.mxu1 %v5233_v18  ;;  %v5317_v17 = vld [vmem:[%s7401_s1 + $0x968] ss:$16 sps:$4 sm:$0xff]   ;;  %v5322_v18 = vld [vmem:[%s7401_s1 + $0x984] ss:$16 sps:$4 sm:$0xff]  }
  0xf8   :  { %3251 = vmatprep.subr.bf16.mxu0 %v5238_v19  ;;  %3579 = vmatprep.subr.bf16.mxu1 %v5241_v20  ;;  %v5325_v19 = vld [vmem:[%s7401_s1 + $0x98c] ss:$16 sps:$4 sm:$0xff]   ;;  %v5320_v20 = vld [vmem:[%s7401_s1 + $0x980] ss:$16 sps:$4 sm:$0xff]  }
  0xfb   :  { %3252 = vmatpush1.bf16.msra.mxu0 %v5236_v22  ;;  %3580 = vmatpush1.bf16.msra.mxu1 %v5239_v23  ;;  %v5323_v22 = vld [vmem:[%s7401_s1 + $0x988] ss:$16 sps:$4 sm:$0xff]   ;;  %v5328_v23 = vld [vmem:[%s7401_s1 + $0x9a4] ss:$16 sps:$4 sm:$0xff]  }
  0xfc   :  { %3253 = vmatprep.subr.bf16.mxu0 %v5244_v24  ;;  %3581 = vmatprep.subr.bf16.mxu1 %v5247_v13  ;;  %v5331_v24 = vld [vmem:[%s7401_s1 + $0x9ac] ss:$16 sps:$4 sm:$0xff]   ;;  %v5326_v13 = vld [vmem:[%s7401_s1 + $0x9a0] ss:$16 sps:$4 sm:$0xff]  }
  0xff   :  { %3254 = vmatpush1.bf16.msra.mxu0 %v5242_v28  ;;  %3582 = vmatpush1.bf16.msra.mxu1 %v5245_v29  ;;  %v5329_v28 = vld [vmem:[%s7401_s1 + $0x9a8] ss:$16 sps:$4 sm:$0xff]   ;;  %v5334_v29 = vld [vmem:[%s7401_s1 + $0x9c4] ss:$16 sps:$4 sm:$0xff]  }
 0x100   :  { %3264 = vmatprep.subr.bf16.mxu0 %v5250_v14  ;;  %3592 = vmatprep.subr.bf16.mxu1 %v5253_v30  ;;  %v5337_v14 = vld [vmem:[%s7401_s1 + $0x9cc] ss:$16 sps:$4 sm:$0xff]   ;;  %v5332_v30 = vld [vmem:[%s7401_s1 + $0x9c0] ss:$16 sps:$4 sm:$0xff]  }
 0x102   :  { %3256 = vmatmul.mubr.bf16.vlgmr.msra.gmra.mrb[0].mxu0 %v586_v25  ;;  %3584 = vmatmul.mubr.bf16.vlgmr.msra.gmra.mrb[0].mxu1 %v586_v25  ;;  %v5340_v25 = vld [vmem:[%s7401_s1 + $0x9e4] ss:$16 sps:$4 sm:$0xff]  }
 0x103   :  { %3265 = vmatpush1.bf16.msra.mxu0 %v5248_v32  ;;  %3593 = vmatpush1.bf16.msra.mxu1 %v5251_v33  ;;  %v5343_v32 = vld [vmem:[%s7401_s1 + $0x9ec] ss:$16 sps:$4 sm:$0xff]   ;;  %v5338_v33 = vld [vmem:[%s7401_s1 + $0x9e0] ss:$16 sps:$4 sm:$0xff]  }
 0x104   :  { %3266 = vmatprep.subr.bf16.mxu0 %v5256_v34  ;;  %3594 = vmatprep.subr.bf16.mxu1 %v5259_v26  ;;  %v5341_v34 = vld [vmem:[%s7401_s1 + $0x9e8] ss:$16 sps:$4 sm:$0xff]   ;;  %v5346_v26 = vld [vmem:[%s7401_s1 + $0xa04] ss:$16 sps:$4 sm:$0xff]  }
 0x105   :  { %3296 = vmatprep.mubr.bf16.mxu0 %v6541_v35  ;;  %3624 = vmatprep.mubr.bf16.mxu1 %v6541_v35 }
 0x107   :  { %3267 = vmatpush1.bf16.msra.mxu0 %v5254_v36  ;;  %3595 = vmatpush1.bf16.msra.mxu1 %v5257_v37  ;;  %v5349_v36 = vld [vmem:[%s7401_s1 + $0xa0c] ss:$16 sps:$4 sm:$0xff]   ;;  %v6727_v37 = vrot.slane %v6510_v27, %v5836_v49 }
 0x108   :  { %3268 = vmatprep.subr.bf16.mxu0 %v5262_v38  ;;  %3596 = vmatprep.subr.bf16.mxu1 %v5265_v39  ;;  %v5344_v38 = vld [vmem:[%s7401_s1 + $0xa00] ss:$16 sps:$4 sm:$0xff]   ;;  %v5347_v39 = vld [vmem:[%s7401_s1 + $0xa08] ss:$16 sps:$4 sm:$0xff]   ;;  %v5355_v27 = vld [vmem:[%s7401_s1 + $0xa2c] ss:$16 sps:$4 sm:$0xff]  }
 0x10b   :  { %3269 = vmatpush1.bf16.msra.mxu0 %v5260_v40  ;;  %3597 = vmatpush1.bf16.msra.mxu1 %v5263_v41  ;;  %v5352_v40 = vld [vmem:[%s7401_s1 + $0xa24] ss:$16 sps:$4 sm:$0xff]   ;;  %v636_v41 = vcombine.high %v6541_v35, %v6541_v35 }
 0x10c   :  { %3270 = vmatprep.subr.bf16.mxu0 %v5268_v43  ;;  %3598 = vmatprep.subr.bf16.mxu1 %v5271_v44  ;;  %v5350_v43 = vld [vmem:[%s7401_s1 + $0xa20] ss:$16 sps:$4 sm:$0xff]   ;;  %v5353_v44 = vld [vmem:[%s7401_s1 + $0xa28] ss:$16 sps:$4 sm:$0xff]   ;;  %v5358_v35 = vld [vmem:[%s7401_s1 + $0xa44] ss:$16 sps:$4 sm:$0xff]  }
 0x10f   :  { %3271 = vmatpush1.bf16.msra.mxu0 %v5266_v45  ;;  %3599 = vmatpush1.bf16.msra.mxu1 %v5269_v46  ;;  %v5361_v45 = vld [vmem:[%s7401_s1 + $0xa4c] ss:$16 sps:$4 sm:$0xff]   ;;  %v5356_v46 = vld [vmem:[%s7401_s1 + $0xa40] ss:$16 sps:$4 sm:$0xff]  }
 0x110   :  { %3272 = vmatprep.subr.bf16.mxu0 %v5274_v47  ;;  %3600 = vmatprep.subr.bf16.mxu1 %v5277_v48  ;;  %v5359_v47 = vld [vmem:[%s7401_s1 + $0xa48] ss:$16 sps:$4 sm:$0xff]   ;;  %v5364_v48 = vld [vmem:[%s7401_s1 + $0xa64] ss:$16 sps:$4 sm:$0xff]  }
 0x113   :  { %3273 = vmatpush1.bf16.msra.mxu0 %v5272_v50  ;;  %3601 = vmatpush1.bf16.msra.mxu1 %v5275_v51  ;;  %v5367_v50 = vld [vmem:[%s7401_s1 + $0xa6c] ss:$16 sps:$4 sm:$0xff]   ;;  %v5362_v51 = vld [vmem:[%s7401_s1 + $0xa60] ss:$16 sps:$4 sm:$0xff]  }
 0x114   :  { %3274 = vmatprep.subr.bf16.mxu0 %v5280_v53  ;;  %3602 = vmatprep.subr.bf16.mxu1 %v5283_v54  ;;  %v5365_v53 = vld [vmem:[%s7401_s1 + $0xa68] ss:$16 sps:$4 sm:$0xff]   ;;  %v5370_v54 = vld [vmem:[%s7401_s1 + $0xa84] ss:$16 sps:$4 sm:$0xff]  }
 0x117   :  { %3275 = vmatpush1.bf16.msra.mxu0 %v5278_v55  ;;  %3603 = vmatpush1.bf16.msra.mxu1 %v5281_v56  ;;  %v5373_v55 = vld [vmem:[%s7401_s1 + $0xa8c] ss:$16 sps:$4 sm:$0xff]   ;;  %v5368_v56 = vld [vmem:[%s7401_s1 + $0xa80] ss:$16 sps:$4 sm:$0xff]  }
 0x118   :  { %3276 = vmatprep.subr.bf16.mxu0 %v5286_v57  ;;  %3604 = vmatprep.subr.bf16.mxu1 %v5289_v58  ;;  %v5371_v57 = vld [vmem:[%s7401_s1 + $0xa88] ss:$16 sps:$4 sm:$0xff]   ;;  %v5376_v58 = vld [vmem:[%s7401_s1 + $0xaa4] ss:$16 sps:$4 sm:$0xff]  }
 0x11b   :  { %3277 = vmatpush1.bf16.msra.mxu0 %v5284_v59  ;;  %3605 = vmatpush1.bf16.msra.mxu1 %v5287_v60  ;;  %v5379_v59 = vld [vmem:[%s7401_s1 + $0xaac] ss:$16 sps:$4 sm:$0xff]   ;;  %v5374_v60 = vld [vmem:[%s7401_s1 + $0xaa0] ss:$16 sps:$4 sm:$0xff]  }
 0x11c   :  { %3278 = vmatprep.subr.bf16.mxu0 %v5292_v61  ;;  %3606 = vmatprep.subr.bf16.mxu1 %v5295_v62  ;;  %v5377_v61 = vld [vmem:[%s7401_s1 + $0xaa8] ss:$16 sps:$4 sm:$0xff]   ;;  %v5382_v62 = vld [vmem:[%s7401_s1 + $0xac4] ss:$16 sps:$4 sm:$0xff]  }
 0x11f   :  { %3279 = vmatpush1.bf16.msra.mxu0 %v5290_v63  ;;  %3607 = vmatpush1.bf16.msra.mxu1 %v5293_v0  ;;  %v5385_v63 = vld [vmem:[%s7401_s1 + $0xacc] ss:$16 sps:$4 sm:$0xff]  }
 0x120   :  { %3280 = vmatprep.subr.bf16.mxu0 %v5298_v1  ;;  %3608 = vmatprep.subr.bf16.mxu1 %v5301_v2 }
 0x123   :  { %3281 = vmatpush1.bf16.msra.mxu0 %v5296_v3  ;;  %3609 = vmatpush1.bf16.msra.mxu1 %v5299_v4 }
 0x124   :  { %3282 = vmatprep.subr.bf16.mxu0 %v5304_v5  ;;  %3610 = vmatprep.subr.bf16.mxu1 %v5307_v6 }
 0x127   :  { %3283 = vmatpush1.bf16.msra.mxu0 %v5302_v7  ;;  %3611 = vmatpush1.bf16.msra.mxu1 %v5305_v8 }
 0x128   :  { %3284 = vmatprep.subr.bf16.mxu0 %v5310_v9  ;;  %3612 = vmatprep.subr.bf16.mxu1 %v5313_v10 }
 0x12b   :  { %3285 = vmatpush1.bf16.msra.mxu0 %v5308_v11  ;;  %3613 = vmatpush1.bf16.msra.mxu1 %v5311_v12 }
 0x12c   :  { %3286 = vmatprep.subr.bf16.mxu0 %v5316_v52  ;;  %3614 = vmatprep.subr.bf16.mxu1 %v5319_v15 }
 0x12f   :  { %3287 = vmatpush1.bf16.msra.mxu0 %v5314_v16  ;;  %3615 = vmatpush1.bf16.msra.mxu1 %v5317_v17 }
 0x130   :  { %3288 = vmatprep.subr.bf16.mxu0 %v5322_v18  ;;  %3616 = vmatprep.subr.bf16.mxu1 %v5325_v19 }
 0x133   :  { %3289 = vmatpush1.bf16.msra.mxu0 %v5320_v20  ;;  %3617 = vmatpush1.bf16.msra.mxu1 %v5323_v22 }
 0x134   :  { %3290 = vmatprep.subr.bf16.mxu0 %v5328_v23  ;;  %3618 = vmatprep.subr.bf16.mxu1 %v5331_v24 }
 0x137   :  { %3291 = vmatpush1.bf16.msra.mxu0 %v5326_v13  ;;  %3619 = vmatpush1.bf16.msra.mxu1 %v5329_v28 }
 0x138   :  { %3292 = vmatprep.subr.bf16.mxu0 %v5334_v29  ;;  %3620 = vmatprep.subr.bf16.mxu1 %v5337_v14 }
 0x13b   :  { %3293 = vmatpush1.bf16.msra.mxu0 %v5332_v30  ;;  %3621 = vmatpush1.bf16.msra.mxu1 %v5335_v31 }
 0x13c   :  { %3294 = vmatprep.subr.bf16.mxu0 %v5340_v25  ;;  %3622 = vmatprep.subr.bf16.mxu1 %v5343_v32 }
 0x13f   :  { %3295 = vmatpush1.bf16.msra.mxu0 %v5338_v33  ;;  %3623 = vmatpush1.bf16.msra.mxu1 %v5341_v34 }
 0x140   :  { %3305 = vmatprep.subr.bf16.mxu0 %v5346_v26  ;;  %3633 = vmatprep.subr.bf16.mxu1 %v5349_v36 }
 0x142   :  { %3297 = vmatmul.mubr.bf16.vlgmr.msra.gmra.mrb[0].mxu0 %v6727_v37  ;;  %3625 = vmatmul.mubr.bf16.vlgmr.msra.gmra.mrb[0].mxu1 %v6727_v37 }
 0x143   :  { %3306 = vmatpush1.bf16.msra.mxu0 %v5344_v38  ;;  %3634 = vmatpush1.bf16.msra.mxu1 %v5347_v39 }
 0x144   :  { %3307 = vmatprep.subr.bf16.mxu0 %v5352_v40  ;;  %3635 = vmatprep.subr.bf16.mxu1 %v5355_v27 }
 0x145   :  { %3337 = vmatprep.mubr.bf16.mxu0 %v636_v41  ;;  %3665 = vmatprep.mubr.bf16.mxu1 %v636_v41 }
 0x147   :  { %3308 = vmatpush1.bf16.msra.mxu0 %v5350_v43  ;;  %3636 = vmatpush1.bf16.msra.mxu1 %v5353_v44 }
 0x148   :  { %3309 = vmatprep.subr.bf16.mxu0 %v5358_v35  ;;  %3637 = vmatprep.subr.bf16.mxu1 %v5361_v45 }
 0x14b   :  { %3310 = vmatpush1.bf16.msra.mxu0 %v5356_v46  ;;  %3638 = vmatpush1.bf16.msra.mxu1 %v5359_v47 }
 0x14c   :  { %3311 = vmatprep.subr.bf16.mxu0 %v5364_v48  ;;  %3639 = vmatprep.subr.bf16.mxu1 %v5367_v50 }
 0x14f   :  { %3312 = vmatpush1.bf16.msra.mxu0 %v5362_v51  ;;  %3640 = vmatpush1.bf16.msra.mxu1 %v5365_v53 }
 0x150   :  { %3313 = vmatprep.subr.bf16.mxu0 %v5370_v54  ;;  %3641 = vmatprep.subr.bf16.mxu1 %v5373_v55 }
 0x153   :  { %3314 = vmatpush1.bf16.msra.mxu0 %v5368_v56  ;;  %3642 = vmatpush1.bf16.msra.mxu1 %v5371_v57 }
 0x154   :  { %3315 = vmatprep.subr.bf16.mxu0 %v5376_v58  ;;  %3643 = vmatprep.subr.bf16.mxu1 %v5379_v59 }
 0x155   :  { %12 = vsyncpa [#allocation3], 0  ;;  %v5380_v0 = vld [vmem:[%s7401_s1 + $0xac0] ss:$16 sps:$4 sm:$0xff]   ;;  %v5383_v1 = vld [vmem:[%s7401_s1 + $0xac8] ss:$16 sps:$4 sm:$0xff]   ;;  %v589_v34 = vcombine.high %v6494_v21, %v6494_v21  ;;  %v634_v35 = vcombine.high %v6727_v37, %v6727_v37 }
 0x156   :  { %v5388_v2 = vld [vmem:[%s7401_s1 + $0xae4] ss:$16 sps:$4 sm:$0xff]   ;;  %v5391_v3 = vld [vmem:[%s7401_s1 + $0xaec] ss:$16 sps:$4 sm:$0xff]   ;;  %v5386_v4 = vld [vmem:[%s7401_s1 + $0xae0] ss:$16 sps:$4 sm:$0xff]  }
 0x157   :  { %3316 = vmatpush1.bf16.msra.mxu0 %v5374_v60  ;;  %3644 = vmatpush1.bf16.msra.mxu1 %v5377_v61  ;;  %v5389_v5 = vld [vmem:[%s7401_s1 + $0xae8] ss:$16 sps:$4 sm:$0xff]   ;;  %v5394_v6 = vld [vmem:[%s7401_s1 + $0xb04] ss:$16 sps:$4 sm:$0xff]   ;;  %v5397_v7 = vld [vmem:[%s7401_s1 + $0xb0c] ss:$16 sps:$4 sm:$0xff]   ;;  %v6916_v39 = vrot.slane %v589_v34, %v5836_v49 }
 0x158   :  { %3317 = vmatprep.subr.bf16.mxu0 %v5382_v62  ;;  %3645 = vmatprep.subr.bf16.mxu1 %v5385_v63  ;;  %v5392_v8 = vld [vmem:[%s7401_s1 + $0xb00] ss:$16 sps:$4 sm:$0xff]   ;;  %v5395_v9 = vld [vmem:[%s7401_s1 + $0xb08] ss:$16 sps:$4 sm:$0xff]   ;;  %v5400_v10 = vld [vmem:[%s7401_s1 + $0xb24] ss:$16 sps:$4 sm:$0xff]  }
 0x159   :  { %v5403_v11 = vld [vmem:[%s7401_s1 + $0xb2c] ss:$16 sps:$4 sm:$0xff]   ;;  %v5398_v12 = vld [vmem:[%s7401_s1 + $0xb20] ss:$16 sps:$4 sm:$0xff]   ;;  %v5401_v52 = vld [vmem:[%s7401_s1 + $0xb28] ss:$16 sps:$4 sm:$0xff]   ;;  %v605_v44 = vcombine.high %v6916_v39, %v6916_v39 }
 0x15a   :  { %v5406_v15 = vld [vmem:[%s7401_s1 + $0xb44] ss:$16 sps:$4 sm:$0xff]   ;;  %v5409_v16 = vld [vmem:[%s7401_s1 + $0xb4c] ss:$16 sps:$4 sm:$0xff]   ;;  %v5404_v17 = vld [vmem:[%s7401_s1 + $0xb40] ss:$16 sps:$4 sm:$0xff]  }
 0x15b   :  { %3318 = vmatpush1.bf16.msra.mxu0 %v5380_v0  ;;  %3646 = vmatpush1.bf16.msra.mxu1 %v5383_v1  ;;  %v5407_v18 = vld [vmem:[%s7401_s1 + $0xb48] ss:$16 sps:$4 sm:$0xff]   ;;  %v5412_v19 = vld [vmem:[%s7401_s1 + $0xb64] ss:$16 sps:$4 sm:$0xff]   ;;  %v5415_v20 = vld [vmem:[%s7401_s1 + $0xb6c] ss:$16 sps:$4 sm:$0xff]   ;;  %v6947_v48 = vrot.slane %v605_v44, %v5836_v49 }
 0x15c   :  { %3319 = vmatprep.subr.bf16.mxu0 %v5388_v2  ;;  %3647 = vmatprep.subr.bf16.mxu1 %v5391_v3  ;;  %v5410_v22 = vld [vmem:[%s7401_s1 + $0xb60] ss:$16 sps:$4 sm:$0xff]   ;;  %v5413_v23 = vld [vmem:[%s7401_s1 + $0xb68] ss:$16 sps:$4 sm:$0xff]   ;;  %v5418_v24 = vld [vmem:[%s7401_s1 + $0xb84] ss:$16 sps:$4 sm:$0xff]  }
 0x15d   :  { %v5421_v13 = vld [vmem:[%s7401_s1 + $0xb8c] ss:$16 sps:$4 sm:$0xff]   ;;  %v5416_v28 = vld [vmem:[%s7401_s1 + $0xb80] ss:$16 sps:$4 sm:$0xff]   ;;  %v5419_v29 = vld [vmem:[%s7401_s1 + $0xb88] ss:$16 sps:$4 sm:$0xff]  }
 0x15e   :  { %v5424_v14 = vld [vmem:[%s7401_s1 + $0xba4] ss:$16 sps:$4 sm:$0xff]   ;;  %v5427_v30 = vld [vmem:[%s7401_s1 + $0xbac] ss:$16 sps:$4 sm:$0xff]   ;;  %v5422_v31 = vld [vmem:[%s7401_s1 + $0xba0] ss:$16 sps:$4 sm:$0xff]  }
 0x15f   :  { %3320 = vmatpush1.bf16.msra.mxu0 %v5386_v4  ;;  %3648 = vmatpush1.bf16.msra.mxu1 %v5389_v5  ;;  %v5425_v25 = vld [vmem:[%s7401_s1 + $0xba8] ss:$16 sps:$4 sm:$0xff]   ;;  %v5430_v32 = vld [vmem:[%s7401_s1 + $0xbc4] ss:$16 sps:$4 sm:$0xff]   ;;  %v5433_v33 = vld [vmem:[%s7401_s1 + $0xbcc] ss:$16 sps:$4 sm:$0xff]  }
 0x160   :  { %3321 = vmatprep.subr.bf16.mxu0 %v5394_v6  ;;  %3649 = vmatprep.subr.bf16.mxu1 %v5397_v7  ;;  %v5428_v26 = vld [vmem:[%s7401_s1 + $0xbc0] ss:$16 sps:$4 sm:$0xff]   ;;  %v5431_v36 = vld [vmem:[%s7401_s1 + $0xbc8] ss:$16 sps:$4 sm:$0xff]   ;;  %v5436_v38 = vld [vmem:[%s7401_s1 + $0xbe4] ss:$16 sps:$4 sm:$0xff]  }
 0x161   :  { %v5439_v21 = vld [vmem:[%s7401_s1 + $0xbec] ss:$16 sps:$4 sm:$0xff]   ;;  %v5434_v40 = vld [vmem:[%s7401_s1 + $0xbe0] ss:$16 sps:$4 sm:$0xff]   ;;  %v5437_v27 = vld [vmem:[%s7401_s1 + $0xbe8] ss:$16 sps:$4 sm:$0xff]  }
 0x162   :  { %v5442_v41 = vld [vmem:[%s7401_s1 + $0xc04] ss:$16 sps:$4 sm:$0xff]   ;;  %v5445_v43 = vld [vmem:[%s7401_s1 + $0xc0c] ss:$16 sps:$4 sm:$0xff]   ;;  %v5440_v45 = vld [vmem:[%s7401_s1 + $0xc00] ss:$16 sps:$4 sm:$0xff]  }
 0x163   :  { %3322 = vmatpush1.bf16.msra.mxu0 %v5392_v8  ;;  %3650 = vmatpush1.bf16.msra.mxu1 %v5395_v9  ;;  %v5443_v46 = vld [vmem:[%s7401_s1 + $0xc08] ss:$16 sps:$4 sm:$0xff]   ;;  %v5448_v47 = vld [vmem:[%s7401_s1 + $0xc24] ss:$16 sps:$4 sm:$0xff]   ;;  %v5451_v37 = vld [vmem:[%s7401_s1 + $0xc2c] ss:$16 sps:$4 sm:$0xff]  }
 0x164   :  { %3323 = vmatprep.subr.bf16.mxu0 %v5400_v10  ;;  %3651 = vmatprep.subr.bf16.mxu1 %v5403_v11  ;;  %v5446_v50 = vld [vmem:[%s7401_s1 + $0xc20] ss:$16 sps:$4 sm:$0xff]   ;;  %v5449_v51 = vld [vmem:[%s7401_s1 + $0xc28] ss:$16 sps:$4 sm:$0xff]   ;;  %v5454_v53 = vld [vmem:[%s7401_s1 + $0xc44] ss:$16 sps:$4 sm:$0xff]  }
 0x165   :  { %v5457_v54 = vld [vmem:[%s7401_s1 + $0xc4c] ss:$16 sps:$4 sm:$0xff]   ;;  %v5452_v55 = vld [vmem:[%s7401_s1 + $0xc40] ss:$16 sps:$4 sm:$0xff]   ;;  %v5455_v56 = vld [vmem:[%s7401_s1 + $0xc48] ss:$16 sps:$4 sm:$0xff]  }
 0x166   :  { %v5460_v57 = vld [vmem:[%s7401_s1 + $0xc64] ss:$16 sps:$4 sm:$0xff]   ;;  %v5463_v58 = vld [vmem:[%s7401_s1 + $0xc6c] ss:$16 sps:$4 sm:$0xff]   ;;  %v5458_v59 = vld [vmem:[%s7401_s1 + $0xc60] ss:$16 sps:$4 sm:$0xff]  }
 0x167   :  { %3324 = vmatpush1.bf16.msra.mxu0 %v5398_v12  ;;  %3652 = vmatpush1.bf16.msra.mxu1 %v5401_v52  ;;  %v5461_v60 = vld [vmem:[%s7401_s1 + $0xc68] ss:$16 sps:$4 sm:$0xff]   ;;  %v5466_v61 = vld [vmem:[%s7401_s1 + $0xc84] ss:$16 sps:$4 sm:$0xff]   ;;  %v5469_v62 = vld [vmem:[%s7401_s1 + $0xc8c] ss:$16 sps:$4 sm:$0xff]  }
 0x168   :  { %3325 = vmatprep.subr.bf16.mxu0 %v5406_v15  ;;  %3653 = vmatprep.subr.bf16.mxu1 %v5409_v16  ;;  %v5464_v63 = vld [vmem:[%s7401_s1 + $0xc80] ss:$16 sps:$4 sm:$0xff]   ;;  %v5467_v0 = vld [vmem:[%s7401_s1 + $0xc88] ss:$16 sps:$4 sm:$0xff]   ;;  %v5472_v1 = vld [vmem:[%s7401_s1 + $0xca4] ss:$16 sps:$4 sm:$0xff]  }
 0x169   :  { %v5475_v2 = vld [vmem:[%s7401_s1 + $0xcac] ss:$16 sps:$4 sm:$0xff]   ;;  %v5470_v3 = vld [vmem:[%s7401_s1 + $0xca0] ss:$16 sps:$4 sm:$0xff]   ;;  %v5473_v4 = vld [vmem:[%s7401_s1 + $0xca8] ss:$16 sps:$4 sm:$0xff]  }
 0x16a   :  { %v5478_v5 = vld [vmem:[%s7401_s1 + $0xcc4] ss:$16 sps:$4 sm:$0xff]   ;;  %v5481_v6 = vld [vmem:[%s7401_s1 + $0xccc] ss:$16 sps:$4 sm:$0xff]   ;;  %v5476_v7 = vld [vmem:[%s7401_s1 + $0xcc0] ss:$16 sps:$4 sm:$0xff]  }
 0x16b   :  { %3326 = vmatpush1.bf16.msra.mxu0 %v5404_v17  ;;  %3654 = vmatpush1.bf16.msra.mxu1 %v5407_v18  ;;  %v5479_v8 = vld [vmem:[%s7401_s1 + $0xcc8] ss:$16 sps:$4 sm:$0xff]   ;;  %v5484_v9 = vld [vmem:[%s7401_s1 + $0xce4] ss:$16 sps:$4 sm:$0xff]   ;;  %v5487_v10 = vld [vmem:[%s7401_s1 + $0xcec] ss:$16 sps:$4 sm:$0xff]  }
 0x16c   :  { %3327 = vmatprep.subr.bf16.mxu0 %v5412_v19  ;;  %3655 = vmatprep.subr.bf16.mxu1 %v5415_v20  ;;  %v5482_v11 = vld [vmem:[%s7401_s1 + $0xce0] ss:$16 sps:$4 sm:$0xff]   ;;  %v5485_v12 = vld [vmem:[%s7401_s1 + $0xce8] ss:$16 sps:$4 sm:$0xff]   ;;  %v5490_v52 = vld [vmem:[%s7401_s1 + $0xd04] ss:$16 sps:$4 sm:$0xff]  }
 0x16d   :  { %v5493_v15 = vld [vmem:[%s7401_s1 + $0xd0c] ss:$16 sps:$4 sm:$0xff]   ;;  %v5488_v16 = vld [vmem:[%s7401_s1 + $0xd00] ss:$16 sps:$4 sm:$0xff]   ;;  %v5491_v17 = vld [vmem:[%s7401_s1 + $0xd08] ss:$16 sps:$4 sm:$0xff]  }
 0x16e   :  { %v5496_v18 = vld [vmem:[%s7401_s1 + $0xd24] ss:$16 sps:$4 sm:$0xff]   ;;  %v5499_v19 = vld [vmem:[%s7401_s1 + $0xd2c] ss:$16 sps:$4 sm:$0xff]   ;;  %v5494_v20 = vld [vmem:[%s7401_s1 + $0xd20] ss:$16 sps:$4 sm:$0xff]  }
 0x16f   :  { %3328 = vmatpush1.bf16.msra.mxu0 %v5410_v22  ;;  %3656 = vmatpush1.bf16.msra.mxu1 %v5413_v23  ;;  %v5497_v22 = vld [vmem:[%s7401_s1 + $0xd28] ss:$16 sps:$4 sm:$0xff]   ;;  %v5502_v23 = vld [vmem:[%s7401_s1 + $0xd44] ss:$16 sps:$4 sm:$0xff]   ;;  %vm3083_vm0 = vcmask 195584   ;;  %vm3087_vm1 = vcmask 1043456  }
 0x170   :  { %3329 = vmatprep.subr.bf16.mxu0 %v5418_v24  ;;  %3657 = vmatprep.subr.bf16.mxu1 %v5421_v13  ;;  %v5505_v24 = vld [vmem:[%s7401_s1 + $0xd4c] ss:$16 sps:$4 sm:$0xff]   ;;  %v5500_v13 = vld [vmem:[%s7401_s1 + $0xd40] ss:$16 sps:$4 sm:$0xff]   ;;  %v5515_v34 = vld [vmem:[%s7401_s1 + $0xd88] ss:$16 sps:$4 sm:$0xff]  }
 0x171   :  { %v5532_v44 = vld [vmem:[%s7401_s1 + $0xde4] ss:$16 sps:$4 sm:$0xff]   ;;  %vm4019_vm2 = vcmask 1042432   ;;  %vm4015_vm3 = vcmask 834560   ;;  %vm4160_vm4 = vcmask 1041408   ;;  %vm5659_vm5 = vmmov 0  }
 0x172   :  { %vm4156_vm6 = vcmask 687104   ;;  %vm4204_vm7 = vcmask 50176  }
 0x173   :  { %3330 = vmatpush1.bf16.msra.mxu0 %v5416_v28  ;;  %3658 = vmatpush1.bf16.msra.mxu1 %v5419_v29  ;;  %v5503_v28 = vld [vmem:[%s7401_s1 + $0xd48] ss:$16 sps:$4 sm:$0xff]   ;;  %v5508_v29 = vld [vmem:[%s7401_s1 + $0xd64] ss:$16 sps:$4 sm:$0xff]  }
 0x174   :  { %3331 = vmatprep.subr.bf16.mxu0 %v5424_v14  ;;  %3659 = vmatprep.subr.bf16.mxu1 %v5427_v30  ;;  %v5511_v14 = vld [vmem:[%s7401_s1 + $0xd6c] ss:$16 sps:$4 sm:$0xff]   ;;  %v5506_v30 = vld [vmem:[%s7401_s1 + $0xd60] ss:$16 sps:$4 sm:$0xff]  }
 0x177   :  { %3332 = vmatpush1.bf16.msra.mxu0 %v5422_v31  ;;  %3660 = vmatpush1.bf16.msra.mxu1 %v5425_v25  ;;  %v5509_v31 = vld [vmem:[%s7401_s1 + $0xd68] ss:$16 sps:$4 sm:$0xff]   ;;  %v5514_v25 = vld [vmem:[%s7401_s1 + $0xd84] ss:$16 sps:$4 sm:$0xff]  }
 0x178   :  { %3333 = vmatprep.subr.bf16.mxu0 %v5430_v32  ;;  %3661 = vmatprep.subr.bf16.mxu1 %v5433_v33  ;;  %v5517_v32 = vld [vmem:[%s7401_s1 + $0xd8c] ss:$16 sps:$4 sm:$0xff]   ;;  %v5512_v33 = vld [vmem:[%s7401_s1 + $0xd80] ss:$16 sps:$4 sm:$0xff]  }
 0x17b   :  { %3334 = vmatpush1.bf16.msra.mxu0 %v5428_v26  ;;  %3662 = vmatpush1.bf16.msra.mxu1 %v5431_v36  ;;  %v5520_v26 = vld [vmem:[%s7401_s1 + $0xda4] ss:$16 sps:$4 sm:$0xff]   ;;  %v5523_v36 = vld [vmem:[%s7401_s1 + $0xdac] ss:$16 sps:$4 sm:$0xff]  }
 0x17c   :  { %3335 = vmatprep.subr.bf16.mxu0 %v5436_v38  ;;  %3663 = vmatprep.subr.bf16.mxu1 %v5439_v21  ;;  %v5518_v38 = vld [vmem:[%s7401_s1 + $0xda0] ss:$16 sps:$4 sm:$0xff]   ;;  %v5521_v21 = vld [vmem:[%s7401_s1 + $0xda8] ss:$16 sps:$4 sm:$0xff]  }
 0x17f   :  { %3336 = vmatpush1.bf16.msra.mxu0 %v5434_v40  ;;  %3664 = vmatpush1.bf16.msra.mxu1 %v5437_v27  ;;  %v5526_v40 = vld [vmem:[%s7401_s1 + $0xdc4] ss:$16 sps:$4 sm:$0xff]   ;;  %v5529_v27 = vld [vmem:[%s7401_s1 + $0xdcc] ss:$16 sps:$4 sm:$0xff]  }
 0x180   :  { %3346 = vmatprep.subr.bf16.mxu0 %v5442_v41  ;;  %3674 = vmatprep.subr.bf16.mxu1 %v5445_v43  ;;  %v5524_v41 = vld [vmem:[%s7401_s1 + $0xdc0] ss:$16 sps:$4 sm:$0xff]   ;;  %v5527_v43 = vld [vmem:[%s7401_s1 + $0xdc8] ss:$16 sps:$4 sm:$0xff]  }
 0x182   :  { %3338 = vmatmul.mubr.bf16.vlgmr.msra.gmra.mrb[0].mxu0 %v634_v35  ;;  %3666 = vmatmul.mubr.bf16.vlgmr.msra.gmra.mrb[0].mxu1 %v634_v35  ;;  %v5535_v35 = vld [vmem:[%s7401_s1 + $0xdec] ss:$16 sps:$4 sm:$0xff]  }
 0x183   :  { %3347 = vmatpush1.bf16.msra.mxu0 %v5440_v45  ;;  %3675 = vmatpush1.bf16.msra.mxu1 %v5443_v46  ;;  %v5530_v45 = vld [vmem:[%s7401_s1 + $0xde0] ss:$16 sps:$4 sm:$0xff]   ;;  %v5533_v46 = vld [vmem:[%s7401_s1 + $0xde8] ss:$16 sps:$4 sm:$0xff]  }
 0x184   :  { %3348 = vmatprep.subr.bf16.mxu0 %v5448_v47  ;;  %3676 = vmatprep.subr.bf16.mxu1 %v5451_v37  ;;  %v5539_v47 = vld [vmem:[%s7401_s1 + $0xe04] ss:$16 sps:$4 sm:$0xff]   ;;  %v5542_v37 = vld [vmem:[%s7401_s1 + $0xe0c] ss:$16 sps:$4 sm:$0xff]  }
 0x185   :  { %3378 = vmatprep.mubr.bf16.mxu0 %v6947_v48  ;;  %3706 = vmatprep.mubr.bf16.mxu1 %v6947_v48 }
 0x187   :  { %3349 = vmatpush1.bf16.msra.mxu0 %v5446_v50  ;;  %3677 = vmatpush1.bf16.msra.mxu1 %v5449_v51  ;;  %v7133_v50 = vrot.slane %v6916_v39, %v5836_v49  ;;  %v5537_v51 = vld [vmem:[%s7401_s1 + $0xe00] ss:$16 sps:$4 sm:$0xff]   ;;  %v5548_v49 = vld [vmem:[%s7401_s1 + $0xe2c] ss:$16 sps:$4 sm:$0xff]   ;;  %v637_v39 = vcombine.high %v6947_v48, %v6947_v48  ;;  %v5551_v48 = vld [vmem:[%s7401_s1 + $0xe44] ss:$16 sps:$4 sm:$0xff]  }
 0x188   :  { %3350 = vmatprep.subr.bf16.mxu0 %v5454_v53  ;;  %3678 = vmatprep.subr.bf16.mxu1 %v5457_v54  ;;  %v5540_v53 = vld [vmem:[%s7401_s1 + $0xe08] ss:$16 sps:$4 sm:$0xff]   ;;  %v5545_v54 = vld [vmem:[%s7401_s1 + $0xe24] ss:$16 sps:$4 sm:$0xff]  }
 0x18b   :  { %3351 = vmatpush1.bf16.msra.mxu0 %v5452_v55  ;;  %3679 = vmatpush1.bf16.msra.mxu1 %v5455_v56  ;;  %v5543_v55 = vld [vmem:[%s7401_s1 + $0xe20] ss:$16 sps:$4 sm:$0xff]   ;;  %v5546_v56 = vld [vmem:[%s7401_s1 + $0xe28] ss:$16 sps:$4 sm:$0xff]  }
 0x18c   :  { %3352 = vmatprep.subr.bf16.mxu0 %v5460_v57  ;;  %3680 = vmatprep.subr.bf16.mxu1 %v5463_v58  ;;  %v5554_v57 = vld [vmem:[%s7401_s1 + $0xe4c] ss:$16 sps:$4 sm:$0xff]   ;;  %v5549_v58 = vld [vmem:[%s7401_s1 + $0xe40] ss:$16 sps:$4 sm:$0xff]  }
 0x18f   :  { %3353 = vmatpush1.bf16.msra.mxu0 %v5458_v59  ;;  %3681 = vmatpush1.bf16.msra.mxu1 %v5461_v60  ;;  %v5552_v59 = vld [vmem:[%s7401_s1 + $0xe48] ss:$16 sps:$4 sm:$0xff]   ;;  %v5557_v60 = vld [vmem:[%s7401_s1 + $0xe64] ss:$16 sps:$4 sm:$0xff]  }
 0x190   :  { %3354 = vmatprep.subr.bf16.mxu0 %v5466_v61  ;;  %3682 = vmatprep.subr.bf16.mxu1 %v5469_v62  ;;  %v5560_v61 = vld [vmem:[%s7401_s1 + $0xe6c] ss:$16 sps:$4 sm:$0xff]   ;;  %v5555_v62 = vld [vmem:[%s7401_s1 + $0xe60] ss:$16 sps:$4 sm:$0xff]  }
 0x193   :  { %3355 = vmatpush1.bf16.msra.mxu0 %v5464_v63  ;;  %3683 = vmatpush1.bf16.msra.mxu1 %v5467_v0  ;;  %v5558_v63 = vld [vmem:[%s7401_s1 + $0xe68] ss:$16 sps:$4 sm:$0xff]   ;;  %v5563_v0 = vld [vmem:[%s7401_s1 + $0xe84] ss:$16 sps:$4 sm:$0xff]  }
 0x194   :  { %3356 = vmatprep.subr.bf16.mxu0 %v5472_v1  ;;  %3684 = vmatprep.subr.bf16.mxu1 %v5475_v2  ;;  %v5566_v1 = vld [vmem:[%s7401_s1 + $0xe8c] ss:$16 sps:$4 sm:$0xff]   ;;  %v5561_v2 = vld [vmem:[%s7401_s1 + $0xe80] ss:$16 sps:$4 sm:$0xff]  }
 0x197   :  { %3357 = vmatpush1.bf16.msra.mxu0 %v5470_v3  ;;  %3685 = vmatpush1.bf16.msra.mxu1 %v5473_v4  ;;  %v5564_v3 = vld [vmem:[%s7401_s1 + $0xe88] ss:$16 sps:$4 sm:$0xff]   ;;  %v5569_v4 = vld [vmem:[%s7401_s1 + $0xea4] ss:$16 sps:$4 sm:$0xff]  }
 0x198   :  { %3358 = vmatprep.subr.bf16.mxu0 %v5478_v5  ;;  %3686 = vmatprep.subr.bf16.mxu1 %v5481_v6  ;;  %v5572_v5 = vld [vmem:[%s7401_s1 + $0xeac] ss:$16 sps:$4 sm:$0xff]   ;;  %v5567_v6 = vld [vmem:[%s7401_s1 + $0xea0] ss:$16 sps:$4 sm:$0xff]  }
 0x19b   :  { %3359 = vmatpush1.bf16.msra.mxu0 %v5476_v7  ;;  %3687 = vmatpush1.bf16.msra.mxu1 %v5479_v8  ;;  %v5570_v7 = vld [vmem:[%s7401_s1 + $0xea8] ss:$16 sps:$4 sm:$0xff]   ;;  %v5575_v8 = vld [vmem:[%s7401_s1 + $0xec4] ss:$16 sps:$4 sm:$0xff]  }
 0x19c   :  { %3360 = vmatprep.subr.bf16.mxu0 %v5484_v9  ;;  %3688 = vmatprep.subr.bf16.mxu1 %v5487_v10  ;;  %v5578_v9 = vld [vmem:[%s7401_s1 + $0xecc] ss:$16 sps:$4 sm:$0xff]   ;;  %v5573_v10 = vld [vmem:[%s7401_s1 + $0xec0] ss:$16 sps:$4 sm:$0xff]  }
 0x19f   :  { %3361 = vmatpush1.bf16.msra.mxu0 %v5482_v11  ;;  %3689 = vmatpush1.bf16.msra.mxu1 %v5485_v12  ;;  %v5576_v11 = vld [vmem:[%s7401_s1 + $0xec8] ss:$16 sps:$4 sm:$0xff]   ;;  %v5581_v12 = vld [vmem:[%s7401_s1 + $0xee4] ss:$16 sps:$4 sm:$0xff]  }
 0x1a0   :  { %3362 = vmatprep.subr.bf16.mxu0 %v5490_v52  ;;  %3690 = vmatprep.subr.bf16.mxu1 %v5493_v15  ;;  %v5584_v52 = vld [vmem:[%s7401_s1 + $0xeec] ss:$16 sps:$4 sm:$0xff]   ;;  %v5579_v15 = vld [vmem:[%s7401_s1 + $0xee0] ss:$16 sps:$4 sm:$0xff]  }
 0x1a3   :  { %3363 = vmatpush1.bf16.msra.mxu0 %v5488_v16  ;;  %3691 = vmatpush1.bf16.msra.mxu1 %v5491_v17  ;;  %v5582_v16 = vld [vmem:[%s7401_s1 + $0xee8] ss:$16 sps:$4 sm:$0xff]   ;;  %v5587_v17 = vld [vmem:[%s7401_s1 + $0xf04] ss:$16 sps:$4 sm:$0xff]  }
 0x1a4   :  { %3364 = vmatprep.subr.bf16.mxu0 %v5496_v18  ;;  %3692 = vmatprep.subr.bf16.mxu1 %v5499_v19  ;;  %v5590_v18 = vld [vmem:[%s7401_s1 + $0xf0c] ss:$16 sps:$4 sm:$0xff]   ;;  %v514_v19 = vld [vmem:[%s7401_s1 + $0xf20] sm:$0xff] }
 0x1a7   :  { %3365 = vmatpush1.bf16.msra.mxu0 %v5494_v20  ;;  %3693 = vmatpush1.bf16.msra.mxu1 %v5497_v22  ;;  %v515_v20 = vld [vmem:[%s7401_s1 + $0xf28] sm:$0xff]  ;;  %v5585_v22 = vld [vmem:[%s7401_s1 + $0xf00] ss:$16 sps:$4 sm:$0xff]  }
 0x1a8   :  { %3366 = vmatprep.subr.bf16.mxu0 %v5502_v23  ;;  %3694 = vmatprep.subr.bf16.mxu1 %v5505_v24  ;;  %v5588_v23 = vld [vmem:[%s7401_s1 + $0xf08] ss:$16 sps:$4 sm:$0xff]   ;;  %v4705_v24 = vcombine.high %v514_v19, %v514_v19  ;;  %s5660_s1 = smov [#allocation2]  }
 0x1a9   :  { %s4212_s16 = sshll.u32 %s5660_s1, 4  ;;  %s4213_s16 = int_to_ptr.vmem [resolvable:$true] %s4212_s16 }
 0x1aa   :  { %p5637_p1 = scmp.lt.s32.totalorder %s4213_s16, %s4213_s16 }
 0x1ab   :  { %3367 = vmatpush1.bf16.msra.mxu0 %v5500_v13  ;;  %3695 = vmatpush1.bf16.msra.mxu1 %v5503_v28  ;;  %v4707_v13 = vcombine.high %v515_v20, %v515_v20  ;;  %v4704_v28 = vcombine.low %v514_v19, %v514_v19 }
 0x1ac   :  { %3368 = vmatprep.subr.bf16.mxu0 %v5508_v29  ;;  %3696 = vmatprep.subr.bf16.mxu1 %v5511_v14  ;;  %v4706_v29 = vcombine.low %v515_v20, %v515_v20 }
 0x1ad   :  { %v3089_v14 = vsel %vm3087_vm1, %v4704_v28, 0 }
 0x1af   :  { %3369 = vmatpush1.bf16.msra.mxu0 %v5506_v30  ;;  %3697 = vmatpush1.bf16.msra.mxu1 %v5509_v31  ;;  %v3095_v30 = vsel %vm3087_vm1, %v4706_v29, 0  ;;  %v5602_v31 = vld [vmem:[%s7403_s3 + $0x40] sm:$0xff]  }
 0x1b0   :  { %3370 = vmatprep.subr.bf16.mxu0 %v5514_v25  ;;  %3698 = vmatprep.subr.bf16.mxu1 %v5517_v32  ;;  %v635_v25 = vcombine.high %v7133_v50, %v7133_v50  ;;  %v5595_v32 = vld [vmem:[%s7403_s3 + $0x80] sm:$0xff]  }
 0x1b3   :  { %3371 = vmatpush1.bf16.msra.mxu0 %v5512_v33  ;;  %3699 = vmatpush1.bf16.msra.mxu1 %v5515_v34  ;;  %v5603_v33 = vld [vmem:[%s7403_s3] sm:$0xff]   ;;  %v5657_v34 = vmov 0  }
 0x1b4   :  { %3372 = vmatprep.subr.bf16.mxu0 %v5520_v26  ;;  %3700 = vmatprep.subr.bf16.mxu1 %v5523_v36  ;;  %v5605_v26 = vld [vmem:[%s7403_s3 + $0x48] sm:$0xff]  }
 0x1b5   :  { %v5596_v36 = vld [vmem:[%s7403_s3 + $0x88] sm:$0xff]  }
 0x1b7   :  { %3373 = vmatpush1.bf16.msra.mxu0 %v5518_v38  ;;  %3701 = vmatpush1.bf16.msra.mxu1 %v5521_v21  ;;  %v5606_v38 = vld [vmem:[%s7403_s3 + $0x8] sm:$0xff]   ;;  %v5608_v21 = vld [vmem:[%s7403_s3 + $0x50] sm:$0xff]  }
 0x1b8   :  { %3374 = vmatprep.subr.bf16.mxu0 %v5526_v40  ;;  %3702 = vmatprep.subr.bf16.mxu1 %v5529_v27  ;;  %v5597_v40 = vld [vmem:[%s7403_s3 + $0x90] sm:$0xff]  }
 0x1b9   :  { %v5609_v27 = vld [vmem:[%s7403_s3 + $0x10] sm:$0xff]  }
 0x1bb   :  { %3375 = vmatpush1.bf16.msra.mxu0 %v5524_v41  ;;  %3703 = vmatpush1.bf16.msra.mxu1 %v5527_v43  ;;  %v5611_v41 = vld [vmem:[%s7403_s3 + $0x58] sm:$0xff]  }
 0x1bc   :  { %3376 = vmatprep.subr.bf16.mxu0 %v5532_v44  ;;  %3704 = vmatprep.subr.bf16.mxu1 %v5535_v35  ;;  %v5598_v43 = vld [vmem:[%s7403_s3 + $0x98] sm:$0xff]   ;;  %v5614_v35 = vld [vmem:[%s7403_s3 + $0x60] sm:$0xff]  }
 0x1bd   :  { %v5612_v44 = vld [vmem:[%s7403_s3 + $0x18] sm:$0xff]  }
 0x1bf   :  { %3377 = vmatpush1.bf16.msra.mxu0 %v5530_v45  ;;  %3705 = vmatpush1.bf16.msra.mxu1 %v5533_v46  ;;  %v5599_v45 = vld [vmem:[%s7403_s3 + $0xa0] sm:$0xff]  }
 0x1c0   :  { %3387 = vmatprep.subr.bf16.mxu0 %v5539_v47  ;;  %3715 = vmatprep.subr.bf16.mxu1 %v5542_v37  ;;  %v5615_v46 = vld [vmem:[%s7403_s3 + $0x20] sm:$0xff]   ;;  %v5617_v47 = vld [vmem:[%s7403_s3 + $0x68] sm:$0xff]  }
 0x1c1   :  { %v5600_v37 = vld [vmem:[%s7403_s3 + $0xa8] sm:$0xff]  }
 0x1c2   :  { %3379 = vmatmul.mubr.bf16.vlgmr.msra.gmra.mrb[0].mxu0 %v7133_v50  ;;  %3707 = vmatmul.mubr.bf16.vlgmr.msra.gmra.mrb[0].mxu1 %v7133_v50  ;;  %v5618_v50 = vld [vmem:[%s7403_s3 + $0x28] sm:$0xff]  }
 0x1c3   :  { %3388 = vmatpush1.bf16.msra.mxu0 %v5537_v51  ;;  %3716 = vmatpush1.bf16.msra.mxu1 %v5540_v53  ;;  %v5601_v51 = vld [vmem:[%s7403_s3 + $0xb0] sm:$0xff]   ;;  %v5604_v53 = vld [vmem:[%s7403_s3 + $0xb8] sm:$0xff]  }
 0x1c4   :  { %3389 = vmatprep.subr.bf16.mxu0 %v5545_v54  ;;  %3717 = vmatprep.subr.bf16.mxu1 %v5548_v49  ;;  %v5607_v54 = vld [vmem:[%s7403_s3 + $0xc0] sm:$0xff]   ;;  %v5610_v49 = vld [vmem:[%s7403_s3 + $0xc8] sm:$0xff]  }
 0x1c5   :  { %4709 = vmatprep.mubr.msk.bf16.mxu0 %vm3083_vm0, %v637_v39  ;;  %4711 = vmatprep.mubr.msk.bf16.mxu1 %vm3083_vm0, %v637_v39  ;;  %v5613_v39 = vld [vmem:[%s7403_s3 + $0xd0] sm:$0xff]  }
 0x1c7   :  { %3390 = vmatpush1.bf16.msra.mxu0 %v5543_v55  ;;  %3718 = vmatpush1.bf16.msra.mxu1 %v5546_v56  ;;  %v5616_v55 = vld [vmem:[%s7403_s3 + $0xd8] sm:$0xff]   ;;  %v5619_v56 = vld [vmem:[%s7403_s3 + $0xe0] sm:$0xff]  }
 0x1c8   :  { %3391 = vmatprep.subr.bf16.mxu0 %v5551_v48  ;;  %3719 = vmatprep.subr.bf16.mxu1 %v5554_v57  ;;  %v5620_v48 = vld [vmem:[%s7403_s3 + $0x70] sm:$0xff]  }
 0x1c9   :  { %v5621_v57 = vld [vmem:[%s7403_s3 + $0x30] sm:$0xff]  }
 0x1cb   :  { %3392 = vmatpush1.bf16.msra.mxu0 %v5549_v58  ;;  %3720 = vmatpush1.bf16.msra.mxu1 %v5552_v59  ;;  %v5622_v58 = vld [vmem:[%s7403_s3 + $0xe8] sm:$0xff]   ;;  %v5623_v59 = vld [vmem:[%s7403_s3 + $0x78] sm:$0xff]  }
 0x1cc   :  { %3393 = vmatprep.subr.bf16.mxu0 %v5557_v60  ;;  %3721 = vmatprep.subr.bf16.mxu1 %v5560_v61  ;;  %v5625_v60 = vld [vmem:[%s7403_s3 + $0xf0] ss:$0 sps:$4 sm:$0x77]   ;;  %v5624_v61 = vld [vmem:[%s7403_s3 + $0x38] sm:$0xff]  }
 0x1cf   :  { %3394 = vmatpush1.bf16.msra.mxu0 %v5555_v62  ;;  %3722 = vmatpush1.bf16.msra.mxu1 %v5558_v63  ;;  %v4021_v62 = vsel %vm4019_vm2, %v5625_v60, 0  ;;  %v5658_v63 = vmov 0.0  }
 0x1d0   :  { %3395 = vmatprep.subr.bf16.mxu0 %v5563_v0  ;;  %3723 = vmatprep.subr.bf16.mxu1 %v5566_v1  ;;  %v520_v0 = vsub.s32 0, %v5818_v42  ;;  %v528_v1 = vsub.s32 2, %v5818_v42 }
 0x1d3   :  { %3396 = vmatpush1.bf16.msra.mxu0 %v5561_v2  ;;  %3724 = vmatpush1.bf16.msra.mxu1 %v5564_v3  ;;  %v516_v2 = vld [vmem:[%s7402_s2] sm:$0xf]  ;;  %v524_v3 = vsub.s32 1, %v5818_v42 }
 0x1d4   :  { %3397 = vmatprep.subr.bf16.mxu0 %v5569_v4  ;;  %3725 = vmatprep.subr.bf16.mxu1 %v5572_v5  ;;  %v532_v4 = vsub.s32 3, %v5818_v42  ;;  %v521_v5 = vrot.slane %v516_v2, %v520_v0 }
 0x1d7   :  { %3398 = vmatpush1.bf16.msra.mxu0 %v5567_v6  ;;  %3726 = vmatpush1.bf16.msra.mxu1 %v5570_v7  ;;  %v529_v6 = vrot.slane %v516_v2, %v528_v1  ;;  %v525_v7 = vrot.slane %v516_v2, %v524_v3 }
 0x1d8   :  { %3399 = vmatprep.subr.bf16.mxu0 %v5575_v8  ;;  %3727 = vmatprep.subr.bf16.mxu1 %v5578_v9  ;;  %v533_v8 = vrot.slane %v516_v2, %v532_v4 }
 0x1db   :  { %3400 = vmatpush1.bf16.msra.mxu0 %v5573_v10  ;;  %3728 = vmatpush1.bf16.msra.mxu1 %v5576_v11 }
 0x1dc   :  { %3401 = vmatprep.subr.bf16.mxu0 %v5581_v12  ;;  %3729 = vmatprep.subr.bf16.mxu1 %v5584_v52 }
 0x1df   :  { %3402 = vmatpush1.bf16.msra.mxu0 %v5579_v15  ;;  %3730 = vmatpush1.bf16.msra.mxu1 %v5582_v16 }
 0x1e0   :  { %3403 = vmatprep.subr.bf16.mxu0 %v5587_v17  ;;  %3731 = vmatprep.subr.bf16.mxu1 %v5590_v18 }
 0x1e3   :  { %3404 = vmatpush1.bf16.msra.mxu0 %v5585_v22  ;;  %3732 = vmatpush1.bf16.msra.mxu1 %v5588_v23 }
 0x1e4   :  { %4708 = vmatprep.subr.msk.bf16.mxu0 %vm3087_vm1, %v4705_v24  ;;  %4710 = vmatprep.subr.msk.bf16.mxu1 %vm3087_vm1, %v4707_v13 }
 0x1e7   :  { %3406 = vmatpush1.bf16.msra.mxu0 %v3089_v14  ;;  %3734 = vmatpush1.bf16.msra.mxu1 %v3095_v30  ;;  %v5626_v14 = vld [vmem:[%s7405_s5] sm:$0xff]  }
 0x1e8   :  { %4063 = vmatprep.subr.bf16.mxu1 %v5657_v34  ;;  %4753 = vmatprep.subr.bf16.mxu0 %v5602_v31 }
 0x1ea   :  { %3420 = vmatmul.mubr.bf16.vlgmr.msra.gmra.mrb[0].mxu0 %v635_v25  ;;  %3748 = vmatmul.mubr.bf16.vlgmr.msra.gmra.mrb[0].mxu1 %v635_v25  ;;  %v5627_v25 = vld [vmem:[%s7405_s5 + $0x8] sm:$0xff]  }
 0x1eb   :  { %4064 = vmatpush1.bf16.msra.mxu1 %v5595_v32  ;;  %4754 = vmatpush3.bf16.msra.mxu0 %v5603_v33  ;;  %v5628_v32 = vld [vmem:[%s7405_s5 + $0x10] sm:$0xff]   ;;  %v5629_v33 = vld [vmem:[%s7405_s5 + $0x18] sm:$0xff]  }
 0x1ec   :  { %4065 = vmatprep.subr.bf16.mxu1 %v5657_v34  ;;  %4755 = vmatprep.subr.bf16.mxu0 %v5605_v26  ;;  %v5631_v26 = vld [vmem:[%s7405_s5 + $0x28] ss:$0 sps:$4 sm:$0x33]  }
 0x1ef   :  { %4066 = vmatpush1.bf16.msra.mxu1 %v5596_v36  ;;  %4756 = vmatpush3.bf16.msra.mxu0 %v5606_v38  ;;  %v4162_v36 = vsel %vm4160_vm4, %v5631_v26, 0 }
 0x1f0   :  { %4067 = vmatprep.subr.bf16.mxu1 %v5657_v34  ;;  %4757 = vmatprep.subr.bf16.mxu0 %v5608_v21 }
 0x1f3   :  { %4068 = vmatpush1.bf16.msra.mxu1 %v5597_v40  ;;  %4758 = vmatpush3.bf16.msra.mxu0 %v5609_v27  ;;  %v4712_v40 = vld [vmem:[%s7404_s4] ss:$0 sm:$0xff]  ;;  %s5632_s4 = scalar_lea.vmem %s4213_s16, 32 }
 0x1f4   :  { %4069 = vmatprep.subr.bf16.mxu1 %v5657_v34  ;;  %4759 = vmatprep.subr.bf16.mxu0 %v5611_v41  ;;  %p5633_p0 = scmp.ne.s32.totalorder %s4213_s16, %s5632_s4  ;;  %p5638_p2 = scmp.lt.s32.totalorder %s5632_s4, %s5632_s4 }
 0x1f6   :  { %p5639_p3 = por %p5638_p2, %p5637_p1 }
 0x1f7   :  { %4070 = vmatpush1.bf16.msra.mxu1 %v5598_v43  ;;  %4760 = vmatpush3.bf16.msra.mxu0 %v5612_v44 }
 0x1f8   :  { %4071 = vmatprep.subr.bf16.mxu1 %v5657_v34  ;;  %4761 = vmatprep.subr.bf16.mxu0 %v5614_v35  ;;  %p5640_p4 = pnand %p5639_p3, %p5633_p0 }
 0x1fb   :  { %4072 = vmatpush1.bf16.msra.mxu1 %v5599_v45  ;;  %4762 = vmatpush3.bf16.msra.mxu0 %v5615_v46 }
 0x1fc   :  { %4073 = vmatprep.subr.bf16.mxu1 %v5657_v34  ;;  %4763 = vmatprep.subr.bf16.mxu0 %v5617_v47 }
 0x1ff   :  { %4074 = vmatpush1.bf16.msra.mxu1 %v5600_v37  ;;  %4764 = vmatpush3.bf16.msra.mxu0 %v5618_v50 }
 0x200   :  { %4075 = vmatprep.subr.bf16.mxu1 %v5657_v34  ;;  %4765 = vmatprep.subr.bf16.mxu0 %v5620_v48 }
 0x203   :  { %4076 = vmatpush1.bf16.msra.mxu1 %v5601_v51  ;;  %4766 = vmatpush3.bf16.msra.mxu0 %v5621_v57 }
 0x204   :  { %4077 = vmatprep.subr.bf16.mxu1 %v5657_v34  ;;  %4767 = vmatprep.subr.bf16.mxu0 %v5623_v59 }
 0x207   :  { %4078 = vmatpush1.bf16.msra.mxu1 %v5604_v53  ;;  %4768 = vmatpush3.bf16.msra.mxu0 %v5624_v61  ;;  %v4745_v53 = vld [vmem:[%s7406_s6] ss:$0 sm:$0xff] }
 0x208   :  { %4079 = vmatprep.subr.bf16.mxu1 %v5657_v34  ;;  %4782 = vmatprep.subr.bf16.mxu0 %v5658_v63 }
 0x20b   :  { %4080 = vmatpush1.bf16.msra.mxu1 %v5607_v54 }
 0x20c   :  { %4081 = vmatprep.subr.bf16.mxu1 %v5657_v34 }
 0x20f   :  { %4082 = vmatpush1.bf16.msra.mxu1 %v5610_v49 }
 0x210   :  { %4083 = vmatprep.subr.bf16.mxu1 %v5657_v34 }
 0x213   :  { %4084 = vmatpush1.bf16.msra.mxu1 %v5613_v39 }
 0x214   :  { %4085 = vmatprep.subr.bf16.mxu1 %v5657_v34 }
 0x217   :  { %4086 = vmatpush1.bf16.msra.mxu1 %v5616_v55 }
 0x218   :  { %4087 = vmatprep.subr.bf16.mxu1 %v5657_v34 }
 0x21b   :  { %4088 = vmatpush1.bf16.msra.mxu1 %v5619_v56 }
 0x21c   :  { %4089 = vmatprep.subr.bf16.mxu1 %v5657_v34 }
 0x21f   :  { %4090 = vmatpush1.bf16.msra.mxu1 %v5622_v58 }
 0x220   :  { %4091 = vmatprep.subr.bf16.mxu1 %v5657_v34  ;;  %v5630_v34 = vld [vmem:[%s7405_s5 + $0x20] sm:$0xff]  }
 0x223   :  { %4092 = vmatpush1.bf16.msra.mxu1 %v4021_v62 }
 0x2bd   :  { %v3421_v9 = vpop.f32.mrb[0].mxu0  ;;  %v3749_v10 = vpop.f32.mrb[0].mxu1 }
 0x2be   :  { %v4798_v11 = vadd.f32 %v3421_v9, %v521_v5  ;;  %v4800_v12 = vadd.f32 %v3749_v10, %v529_v6  ;;  %v3423_v52 = vpop.f32.mrb[1].mxu0  ;;  %v3751_v15 = vpop.f32.mrb[1].mxu1 }
 0x2bf   :  { %v4799_v16 = vadd.f32 %v3423_v52, %v525_v7  ;;  %v4801_v17 = vadd.f32 %v3751_v15, %v533_v8  ;;  %v3425_v18 = vpop.f32.mrb[2].mxu0  ;;  %v3753_v19 = vpop.f32.mrb[2].mxu1 }
 0x2c0   :  { %v3756_v20 = vmax.f32 %v4798_v11, 0.0  ;;  %v3758_v22 = vmax.f32 %v4800_v12, 0.0  ;;  %v3426_v23 = vpop.f32.mrb[3].mxu0  ;;  %v3754_v24 = vpop.f32.mrb[3].mxu1 }
 0x2c1   :  { %v3757_v13 = vmax.f32 %v4799_v16, 0.0  ;;  %v3759_v42 = vmax.f32 %v4801_v17, 0.0 }
 0x2c2   :  { %v3760_v30 = vpack.c.bf16 %v3756_v20, %v3756_v20  ;;  %v3762_v31 = vpack.c.bf16 %v3758_v22, %v3758_v22 }
 0x2c3   :  { %v3761_v28 = vpack.c.bf16 %v3757_v13, %v3757_v13  ;;  %v3763_v29 = vpack.c.bf16 %v3759_v42, %v3759_v42 }
 0x2c5   :  { %4055 = vmatprep.mubr.bf16.mxu0 %v3761_v28  ;;  %4744 = vmatprep.mubr.msk.bf16.mxu1 %vm4015_vm3, %v3763_v29 }
 0x2c6   :  { %4056 = vmatmul.mubr.bf16.vlgmr.msra.gmra.mrb[4].mxu0 %v3760_v30  ;;  %4096 = vmatmul.mubr.bf16.vlgmr.msra.gmra.mrb[4].mxu1 %v3762_v31 }
 0x2c7   :  { %4783 = vmatpush3.bf16.msra.mxu0 %v5626_v14  ;;  %4794 = vmatprep.mubr.msk.bf16.mxu0 %vm5659_vm5, %v5658_v63 }
 0x2c8   :  { %4784 = vmatprep.subr.bf16.mxu0 %v5658_v63 }
 0x2cb   :  { %4785 = vmatpush3.bf16.msra.mxu0 %v5627_v25 }
 0x2cc   :  { %4786 = vmatprep.subr.bf16.mxu0 %v5658_v63 }
 0x2cf   :  { %4787 = vmatpush3.bf16.msra.mxu0 %v5628_v32 }
 0x2d0   :  { %4788 = vmatprep.subr.bf16.mxu0 %v5658_v63 }
 0x2d3   :  { %4789 = vmatpush3.bf16.msra.mxu0 %v5629_v33 }
 0x2d4   :  { %4790 = vmatprep.subr.bf16.mxu0 %v5658_v63 }
 0x2d7   :  { %4791 = vmatpush3.bf16.msra.mxu0 %v5630_v34 }
 0x2d8   :  { %4792 = vmatprep.subr.bf16.mxu0 %v5658_v63 }
 0x2db   :  { %4793 = vmatpush3.bf16.msra.mxu0 %v4162_v36 }
 0x399   :  { %v4769_v38 = vpop.f32.mrb[4].mxu0  ;;  %v4097_v21 = vpop.f32.mrb[4].mxu1 }
 0x39a   :  { %v4770_v27 = vpop.f32.mrb[5].mxu0  ;;  %v4099_v41 = vpop.f32.mrb[5].mxu1 }
 0x39b   :  { %v4771_v43 = vadd.f32 %v4770_v27, %v4769_v38  ;;  %v4772_v44 = vpop.f32.mrb[6].mxu0  ;;  %v4100_v35 = vpop.f32.mrb[6].mxu1 }
 0x39c   :  { %v4773_v45 = vpop.f32.mrb[7].mxu0  ;;  %v4101_v46 = vpop.f32.mrb[7].mxu1 }
 0x39d   :  { %v4058_v47 = vadd.f32 %v4771_v43, %v4712_v40 }
 0x39f   :  { %v4098_v37 = vadd.f32 %v4097_v21, %v4058_v47 }
 0x3a1   :  { %v4103_v50 = vmax.f32 %v4098_v37, 0.0 }
 0x3a3   :  { %v4104_v51 = vpack.c.bf16 %v4103_v50, %v4103_v50 }
 0x3a5   :  { %4795 = vmatmul.mubr.msk.bf16.vlgmr.msra.gmra.mrb[8].mxu0 %vm4156_vm6, %v4104_v51 }
 0x478   :  { %v4198_v54 = vpop.f32.mrb[8].mxu0 }
 0x479   :  { %v4199_v49 = vadd.f32 %v4745_v53, %v4198_v54  ;;  %v4796_v39 = vpop.f32.mrb[9].mxu0 }
 0x47a   :  { %v4201_v55 = vpop.f32.mrb[10].mxu0 }
 0x47b   :  { %v4797_v56 = vpop.f32.mrb[11].mxu0  ;;  %4205 = vst.msk [vmem:[#allocation2] sm:$0x3] %vm4204_vm7, %v4199_v49 }
 0x47c   :  { %5643 = shalt.err (!%p5640_p4)
}
 0x47d   :  { %s5644_s6 = scalar_lea.hbm %s7407_s7, 32 }
 0x47e   :  { %p5645_p5 = scmp.ne.s32.totalorder %s7407_s7, %s5644_s6  ;;  %p5648_p6 = scmp.lt.u32.totalorder %s5644_s6, %s7407_s7 }
 0x480   :  { %p5650_p7 = pnand %p5648_p6, %p5645_p5 }
 0x482   :  { %5653 = shalt.err (!%p5650_p7)
}
 0x483   :  { %4215 = dma.vmem_to_hbm [thread:$0]  %s4213_s16, 32, %s7407_s7, [#allocation3]  }
 0x484   :  { %5654 = dma.done.wait [#allocation3], 32  }
 0x485   :  { %5655 = vsyncadd [#allocation3], 4294967264 }
 0x486   :  { %4219 = vsyncpa [#allocation3], 1 }

</bundles_post_ra>
